<compile_context>
chip_gen: v7x
topology: tpu7x:2x2x1
jax: 0.10.0
libtpu: 0.0.40
codegen_flags: <defaults>
</compile_context>

<pallas_src>
import functools

import numpy as np
import jax
import jax.numpy as jnp
from jax.experimental import pallas as pl
from jax.experimental.pallas import tpu as pltpu

IMAGENET_MEAN = np.array([0.485, 0.456, 0.406], dtype=np.float32)
IMAGENET_STD = np.array([0.229, 0.224, 0.225], dtype=np.float32)
_BIAS = (-IMAGENET_MEAN / IMAGENET_STD).astype(np.float32)   # per-channel bias
OUT_HW = 224                                   # Resize((224, 224))
OUT_PAD = ((OUT_HW + 127) // 128) * 128        # 256: lane-dense intermediate
_VMEM_LIMIT = 32 * 1024 * 1024                 # safe across v5e / v6e / v7x


def _bilinear_matrix(out_size: int, in_size: int) -> np.ndarray:
    """Resampling matrix matching torch bilinear (align_corners=False).

    Exact for upsampling (torchvision antialias is a no-op when out >= in).
    """
    i = np.arange(out_size, dtype=np.float64)
    src = (i + 0.5) * (in_size / out_size) - 0.5
    i0 = np.floor(src)
    frac = (src - i0).astype(np.float32)
    lo = np.clip(i0, 0, in_size - 1).astype(np.int64)
    hi = np.clip(i0 + 1, 0, in_size - 1).astype(np.int64)
    m = np.zeros((out_size, in_size), dtype=np.float32)
    np.add.at(m, (np.arange(out_size), lo), 1.0 - frac)
    np.add.at(m, (np.arange(out_size), hi), frac)
    return m


# ---------------------------------------------------------------------------
# Fused kernel (single invocation, no grid):
#   stage 1: tmp = x_flat @ RwT            (C*H, W) @ (W, 256) -> VMEM scratch
#   stage 2: out[c] = (Rh/std[c]) @ tmp[c*H:(c+1)*H] + (-mean[c]/std[c])
#            stored 224-wide directly.
# ---------------------------------------------------------------------------
def _fused_resize_norm_kernel(x_ref, rwt_ref, rh_ref, o_ref, tmp_ref, *, C, H):
    # Stage 1: column resample, one lane-dense MXU matmul over all channels.
    tmp_ref[...] = jnp.dot(x_ref[...], rwt_ref[...],
                           preferred_element_type=jnp.float32,
                           precision=jax.lax.Precision.HIGHEST)
    # Stage 2: row resample + fused normalization (static C=3 loop; static
    # pl.ds slices into the VMEM scratch are zero-cost ref views).
    for c in range(C):
        acc = jnp.dot(rh_ref[c], tmp_ref[pl.ds(c * H, H), :],
                      preferred_element_type=jnp.float32,
                      precision=jax.lax.Precision.HIGHEST)
        o_ref[c, :, :] = acc[:, :OUT_HW] + jnp.float32(_BIAS[c])


def resize_and_normalize(img_chw: jax.Array) -> jax.Array:
    C, H, W = img_chw.shape
    if C != 3:
        raise ValueError(f"ImageNet normalization expects 3 channels, got {C}")

    stdinv = (1.0 / IMAGENET_STD).astype(np.float32)
    # Row-resample matrix with 1/std folded in: (C, 224, H).
    rh = _bilinear_matrix(OUT_HW, H)
    rh_scaled = jnp.asarray(rh[None, :, :] * stdinv[:, None, None])
    # Column-resample matrix, transposed and zero-padded to 256 lanes: (W, 256).
    rwt_np = np.zeros((W, OUT_PAD), dtype=np.float32)
    rwt_np[:, :OUT_HW] = _bilinear_matrix(OUT_HW, W).T
    rwt = jnp.asarray(rwt_np)

    # Merge channel/row axes so stage 1 is one matmul (bitcast-level reshape).
    x_flat = img_chw.reshape(C * H, W)

    kernel = functools.partial(_fused_resize_norm_kernel, C=C, H=H)
    vmem_spec = pl.BlockSpec(memory_space=pltpu.MemorySpace.VMEM)
    return pl.pallas_call(
        kernel,
        out_shape=jax.ShapeDtypeStruct((C, OUT_HW, OUT_HW), jnp.float32),
        in_specs=[vmem_spec, vmem_spec, vmem_spec],
        out_specs=vmem_spec,
        scratch_shapes=[pltpu.VMEM((C * H, OUT_PAD), jnp.float32)],
        compiler_params=pltpu.CompilerParams(vmem_limit_bytes=_VMEM_LIMIT),
    )(x_flat, rwt, rh_scaled)


def yolo_base_model_forward(data: jax.Array) -> jax.Array:
    # Detector branch omitted (dead code w.r.t. the returned tensor; see TODO).
    return resize_and_normalize(data)


if __name__ == "__main__":
    key = jax.random.PRNGKey(0)
    C, H, W = 3, 32, 32
    data = jax.random.uniform(key, (C, H, W), dtype=jnp.float32)

    fwd = jax.jit(yolo_base_model_forward)
    out = jax.block_until_ready(fwd(data))

    assert out.shape == (C, OUT_HW, OUT_HW) and out.dtype == jnp.float32

    # Float64 host reference of Resize(224,224) + Normalize.
    rh64 = _bilinear_matrix(OUT_HW, H).astype(np.float64)
    rw64 = _bilinear_matrix(OUT_HW, W).astype(np.float64)
    x64 = np.asarray(data, dtype=np.float64)
    ref = np.einsum("oh,chw,pw->cop", rh64, x64, rw64)
    ref = (ref - IMAGENET_MEAN.reshape(3, 1, 1)) / IMAGENET_STD.reshape(3, 1, 1)
    err = float(np.max(np.abs(np.asarray(out, dtype=np.float64) - ref)))
    assert err < 1e-3, f"max abs error {err}"

    print("KERNEL_OK")
</pallas_src>

<mosaic_0001>
module attributes {stable_mosaic.version = 11 : i64} {
  func.func @_fused_resize_norm_kernel(%arg0: memref<96x32xf32, #tpu.memory_space<vmem>>, %arg1: memref<32x256xf32, #tpu.memory_space<vmem>>, %arg2: memref<3x224x32xf32, #tpu.memory_space<vmem>>, %arg3: memref<3x224x224xf32, #tpu.memory_space<vmem>>, %arg4: memref<96x256xf32, #tpu.memory_space<vmem>>) attributes {dimension_semantics = [], scalar_prefetch = 0 : i64, scratch_operands = 1 : i64, tpu.core_type = #tpu.core_type<tc>} {
    %c0 = arith.constant 0 : index
    %c0_0 = arith.constant 0 : index
    %0 = vector.load %arg0[%c0, %c0_0] : memref<96x32xf32, #tpu.memory_space<vmem>>, vector<96x32xf32>
    %c0_1 = arith.constant 0 : index
    %c0_2 = arith.constant 0 : index
    %1 = vector.load %arg1[%c0_1, %c0_2] : memref<32x256xf32, #tpu.memory_space<vmem>>, vector<32x256xf32>
    %cst = arith.constant dense<0.000000e+00> : vector<96x256xf32>
    %2 = tpu.matmul %0, %1, %cst {dimension_numbers = #tpu.dot_dimension_numbers<[1], [0], [0], [1], [0, 0, 1, 1], [], []>, precision = #tpu.contract_precision<fp32>} : vector<96x32xf32>, vector<32x256xf32>, vector<96x256xf32> -> vector<96x256xf32>
    %c0_3 = arith.constant 0 : index
    %c0_4 = arith.constant 0 : index
    %3 = vector.load %arg4[%c0_3, %c0_4] : memref<96x256xf32, #tpu.memory_space<vmem>>, vector<96x256xf32>
    tpu.vector_store %arg4[%c0_3, %c0_4], %2 {strides = array<i32>} : memref<96x256xf32, #tpu.memory_space<vmem>>, vector<96x256xf32>,
    %c0_5 = arith.constant 0 : index
    %c0_6 = arith.constant 0 : index
    %c0_7 = arith.constant 0 : index
    %4 = vector.load %arg2[%c0_5, %c0_6, %c0_7] : memref<3x224x32xf32, #tpu.memory_space<vmem>>, vector<1x224x32xf32>
    %5 = vector.shape_cast %4 : vector<1x224x32xf32> to vector<224x32xf32>
    %c0_8 = arith.constant 0 : index
    %c0_9 = arith.constant 0 : index
    %6 = vector.load %arg4[%c0_8, %c0_9] : memref<96x256xf32, #tpu.memory_space<vmem>>, vector<32x256xf32>
    %cst_10 = arith.constant dense<0.000000e+00> : vector<224x256xf32>
    %7 = tpu.matmul %5, %6, %cst_10 {dimension_numbers = #tpu.dot_dimension_numbers<[1], [0], [0], [1], [0, 0, 1, 1], [], []>, precision = #tpu.contract_precision<fp32>} : vector<224x32xf32>, vector<32x256xf32>, vector<224x256xf32> -> vector<224x256xf32>
    %8 = vector.extract_strided_slice %7 {offsets = [0, 0], sizes = [224, 224], strides = [1, 1]} : vector<224x256xf32> to vector<224x224xf32>
    %cst_11 = arith.constant -2.11790395 : f32
    %9 = vector.broadcast %cst_11 : f32 to vector<224x224xf32>
    %10 = arith.addf %8, %9 : vector<224x224xf32>
    %c0_12 = arith.constant 0 : index
    %c0_13 = arith.constant 0 : index
    %c0_14 = arith.constant 0 : index
    %11 = vector.load %arg3[%c0_12, %c0_13, %c0_14] : memref<3x224x224xf32, #tpu.memory_space<vmem>>, vector<1x224x224xf32>
    %12 = vector.shape_cast %11 : vector<1x224x224xf32> to vector<224x224xf32>
    %13 = vector.shape_cast %10 : vector<224x224xf32> to vector<1x224x224xf32>
    tpu.vector_store %arg3[%c0_12, %c0_13, %c0_14], %13 {strides = array<i32>} : memref<3x224x224xf32, #tpu.memory_space<vmem>>, vector<1x224x224xf32>,
    %c1 = arith.constant 1 : index
    %c0_15 = arith.constant 0 : index
    %c0_16 = arith.constant 0 : index
    %14 = vector.load %arg2[%c1, %c0_15, %c0_16] : memref<3x224x32xf32, #tpu.memory_space<vmem>>, vector<1x224x32xf32>
    %15 = vector.shape_cast %14 : vector<1x224x32xf32> to vector<224x32xf32>
    %c32 = arith.constant 32 : index
    %c0_17 = arith.constant 0 : index
    %16 = vector.load %arg4[%c32, %c0_17] : memref<96x256xf32, #tpu.memory_space<vmem>>, vector<32x256xf32>
    %cst_18 = arith.constant dense<0.000000e+00> : vector<224x256xf32>
    %17 = tpu.matmul %15, %16, %cst_18 {dimension_numbers = #tpu.dot_dimension_numbers<[1], [0], [0], [1], [0, 0, 1, 1], [], []>, precision = #tpu.contract_precision<fp32>} : vector<224x32xf32>, vector<32x256xf32>, vector<224x256xf32> -> vector<224x256xf32>
    %18 = vector.extract_strided_slice %17 {offsets = [0, 0], sizes = [224, 224], strides = [1, 1]} : vector<224x256xf32> to vector<224x224xf32>
    %cst_19 = arith.constant -2.03571415 : f32
    %19 = vector.broadcast %cst_19 : f32 to vector<224x224xf32>
    %20 = arith.addf %18, %19 : vector<224x224xf32>
    %c1_20 = arith.constant 1 : index
    %c0_21 = arith.constant 0 : index
    %c0_22 = arith.constant 0 : index
    %21 = vector.load %arg3[%c1_20, %c0_21, %c0_22] : memref<3x224x224xf32, #tpu.memory_space<vmem>>, vector<1x224x224xf32>
    %22 = vector.shape_cast %21 : vector<1x224x224xf32> to vector<224x224xf32>
    %23 = vector.shape_cast %20 : vector<224x224xf32> to vector<1x224x224xf32>
    tpu.vector_store %arg3[%c1_20, %c0_21, %c0_22], %23 {strides = array<i32>} : memref<3x224x224xf32, #tpu.memory_space<vmem>>, vector<1x224x224xf32>,
    %c2 = arith.constant 2 : index
    %c0_23 = arith.constant 0 : index
    %c0_24 = arith.constant 0 : index
    %24 = vector.load %arg2[%c2, %c0_23, %c0_24] : memref<3x224x32xf32, #tpu.memory_space<vmem>>, vector<1x224x32xf32>
    %25 = vector.shape_cast %24 : vector<1x224x32xf32> to vector<224x32xf32>
    %c64 = arith.constant 64 : index
    %c0_25 = arith.constant 0 : index
    %26 = vector.load %arg4[%c64, %c0_25] : memref<96x256xf32, #tpu.memory_space<vmem>>, vector<32x256xf32>
    %cst_26 = arith.constant dense<0.000000e+00> : vector<224x256xf32>
    %27 = tpu.matmul %25, %26, %cst_26 {dimension_numbers = #tpu.dot_dimension_numbers<[1], [0], [0], [1], [0, 0, 1, 1], [], []>, precision = #tpu.contract_precision<fp32>} : vector<224x32xf32>, vector<32x256xf32>, vector<224x256xf32> -> vector<224x256xf32>
    %28 = vector.extract_strided_slice %27 {offsets = [0, 0], sizes = [224, 224], strides = [1, 1]} : vector<224x256xf32> to vector<224x224xf32>
    %cst_27 = arith.constant -1.80444443 : f32
    %29 = vector.broadcast %cst_27 : f32 to vector<224x224xf32>
    %30 = arith.addf %28, %29 : vector<224x224xf32>
    %c2_28 = arith.constant 2 : index
    %c0_29 = arith.constant 0 : index
    %c0_30 = arith.constant 0 : index
    %31 = vector.load %arg3[%c2_28, %c0_29, %c0_30] : memref<3x224x224xf32, #tpu.memory_space<vmem>>, vector<1x224x224xf32>
    %32 = vector.shape_cast %31 : vector<1x224x224xf32> to vector<224x224xf32>
    %33 = vector.shape_cast %30 : vector<224x224xf32> to vector<1x224x224xf32>
    tpu.vector_store %arg3[%c2_28, %c0_29, %c0_30], %33 {strides = array<i32>} : memref<3x224x224xf32, #tpu.memory_space<vmem>>, vector<1x224x224xf32>,
    return
  }
}

</mosaic_0001>

<bundles_post_ra>
// kernel: yolo_base_model_forward.1
= control target key start
LH: loop header
LB: loop body
LE: loop exit
PB: predicated region body
PF: predicated region fallthrough
CT: control target
= control target key end

     0   :  { %8 = vsyncpa [#allocation4], 0  ;;  %s11709_s0 = inlined_call_operand.hbm [shape: f32[96,32], index: 0, kind: input, shape index: {}]   ;;  %s11710_s1 = inlined_call_operand.hbm [shape: f32[32,256], index: 1, kind: input, shape index: {}]   ;;  %s11711_s2 = inlined_call_operand.hbm [shape: f32[3,224,32], index: 2, kind: input, shape index: {}]   ;;  %s11712_s3 = inlined_call_operand.hbm [shape: f32[3,224,224], index: 3, kind: output, shape index: {}]  }
   0x1   :  { %9 = vsyncpa [#allocation7], 0 }
   0x2   :  { %10 = vsyncpa [#allocation5], 0  ;;  %s8795_s12 = smov [#allocation6]   ;;  %s8701_s16 = scalar_lea.hbm %s11710_s1, 1024 }
   0x3   :  { %s28_s13 = sshll.u32 %s8795_s12, 4  ;;  %p8702_p0 = scmp.ne.s32.totalorder %s11710_s1, %s8701_s16  ;;  %s29_s13 = int_to_ptr.vmem [resolvable:$true] %s28_s13 }
   0x4   :  { %p8705_p1 = scmp.lt.u32.totalorder %s8701_s16, %s11710_s1 }
   0x6   :  { %p8707_p2 = pnand %p8705_p1, %p8702_p0 }
   0x8   :  { %8710 = shalt.err (!%p8707_p2)
}
   0x9   :  { %s8711_s21 = scalar_lea.vmem %s29_s13, 1024  ;;  %p8716_p4 = scmp.lt.s32.totalorder %s29_s13, %s29_s13 }
   0xa   :  { %p8712_p3 = scmp.ne.s32.totalorder %s29_s13, %s8711_s21  ;;  %p8717_p5 = scmp.lt.s32.totalorder %s8711_s21, %s8711_s21 }
   0xc   :  { %p8718_p6 = por %p8717_p5, %p8716_p4 }
   0xe   :  { %p8719_p7 = pnand %p8718_p6, %p8712_p3 }
  0x10   :  { %8722 = shalt.err (!%p8719_p7)
}
  0x11   :  { %s8796_s22 = smov 256   ;;  %s8797_s23 = smov 16  }
  0x12   :  { %34 = dma.hbm_to_vmem [thread:$0]  %s11710_s1, 1024, %s29_s13, [#allocation7], %s8796_s22, %s8796_s22, %s8797_s23  }
  0x13   :  { %s8798_s26 = smov [#allocation3]   ;;  %s8723_s30 = scalar_lea.hbm %s11709_s0, 1536 }
  0x14   :  { %s16_s27 = sshll.u32 %s8798_s26, 4  ;;  %p8724_p8 = scmp.ne.s32.totalorder %s11709_s0, %s8723_s30  ;;  %s17_s27 = int_to_ptr.vmem [resolvable:$true] %s16_s27 }
  0x15   :  { %p8727_p9 = scmp.lt.u32.totalorder %s8723_s30, %s11709_s0 }
  0x17   :  { %p8729_p10 = pnand %p8727_p9, %p8724_p8 }
  0x19   :  { %8732 = shalt.err (!%p8729_p10)
}
  0x1a   :  { %s8733_s8 = scalar_lea.vmem %s17_s27, 1536  ;;  %p8738_p12 = scmp.lt.s32.totalorder %s17_s27, %s17_s27 }
  0x1b   :  { %p8734_p11 = scmp.ne.s32.totalorder %s17_s27, %s8733_s8  ;;  %p8739_p13 = scmp.lt.s32.totalorder %s8733_s8, %s8733_s8 }
  0x1d   :  { %p8740_p0 = por %p8739_p13, %p8738_p12 }
  0x1f   :  { %p8741_p1 = pnand %p8740_p0, %p8734_p11 }
  0x21   :  { %8744 = shalt.err (!%p8741_p1)
}
  0x22   :  { %s8799_s1 = smov 128   ;;  %s8800_s9 = smov 8  }
  0x23   :  { %22 = dma.hbm_to_vmem [thread:$0]  %s11709_s0, 1536, %s17_s27, [#allocation4], %s8799_s1, %s8799_s1, %s8800_s9  }
  0x24   :  { %s8801_s12 = smov [#allocation8]   ;;  %s8745_s16 = scalar_lea.hbm %s11711_s2, 10752 }
  0x25   :  { %s40_s13 = sshll.u32 %s8801_s12, 4  ;;  %p8746_p2 = scmp.ne.s32.totalorder %s11711_s2, %s8745_s16  ;;  %s41_s13 = int_to_ptr.vmem [resolvable:$true] %s40_s13 }
  0x26   :  { %p8749_p3 = scmp.lt.u32.totalorder %s8745_s16, %s11711_s2 }
  0x28   :  { %p8751_p4 = pnand %p8749_p3, %p8746_p2 }
  0x2a   :  { %8754 = shalt.err (!%p8751_p4)
}
  0x2b   :  { %s8755_s21 = scalar_lea.vmem %s41_s13, 10752  ;;  %p8760_p6 = scmp.lt.s32.totalorder %s41_s13, %s41_s13 }
  0x2c   :  { %p8756_p5 = scmp.ne.s32.totalorder %s41_s13, %s8755_s21  ;;  %p8761_p7 = scmp.lt.s32.totalorder %s8755_s21, %s8755_s21 }
  0x2e   :  { %p8762_p8 = por %p8761_p7, %p8760_p6 }
  0x30   :  { %p8763_p9 = pnand %p8762_p8, %p8756_p5 }
  0x32   :  { %8766 = shalt.err (!%p8763_p9)
}
  0x33   :  { %46 = dma.hbm_to_vmem [thread:$0]  %s11711_s2, 10752, %s41_s13, [#allocation7], %s8799_s1, %s8799_s1, %s8800_s9  }
  0x34   :  { %8789 = dma.done.wait [#allocation4], 1536  }
  0x35   :  { %8790 = vsyncadd [#allocation4], 4294965760 }
  0x36   :  { %8791 = dma.done.wait [#allocation7], 11776  }
  0x37   :  { %8792 = vsyncadd [#allocation7], 4294955520  ;;  %v11721_v0 = vmov 0.0   ;;  %v69_v1 = vld [vmem:[#allocation6 + $0x8] sm:$0xff]  ;;  %v71_v2 = vld [vmem:[#allocation6 + $0x18] sm:$0xff]  ;;  %vm76_vm0 = vcmask 261120  }
  0x38   :  { %185 = vmatprep.mubr.f32.mxu0 %v11721_v0  ;;  %1964 = vmatprep.mubr.f32.mxu1 %v11721_v0  ;;  %v68_v3 = vld [vmem:[#allocation6] sm:$0xff]  ;;  %v113_v4 = vand.u32 4294901760, %v69_v1  ;;  %v117_v5 = vand.u32 4294901760, %v71_v2  ;;  %v70_v6 = vld [vmem:[#allocation6 + $0x10] sm:$0xff]  ;;  %v73_v8 = vld [vmem:[#allocation6 + $0x28] sm:$0xff]  ;;  %vm3262_vm1 = vcmask 785408  }
  0x39   :  { %v115_v7 = vand.u32 4294901760, %v68_v3  ;;  %v75_v9 = vld [vmem:[#allocation6 + $0x38] sm:$0xff]  ;;  %v119_v10 = vand.u32 4294901760, %v70_v6  ;;  %v121_v11 = vand.u32 4294901760, %v73_v8  ;;  %v72_v13 = vld [vmem:[#allocation6 + $0x20] sm:$0xff]  ;;  %v8865_v14 = vld [vmem:[#allocation6 + $0x30] sm:$0xff] }
  0x3a   :  { %v125_v12 = vand.u32 4294901760, %v75_v9  ;;  %v56_v15 = vld [vmem:[#allocation3] sm:$0xff]  ;;  %v8867_v16 = vpack.c.bf16 %v117_v5, %v113_v4  ;;  %v8869_v17 = vsub.f32 %v69_v1, %v113_v4  ;;  %v8871_v18 = vsub.f32 %v71_v2, %v117_v5  ;;  %v57_v27 = vld [vmem:[#allocation3 + $0x8] sm:$0xff]  ;;  %v58_v32 = vld [vmem:[#allocation3 + $0x10] sm:$0xff]  ;;  %s8803_s2 = smov [#allocation9]  }
  0x3b   :  { %v8873_v19 = vsub.f32 %v68_v3, %v115_v7  ;;  %v8875_v20 = vpack.c.bf16 %v119_v10, %v115_v7  ;;  %v8877_v21 = vsub.f32 %v70_v6, %v119_v10  ;;  %v8882_v23 = vsub.f32 %v73_v8, %v121_v11  ;;  %v59_v33 = vld [vmem:[#allocation3 + $0x18] sm:$0xff]  ;;  %v60_v46 = vld [vmem:[#allocation3 + $0x20] sm:$0xff]  ;;  %v61_v47 = vld [vmem:[#allocation3 + $0x28] sm:$0xff]  ;;  %s7523_s25 = sshll.u32 %s8803_s2, 4  ;;  %s7524_s25 = int_to_ptr.vmem [resolvable:$true] %s7523_s25 }
  0x3c   :  { %v8879_v22 = vpack.c.bf16 %v125_v12, %v121_v11  ;;  %7537 = vmatprep.subr.bf16.mxu0 %v8867_v16  ;;  %v123_v24 = vand.u32 4294901760, %v72_v13  ;;  %v127_v25 = vand.u32 4294901760, %v8865_v14  ;;  %v78_v26 = vsel %vm76_vm0, %v56_v15, 0  ;;  %v62_v60 = vld [vmem:[#allocation3 + $0x30] sm:$0xff]  ;;  %s8767_s26 = scalar_lea.vmem %s7524_s25, 21504  ;;  %p8772_p11 = scmp.lt.s32.totalorder %s7524_s25, %s7524_s25 }
  0x3d   :  { %7539 = vmatpush1.bf16.msra.mxu0 %v8875_v20  ;;  %v8887_v28 = vand.u32 4294901760, %v78_v26  ;;  %v320_v29 = vand.u32 4294901760, %v8869_v17  ;;  %v332_v30 = vand.u32 4294901760, %v8871_v18  ;;  %v326_v31 = vand.u32 4294901760, %v8873_v19  ;;  %p8768_p10 = scmp.ne.s32.totalorder %s7524_s25, %s8767_s26  ;;  %p8773_p12 = scmp.lt.s32.totalorder %s8767_s26, %s8767_s26 }
  0x3e   :  { %7541 = vmatprep.subr.bf16.mxu0 %v8879_v22  ;;  %v8893_v34 = vsub.f32 %v75_v9, %v125_v12  ;;  %v8895_v35 = vpack.c.bf16 %v127_v25, %v123_v24  ;;  %v8897_v36 = vsub.f32 %v72_v13, %v123_v24  ;;  %v338_v37 = vand.u32 4294901760, %v8877_v21 }
  0x3f   :  { %v8901_v38 = vsub.f32 %v78_v26, %v8887_v28  ;;  %v321_v39 = vsub.f32 %v8869_v17, %v320_v29  ;;  %v333_v40 = vsub.f32 %v8871_v18, %v332_v30  ;;  %v327_v41 = vsub.f32 %v8873_v19, %v326_v31  ;;  %p8774_p13 = por %p8773_p12, %p8772_p11 }
  0x40   :  { %v339_v42 = vsub.f32 %v8877_v21, %v338_v37  ;;  %v81_v43 = vsel %vm76_vm0, %v57_v27, 0  ;;  %v84_v44 = vsel %vm76_vm0, %v58_v32, 0  ;;  %v87_v45 = vsel %vm76_vm0, %v59_v33, 0  ;;  %v63_v32 = vld [vmem:[#allocation3 + $0x38] sm:$0xff] }
  0x41   :  { %7543 = vmatpush1.bf16.msra.mxu0 %v8895_v35  ;;  %v188_v48 = vand.u32 4294901760, %v8901_v38  ;;  %v322_v49 = vand.u32 4294901760, %v321_v39  ;;  %v334_v50 = vand.u32 4294901760, %v333_v40  ;;  %v328_v51 = vand.u32 4294901760, %v327_v41  ;;  %p8775_p0 = pnand %p8774_p13, %p8768_p10 }
  0x42   :  { %v340_v52 = vand.u32 4294901760, %v339_v42  ;;  %v8920_v53 = vand.u32 4294901760, %v81_v43  ;;  %v8922_v54 = vand.u32 4294901760, %v84_v44  ;;  %v8924_v55 = vand.u32 4294901760, %v87_v45 }
  0x43   :  { %v189_v56 = vsub.f32 %v8901_v38, %v188_v48  ;;  %v7544_v57 = vpack.c.bf16 %v334_v50, %v322_v49  ;;  %v90_v58 = vsel %vm76_vm0, %v60_v46, 0  ;;  %v93_v59 = vsel %vm76_vm0, %v61_v47, 0 }
  0x44   :  { %v7546_v61 = vpack.c.bf16 %v340_v52, %v328_v51  ;;  %v8932_v62 = vsub.f32 %v81_v43, %v8920_v53  ;;  %v8935_v63 = vsub.f32 %v84_v44, %v8922_v54  ;;  %v8938_v1 = vsub.f32 %v87_v45, %v8924_v55  ;;  %v64_v51 = vld [vmem:[#allocation3 + $0x40] sm:$0xff] }
  0x45   :  { %v190_v2 = vand.u32 4294901760, %v189_v56  ;;  %7545 = vmatprep.subr.bf16.mxu0 %v7544_v57  ;;  %v8940_v3 = vand.u32 4294901760, %v90_v58  ;;  %v8944_v6 = vand.u32 4294901760, %v93_v59  ;;  %v96_v7 = vsel %vm76_vm0, %v62_v60, 0 }
  0x46   :  { %v199_v4 = vand.u32 4294901760, %v8932_v62  ;;  %v210_v5 = vand.u32 4294901760, %v8935_v63  ;;  %v221_v8 = vand.u32 4294901760, %v8938_v1  ;;  %v344_v10 = vand.u32 4294901760, %v8882_v23 }
  0x47   :  { %191 = vmatmul.mubr.f32.vlgmr.msra.gmra.mrb[0].mxu0 %v190_v2  ;;  %v8949_v9 = vsub.f32 %v90_v58, %v8940_v3  ;;  %v356_v11 = vand.u32 4294901760, %v8893_v34  ;;  %v8954_v12 = vsub.f32 %v8865_v14, %v127_v25  ;;  %v350_v24 = vand.u32 4294901760, %v8897_v36  ;;  %v65_v2 = vld [vmem:[#allocation3 + $0x48] sm:$0xff] }
  0x48   :  { %7547 = vmatpush1.bf16.msra.mxu0 %v7546_v61  ;;  %196 = vmatprep.mubr.f32.mxu0 %v11721_v0  ;;  %v200_v13 = vsub.f32 %v8932_v62, %v199_v4  ;;  %v211_v15 = vsub.f32 %v8935_v63, %v210_v5  ;;  %v345_v26 = vsub.f32 %v8882_v23, %v344_v10  ;;  %v8967_v14 = vand.u32 4294901760, %v96_v7 }
  0x49   :  { %v357_v25 = vsub.f32 %v8893_v34, %v356_v11  ;;  %v222_v33 = vsub.f32 %v8938_v1, %v221_v8  ;;  %v232_v39 = vand.u32 4294901760, %v8949_v9  ;;  %v8977_v40 = vsub.f32 %v93_v59, %v8944_v6 }
  0x4a   :  { %v201_v27 = vand.u32 4294901760, %v200_v13  ;;  %v346_v41 = vand.u32 4294901760, %v345_v26  ;;  %v212_v42 = vand.u32 4294901760, %v211_v15  ;;  %v351_v44 = vsub.f32 %v8897_v36, %v350_v24 }
  0x4b   :  { %v358_v43 = vand.u32 4294901760, %v357_v25  ;;  %v362_v45 = vand.u32 4294901760, %v8954_v12  ;;  %v99_v46 = vsel %vm76_vm0, %v63_v32, 0  ;;  %v243_v52 = vand.u32 4294901760, %v8977_v40 }
  0x4c   :  { %202 = vmatmul.mubr.f32.gmra.mrb[2].mxu0 %v201_v27  ;;  %v352_v49 = vand.u32 4294901760, %v351_v44  ;;  %v8990_v56 = vsub.f32 %v96_v7, %v8967_v14  ;;  %v223_v57 = vand.u32 4294901760, %v222_v33  ;;  %v233_v58 = vsub.f32 %v8949_v9, %v232_v39 }
  0x4d   :  { %207 = vmatprep.mubr.f32.mxu0 %v11721_v0  ;;  %v7548_v47 = vpack.c.bf16 %v358_v43, %v346_v41  ;;  %v363_v50 = vsub.f32 %v8954_v12, %v362_v45  ;;  %v8995_v60 = vand.u32 4294901760, %v99_v46  ;;  %v102_v61 = vsel %vm76_vm0, %v64_v51, 0  ;;  %v66_v41 = vld [vmem:[#allocation3 + $0x50] sm:$0xff] }
  0x4e   :  { %v7552_v7 = vpack.c.bf16 %v8871_v18, %v8869_v17  ;;  %v244_v15 = vsub.f32 %v8977_v40, %v243_v52  ;;  %v254_v26 = vand.u32 4294901760, %v8990_v56  ;;  %v234_v27 = vand.u32 4294901760, %v233_v58 }
  0x4f   :  { %7549 = vmatprep.subr.bf16.mxu0 %v7548_v47  ;;  %v364_v59 = vand.u32 4294901760, %v363_v50  ;;  %v9006_v25 = vsub.f32 %v99_v46, %v8995_v60  ;;  %v9008_v32 = vand.u32 4294901760, %v102_v61  ;;  %v105_v33 = vsel %vm76_vm0, %v65_v2, 0 }
  0x50   :  { %213 = vmatmul.mubr.f32.gmra.mrb[4].mxu0 %v212_v42  ;;  %v245_v42 = vand.u32 4294901760, %v244_v15  ;;  %v255_v43 = vsub.f32 %v8990_v56, %v254_v26  ;;  %v9015_v44 = vand.u32 4294901760, %v105_v33  ;;  %v9025_v50 = vpack.c.bf16 %v332_v30, %v320_v29 }
  0x51   :  { %218 = vmatprep.mubr.f32.mxu0 %v11721_v0  ;;  %v7550_v13 = vpack.c.bf16 %v364_v59, %v352_v49  ;;  %v265_v46 = vand.u32 4294901760, %v9006_v25  ;;  %v9019_v47 = vsub.f32 %v102_v61, %v9008_v32  ;;  %v67_v49 = vld [vmem:[#allocation3 + $0x58] sm:$0xff]  ;;  %v9031_v51 = vpack.c.bf16 %v338_v37, %v326_v31 }
  0x52   :  { %v256_v58 = vand.u32 4294901760, %v255_v43  ;;  %v111_v59 = vsel %vm76_vm0, %v67_v49, 0  ;;  %v9041_v29 = vsub.f32 %v105_v33, %v9015_v44 }
  0x53   :  { %7551 = vmatpush1.bf16.msra.mxu0 %v7550_v13  ;;  %v266_v17 = vsub.f32 %v9006_v25, %v265_v46  ;;  %v276_v18 = vand.u32 4294901760, %v9019_v47  ;;  %v9046_v31 = vand.u32 4294901760, %v111_v59 }
  0x54   :  { %224 = vmatmul.mubr.f32.gmra.mrb[6].mxu0 %v223_v57  ;;  %7553 = vmatprep.subr.bf16.mxu0 %v7552_v7  ;;  %v108_v57 = vsel %vm76_vm0, %v66_v41, 0  ;;  %v287_v2 = vand.u32 4294901760, %v9041_v29 }
  0x55   :  { %229 = vmatprep.mubr.f32.mxu0 %v11721_v0  ;;  %v9043_v30 = vand.u32 4294901760, %v108_v57  ;;  %v267_v37 = vand.u32 4294901760, %v266_v17  ;;  %v277_v61 = vsub.f32 %v9019_v47, %v276_v18  ;;  %v9061_v33 = vsub.f32 %v111_v59, %v9046_v31 }
  0x56   :  { %v288_v15 = vsub.f32 %v9041_v29, %v287_v2  ;;  %v9077_v59 = vpack.c.bf16 %v356_v11, %v344_v10  ;;  %v9083_v17 = vpack.c.bf16 %v362_v45, %v350_v24  ;;  %v7558_v10 = vpack.c.bf16 %v8954_v12, %v8897_v36  ;;  %v1226_v11 = vld [vmem:[#allocation8 + $0x38] sm:$0xff] }
  0x57   :  { %v9053_v13 = vsub.f32 %v108_v57, %v9043_v30  ;;  %v278_v7 = vand.u32 4294901760, %v277_v61  ;;  %v309_v43 = vand.u32 4294901760, %v9061_v33  ;;  %v7556_v61 = vpack.c.bf16 %v8893_v34, %v8882_v23  ;;  %v1223_v34 = vld [vmem:[#allocation8 + $0x20] sm:$0xff] }
  0x58   :  { %235 = vmatmul.mubr.f32.gmra.mrb[8].mxu0 %v234_v27  ;;  %v289_v41 = vand.u32 4294901760, %v288_v15  ;;  %v1277_v45 = vsel %vm76_vm0, %v1226_v11, 0 }
  0x59   :  { %240 = vmatprep.mubr.f32.mxu0 %v11721_v0  ;;  %v298_v27 = vand.u32 4294901760, %v9053_v13  ;;  %v310_v57 = vsub.f32 %v9061_v33, %v309_v43 }
  0x5c   :  { %246 = vmatmul.mubr.f32.gmra.mrb[10].mxu0 %v245_v42  ;;  %v299_v42 = vsub.f32 %v9053_v13, %v298_v27 }
  0x5d   :  { %251 = vmatprep.mubr.f32.mxu0 %v11721_v0 }
  0x5e   :  { %v300_v49 = vand.u32 4294901760, %v299_v42 }
  0x60   :  { %257 = vmatmul.mubr.f32.gmra.mrb[12].mxu0 %v256_v58  ;;  %v311_v58 = vand.u32 4294901760, %v310_v57 }
  0x61   :  { %262 = vmatprep.mubr.f32.mxu0 %v11721_v0 }
  0x64   :  { %268 = vmatmul.mubr.f32.gmra.mrb[14].mxu0 %v267_v37  ;;  %v7554_v37 = vpack.c.bf16 %v8877_v21, %v8873_v19  ;;  %v1220_v19 = vld [vmem:[#allocation8 + $0x8] sm:$0xff]  ;;  %v1222_v21 = vld [vmem:[#allocation8 + $0x18] sm:$0xff] }
  0x65   :  { %273 = vmatprep.mubr.f32.mxu0 %v11721_v0  ;;  %v1259_v23 = vsel %vm76_vm0, %v1220_v19, 0 }
  0x68   :  { %279 = vmatmul.mubr.f32.gmra.mrb[16].mxu0 %v278_v7 }
  0x69   :  { %284 = vmatprep.mubr.f32.mxu0 %v11721_v0 }
  0x6c   :  { %290 = vmatmul.mubr.f32.gmra.mrb[18].mxu0 %v289_v41 }
  0x6d   :  { %295 = vmatprep.mubr.f32.mxu0 %v11721_v0 }
  0x70   :  { %301 = vmatmul.mubr.f32.gmra.mrb[20].mxu0 %v300_v49 }
  0x71   :  { %306 = vmatprep.mubr.f32.mxu0 %v11721_v0 }
  0x74   :  { %312 = vmatmul.mubr.f32.gmra.mrb[22].mxu0 %v311_v58  ;;  %v1227_v58 = vld [vmem:[#allocation8 + $0x40] sm:$0xff] }
  0x75   :  { %422 = vmatprep.mubr.f32.mxu0 %v11721_v0 }
  0x78   :  { %424 = vmatmul.mubr.f32.vlgmr.msra.gmra.mrb[0].mxu0 %v8887_v28 }
  0x79   :  { %7555 = vmatpush1.bf16.msra.mxu0 %v7554_v37  ;;  %429 = vmatprep.mubr.f32.mxu0 %v11721_v0 }
  0x7a   :  { %7557 = vmatprep.subr.bf16.mxu0 %v7556_v61 }
  0x7c   :  { %431 = vmatmul.mubr.f32.gmra.mrb[2].mxu0 %v8920_v53 }
  0x7d   :  { %436 = vmatprep.mubr.f32.mxu0 %v11721_v0  ;;  %7559 = vmatpush1.bf16.msra.mxu0 %v7558_v10  ;;  %v1243_v10 = vld [vmem:[#allocation8 + $0xc0] sm:$0xff] }
  0x7e   :  { %7561 = vmatprep.subr.bf16.mxu0 %v8867_v16 }
  0x80   :  { %438 = vmatmul.mubr.f32.gmra.mrb[4].mxu0 %v8922_v54 }
  0x81   :  { %443 = vmatprep.mubr.f32.mxu0 %v11721_v0 }
  0x84   :  { %445 = vmatmul.mubr.f32.gmra.mrb[6].mxu0 %v8924_v55 }
  0x85   :  { %450 = vmatprep.mubr.f32.mxu0 %v11721_v0 }
  0x88   :  { %452 = vmatmul.mubr.f32.gmra.mrb[8].mxu0 %v8940_v3 }
  0x89   :  { %457 = vmatprep.mubr.f32.mxu0 %v11721_v0 }
  0x8c   :  { %459 = vmatmul.mubr.f32.gmra.mrb[10].mxu0 %v8944_v6 }
  0x8d   :  { %464 = vmatprep.mubr.f32.mxu0 %v11721_v0 }
  0x90   :  { %466 = vmatmul.mubr.f32.gmra.mrb[12].mxu0 %v8967_v14 }
  0x91   :  { %471 = vmatprep.mubr.f32.mxu0 %v11721_v0 }
  0x94   :  { %473 = vmatmul.mubr.f32.gmra.mrb[14].mxu0 %v8995_v60 }
  0x95   :  { %478 = vmatprep.mubr.f32.mxu0 %v11721_v0 }
  0x98   :  { %480 = vmatmul.mubr.f32.gmra.mrb[16].mxu0 %v9008_v32 }
  0x99   :  { %485 = vmatprep.mubr.f32.mxu0 %v11721_v0 }
  0x9c   :  { %487 = vmatmul.mubr.f32.gmra.mrb[18].mxu0 %v9015_v44 }
  0x9d   :  { %492 = vmatprep.mubr.f32.mxu0 %v11721_v0 }
  0xa0   :  { %494 = vmatmul.mubr.f32.gmra.mrb[20].mxu0 %v9043_v30 }
  0xa1   :  { %499 = vmatprep.mubr.f32.mxu0 %v11721_v0 }
  0xa4   :  { %501 = vmatmul.mubr.f32.gmra.mrb[22].mxu0 %v9046_v31 }
  0xa5   :  { %587 = vmatprep.mubr.f32.mxu0 %v11721_v0 }
  0xa8   :  { %590 = vmatmul.mubr.f32.vlgmr.msra.gmra.mrb[0].mxu0 %v8901_v38  ;;  %v1224_v38 = vld [vmem:[#allocation8 + $0x28] sm:$0xff] }
  0xa9   :  { %7563 = vmatpush1.bf16.msra.mxu0 %v8875_v20  ;;  %595 = vmatprep.mubr.f32.mxu0 %v11721_v0 }
  0xaa   :  { %7565 = vmatprep.subr.bf16.mxu0 %v8879_v22 }
  0xac   :  { %598 = vmatmul.mubr.f32.gmra.mrb[2].mxu0 %v8932_v62 }
  0xad   :  { %603 = vmatprep.mubr.f32.mxu0 %v11721_v0  ;;  %7567 = vmatpush1.bf16.msra.mxu0 %v8895_v35 }
  0xae   :  { %7569 = vmatprep.subr.bf16.mxu0 %v9025_v50  ;;  %v1240_v50 = vld [vmem:[#allocation8 + $0xa8] sm:$0xff] }
  0xaf   :  { %v9314_v7 = vsel %vm76_vm0, %v1240_v50, 0 }
  0xb0   :  { %606 = vmatmul.mubr.f32.gmra.mrb[4].mxu0 %v8935_v63  ;;  %v1271_v63 = vsel %vm76_vm0, %v1224_v38, 0  ;;  %12061 = vst [vmem:[#allocation21_spill] sm:$0xff] %v9314_v7  ;;  %v9341_v19 = vand.u32 4294901760, %v9314_v7 }
  0xb1   :  { %611 = vmatprep.mubr.f32.mxu0 %v11721_v0 }
  0xb2   :  { %12065 = vst [vmem:[#allocation25_spill] sm:$0xff] %v9341_v19 }
  0xb4   :  { %614 = vmatmul.mubr.f32.gmra.mrb[6].mxu0 %v8938_v1 }
  0xb5   :  { %619 = vmatprep.mubr.f32.mxu0 %v11721_v0 }
  0xb8   :  { %622 = vmatmul.mubr.f32.gmra.mrb[8].mxu0 %v8949_v9  ;;  %v9266_v9 = vand.u32 4294901760, %v1271_v63 }
  0xb9   :  { %627 = vmatprep.mubr.f32.mxu0 %v11721_v0 }
  0xba   :  { %12058 = vst [vmem:[#allocation18_spill] sm:$0xff] %v9266_v9 }
  0xbc   :  { %630 = vmatmul.mubr.f32.gmra.mrb[10].mxu0 %v8977_v40 }
  0xbd   :  { %635 = vmatprep.mubr.f32.mxu0 %v11721_v0 }
  0xc0   :  { %638 = vmatmul.mubr.f32.gmra.mrb[12].mxu0 %v8990_v56  ;;  %v9279_v56 = vsub.f32 %v1271_v63, %v9266_v9 }
  0xc1   :  { %643 = vmatprep.mubr.f32.mxu0 %v11721_v0 }
  0xc4   :  { %646 = vmatmul.mubr.f32.gmra.mrb[14].mxu0 %v9006_v25 }
  0xc5   :  { %651 = vmatprep.mubr.f32.mxu0 %v11721_v0 }
  0xc8   :  { %654 = vmatmul.mubr.f32.gmra.mrb[16].mxu0 %v9019_v47 }
  0xc9   :  { %659 = vmatprep.mubr.f32.mxu0 %v11721_v0 }
  0xcc   :  { %662 = vmatmul.mubr.f32.gmra.mrb[18].mxu0 %v9041_v29  ;;  %v11714_v29 = vand.u32 4294901760, %v9279_v56 }
  0xcd   :  { %667 = vmatprep.mubr.f32.mxu0 %v11721_v0 }
  0xce   :  { %v9336_v61 = vsub.f32 %v9279_v56, %v11714_v29 }
  0xd0   :  { %670 = vmatmul.mubr.f32.gmra.mrb[20].mxu0 %v9053_v13 }
  0xd1   :  { %675 = vmatprep.mubr.f32.mxu0 %v11721_v0 }
  0xd4   :  { %678 = vmatmul.mubr.f32.gmra.mrb[22].mxu0 %v9061_v33 }
  0xd5   :  { %756 = vmatprep.mubr.f32.mxu0 %v11721_v0 }
  0xd8   :  { %760 = vmatmul.mubr.f32.vlgmr.msra.gmra.mrb[0].mxu0 %v188_v48  ;;  %v9243_v48 = vand.u32 4294901760, %v1259_v23 }
  0xd9   :  { %7571 = vmatpush1.bf16.msra.mxu0 %v9031_v51  ;;  %765 = vmatprep.mubr.f32.mxu0 %v11721_v0 }
  0xda   :  { %7573 = vmatprep.subr.bf16.mxu0 %v9077_v59  ;;  %12054 = vst [vmem:[#allocation14_spill] sm:$0xff] %v9243_v48 }
  0xdc   :  { %769 = vmatmul.mubr.f32.gmra.mrb[2].mxu0 %v199_v4 }
  0xdd   :  { %774 = vmatprep.mubr.f32.mxu0 %v11721_v0  ;;  %7575 = vmatpush1.bf16.msra.mxu0 %v9083_v17 }
  0xde   :  { %7577 = vmatprep.subr.bf16.mxu0 %v8867_v16  ;;  %v1219_v16 = vld [vmem:[#allocation8] sm:$0xff] }
  0xe0   :  { %778 = vmatmul.mubr.f32.gmra.mrb[4].mxu0 %v210_v5  ;;  %v9258_v5 = vsub.f32 %v1259_v23, %v9243_v48 }
  0xe1   :  { %783 = vmatprep.mubr.f32.mxu0 %v11721_v0 }
  0xe4   :  { %787 = vmatmul.mubr.f32.gmra.mrb[6].mxu0 %v221_v8 }
  0xe5   :  { %792 = vmatprep.mubr.f32.mxu0 %v11721_v0 }
  0xe8   :  { %796 = vmatmul.mubr.f32.gmra.mrb[8].mxu0 %v232_v39  ;;  %v11718_v39 = vand.u32 4294901760, %v9258_v5 }
  0xe9   :  { %801 = vmatprep.mubr.f32.mxu0 %v11721_v0 }
  0xec   :  { %805 = vmatmul.mubr.f32.gmra.mrb[10].mxu0 %v243_v52 }
  0xed   :  { %810 = vmatprep.mubr.f32.mxu0 %v11721_v0 }
  0xf0   :  { %814 = vmatmul.mubr.f32.gmra.mrb[12].mxu0 %v254_v26 }
  0xf1   :  { %819 = vmatprep.mubr.f32.mxu0 %v11721_v0 }
  0xf4   :  { %823 = vmatmul.mubr.f32.gmra.mrb[14].mxu0 %v265_v46  ;;  %v9295_v46 = vsub.f32 %v9258_v5, %v11718_v39 }
  0xf5   :  { %828 = vmatprep.mubr.f32.mxu0 %v11721_v0 }
  0xf8   :  { %832 = vmatmul.mubr.f32.gmra.mrb[16].mxu0 %v276_v18 }
  0xf9   :  { %837 = vmatprep.mubr.f32.mxu0 %v11721_v0 }
  0xfc   :  { %841 = vmatmul.mubr.f32.gmra.mrb[18].mxu0 %v287_v2 }
  0xfd   :  { %846 = vmatprep.mubr.f32.mxu0 %v11721_v0 }
 0x100   :  { %850 = vmatmul.mubr.f32.gmra.mrb[20].mxu0 %v298_v27  ;;  %v1242_v27 = vld [vmem:[#allocation8 + $0xb8] sm:$0xff] }
 0x101   :  { %855 = vmatprep.mubr.f32.mxu0 %v11721_v0 }
 0x104   :  { %859 = vmatmul.mubr.f32.gmra.mrb[22].mxu0 %v309_v43 }
 0x105   :  { %953 = vmatprep.mubr.f32.mxu0 %v11721_v0 }
 0x108   :  { %955 = vmatmul.mubr.f32.vlgmr.msra.gmra.mrb[0].mxu0 %v8887_v28 }
 0x109   :  { %7579 = vmatpush1.bf16.msra.mxu0 %v8875_v20  ;;  %960 = vmatprep.mubr.f32.mxu0 %v11721_v0  ;;  %v1221_v20 = vld [vmem:[#allocation8 + $0x10] sm:$0xff] }
 0x10a   :  { %7581 = vmatprep.subr.bf16.mxu0 %v8879_v22  ;;  %v1256_v22 = vsel %vm76_vm0, %v1219_v16, 0 }
 0x10b   :  { %v9241_v36 = vand.u32 4294901760, %v1256_v22 }
 0x10c   :  { %962 = vmatmul.mubr.f32.gmra.mrb[2].mxu0 %v8920_v53 }
 0x10d   :  { %967 = vmatprep.mubr.f32.mxu0 %v11721_v0  ;;  %7583 = vmatpush1.bf16.msra.mxu0 %v8895_v35  ;;  %v1265_v35 = vsel %vm76_vm0, %v1222_v21, 0  ;;  %12053 = vst [vmem:[#allocation13_spill] sm:$0xff] %v9241_v36  ;;  %v9252_v1 = vsub.f32 %v1256_v22, %v9241_v36 }
 0x10e   :  { %v9248_v62 = vand.u32 4294901760, %v1265_v35 }
 0x10f   :  { %v11720_v24 = vand.u32 4294901760, %v9252_v1 }
 0x110   :  { %969 = vmatmul.mubr.f32.gmra.mrb[4].mxu0 %v8922_v54  ;;  %12056 = vst [vmem:[#allocation16_spill] sm:$0xff] %v9248_v62  ;;  %v9264_v8 = vsub.f32 %v1265_v35, %v9248_v62  ;;  %v1280_v35 = vsel %vm76_vm0, %v1227_v58, 0 }
 0x111   :  { %974 = vmatprep.mubr.f32.mxu0 %v11721_v0  ;;  %v9287_v25 = vsub.f32 %v9252_v1, %v11720_v24  ;;  %v1228_v24 = vld [vmem:[#allocation8 + $0x48] sm:$0xff] }
 0x112   :  { %v11716_v52 = vand.u32 4294901760, %v9264_v8 }
 0x114   :  { %976 = vmatmul.mubr.f32.gmra.mrb[6].mxu0 %v8924_v55  ;;  %v9308_v18 = vsub.f32 %v9264_v8, %v11716_v52 }
 0x115   :  { %981 = vmatprep.mubr.f32.mxu0 %v11721_v0 }
 0x118   :  { %983 = vmatmul.mubr.f32.gmra.mrb[8].mxu0 %v8940_v3 }
 0x119   :  { %988 = vmatprep.mubr.f32.mxu0 %v11721_v0 }
 0x11c   :  { %990 = vmatmul.mubr.f32.gmra.mrb[10].mxu0 %v8944_v6 }
 0x11d   :  { %995 = vmatprep.mubr.f32.mxu0 %v11721_v0 }
 0x120   :  { %997 = vmatmul.mubr.f32.gmra.mrb[12].mxu0 %v8967_v14 }
 0x121   :  { %1002 = vmatprep.mubr.f32.mxu0 %v11721_v0 }
 0x124   :  { %1004 = vmatmul.mubr.f32.gmra.mrb[14].mxu0 %v8995_v60 }
 0x125   :  { %1009 = vmatprep.mubr.f32.mxu0 %v11721_v0 }
 0x128   :  { %1011 = vmatmul.mubr.f32.gmra.mrb[16].mxu0 %v9008_v32 }
 0x129   :  { %1016 = vmatprep.mubr.f32.mxu0 %v11721_v0 }
 0x12c   :  { %1018 = vmatmul.mubr.f32.gmra.mrb[18].mxu0 %v9015_v44 }
 0x12d   :  { %1023 = vmatprep.mubr.f32.mxu0 %v11721_v0 }
 0x130   :  { %1025 = vmatmul.mubr.f32.gmra.mrb[20].mxu0 %v9043_v30 }
 0x131   :  { %1030 = vmatprep.mubr.f32.mxu0 %v11721_v0 }
 0x134   :  { %1032 = vmatmul.mubr.f32.gmra.mrb[22].mxu0 %v9046_v31 }
 0x135   :  { %1110 = vmatprep.mubr.f32.mxu0 %v11721_v0 }
 0x138   :  { %1112 = vmatmul.mubr.f32.vlgmr.msra.gmra.mrb[0].mxu0 %v8887_v28  ;;  %v1262_v28 = vsel %vm76_vm0, %v1221_v20, 0  ;;  %v9344_v20 = vsel %vm76_vm0, %v1242_v27, 0 }
 0x139   :  { %1117 = vmatprep.mubr.f32.mxu0 %v11721_v0  ;;  %12066 = vst [vmem:[#allocation26_spill] sm:$0xff] %v9344_v20  ;;  %v9366_v50 = vand.u32 4294901760, %v9344_v20 }
 0x13b   :  { %12069 = vst [vmem:[#allocation29_spill] sm:$0xff] %v9366_v50 }
 0x13c   :  { %1119 = vmatmul.mubr.f32.gmra.mrb[2].mxu0 %v8920_v53  ;;  %v9245_v53 = vand.u32 4294901760, %v1262_v28 }
 0x13d   :  { %1124 = vmatprep.mubr.f32.mxu0 %v11721_v0 }
 0x13e   :  { %12055 = vst [vmem:[#allocation15_spill] sm:$0xff] %v9245_v53 }
 0x140   :  { %1126 = vmatmul.mubr.f32.gmra.mrb[4].mxu0 %v8922_v54  ;;  %v1268_v54 = vsel %vm76_vm0, %v1223_v34, 0 }
 0x141   :  { %1131 = vmatprep.mubr.f32.mxu0 %v11721_v0 }
 0x144   :  { %1133 = vmatmul.mubr.f32.gmra.mrb[6].mxu0 %v8924_v55  ;;  %v1225_v55 = vld [vmem:[#allocation8 + $0x30] sm:$0xff] }
 0x145   :  { %1138 = vmatprep.mubr.f32.mxu0 %v11721_v0  ;;  %v1274_v4 = vsel %vm76_vm0, %v1225_v55, 0 }
 0x146   :  { %v9268_v12 = vand.u32 4294901760, %v1274_v4 }
 0x148   :  { %1140 = vmatmul.mubr.f32.gmra.mrb[8].mxu0 %v8940_v3  ;;  %v9254_v3 = vand.u32 4294901760, %v1268_v54  ;;  %12059 = vst [vmem:[#allocation19_spill] sm:$0xff] %v9268_v12  ;;  %v9282_v26 = vsub.f32 %v1274_v4, %v9268_v12  ;;  %v9361_v4 = vsel %vm76_vm0, %v1243_v10, 0 }
 0x149   :  { %1145 = vmatprep.mubr.f32.mxu0 %v11721_v0  ;;  %12068 = vst [vmem:[#allocation28_spill] sm:$0xff] %v9361_v4  ;;  %v9380_v29 = vand.u32 4294901760, %v9361_v4 }
 0x14a   :  { %12057 = vst [vmem:[#allocation17_spill] sm:$0xff] %v9254_v3 }
 0x14b   :  { %12071 = vst [vmem:[#allocation31_spill] sm:$0xff] %v9380_v29 }
 0x14c   :  { %1147 = vmatmul.mubr.f32.gmra.mrb[10].mxu0 %v8944_v6  ;;  %v9261_v6 = vsub.f32 %v1262_v28, %v9245_v53 }
 0x14d   :  { %1152 = vmatprep.mubr.f32.mxu0 %v11721_v0 }
 0x14e   :  { %v11717_v40 = vand.u32 4294901760, %v9261_v6 }
 0x150   :  { %1154 = vmatmul.mubr.f32.gmra.mrb[12].mxu0 %v8967_v14  ;;  %v9272_v14 = vsub.f32 %v1268_v54, %v9254_v3  ;;  %v9300_v47 = vsub.f32 %v9261_v6, %v11717_v40 }
 0x151   :  { %1159 = vmatprep.mubr.f32.mxu0 %v11721_v0 }
 0x154   :  { %1161 = vmatmul.mubr.f32.gmra.mrb[14].mxu0 %v8995_v60  ;;  %v1239_v60 = vld [vmem:[#allocation8 + $0xa0] sm:$0xff] }
 0x155   :  { %1166 = vmatprep.mubr.f32.mxu0 %v11721_v0  ;;  %v9303_v51 = vsel %vm76_vm0, %v1239_v60, 0 }
 0x156   :  { %v9327_v57 = vand.u32 4294901760, %v9303_v51 }
 0x158   :  { %1168 = vmatmul.mubr.f32.gmra.mrb[16].mxu0 %v9008_v32  ;;  %v11715_v32 = vand.u32 4294901760, %v9272_v14  ;;  %12063 = vst [vmem:[#allocation23_spill] sm:$0xff] %v9327_v57 }
 0x159   :  { %1173 = vmatprep.mubr.f32.mxu0 %v11721_v0 }
 0x15a   :  { %v9319_v15 = vsub.f32 %v9272_v14, %v11715_v32 }
 0x15c   :  { %1175 = vmatmul.mubr.f32.gmra.mrb[18].mxu0 %v9015_v44  ;;  %v9290_v44 = vand.u32 4294901760, %v1277_v45 }
 0x15d   :  { %1180 = vmatprep.mubr.f32.mxu0 %v11721_v0 }
 0x15e   :  { %12060 = vst [vmem:[#allocation20_spill] sm:$0xff] %v9290_v44  ;;  %v9322_v33 = vsub.f32 %v1277_v45, %v9290_v44 }
 0x160   :  { %1182 = vmatmul.mubr.f32.gmra.mrb[20].mxu0 %v9043_v30  ;;  %v1241_v30 = vld [vmem:[#allocation8 + $0xb0] sm:$0xff]  ;;  %12062 = vst [vmem:[#allocation22_spill] sm:$0xff] %v9322_v33  ;;  %v11719_v34 = vand.u32 4294901760, %v9322_v33 }
 0x161   :  { %1187 = vmatprep.mubr.f32.mxu0 %v11721_v0  ;;  %v9331_v37 = vsel %vm76_vm0, %v1241_v30, 0 }
 0x162   :  { %12064 = vst [vmem:[#allocation24_spill] sm:$0xff] %v9331_v37  ;;  %v9358_v63 = vand.u32 4294901760, %v9331_v37  ;;  %v9385_v32 = vsub.f32 %v9322_v33, %v11719_v34 }
 0x164   :  { %1189 = vmatmul.mubr.f32.gmra.mrb[22].mxu0 %v9046_v31  ;;  %v11713_v31 = vand.u32 4294901760, %v9282_v26  ;;  %12067 = vst [vmem:[#allocation27_spill] sm:$0xff] %v9358_v63 }
 0x165   :  { %1411 = vmatprep.mubr.f32.mxu0 %v11721_v0 }
 0x166   :  { %v9349_v21 = vsub.f32 %v9282_v26, %v11713_v31 }
 0x20b   :  { %v1113_v2 = vpop.f32.mrb[0].mxu0 }
 0x20c   :  { %v1341_v41 = vand.u32 4294901760, %v1113_v2  ;;  %v1115_v42 = vpop.f32.mrb[1].mxu0 }
 0x20d   :  { %v1339_v59 = vand.u32 4294901760, %v1115_v42 }
 0x20e   :  { %v9338_v16 = vsub.f32 %v1113_v2, %v1341_v41 }
 0x20f   :  { %v9351_v22 = vsub.f32 %v1115_v42, %v1339_v59  ;;  %v1120_v23 = vpop.f32.mrb[2].mxu0  ;;  %v9373_v42 = vand.u32 4294901760, %v1280_v35 }
 0x210   :  { %v1345_v38 = vand.u32 4294901760, %v1120_v23  ;;  %v1122_v54 = vpop.f32.mrb[3].mxu0  ;;  %v1728_v55 = vand.u32 4294901760, %v9338_v16 }
 0x211   :  { %v1343_v11 = vand.u32 4294901760, %v1122_v54  ;;  %v1722_v45 = vand.u32 4294901760, %v9351_v22  ;;  %12070 = vst [vmem:[#allocation30_spill] sm:$0xff] %v9373_v42  ;;  %v9402_v28 = vsub.f32 %v1280_v35, %v9373_v42 }
 0x212   :  { %v9368_v30 = vpack.c.bf16 %v1345_v38, %v1341_v41  ;;  %v9370_v2 = vsub.f32 %v1120_v23, %v1345_v38  ;;  %v1244_v41 = vld [vmem:[#allocation8 + $0xc8] sm:$0xff] }
 0x213   :  { %v9375_v58 = vpack.c.bf16 %v1343_v11, %v1339_v59  ;;  %v9377_v10 = vsub.f32 %v1122_v54, %v1343_v11  ;;  %v1127_v31 = vpop.f32.mrb[4].mxu0  ;;  %v1729_v59 = vsub.f32 %v9338_v16, %v1728_v55  ;;  %v1723_v40 = vsub.f32 %v9351_v22, %v1722_v45  ;;  %12073 = vst [vmem:[#allocation33_spill] sm:$0xff] %v9402_v28 }
 0x214   :  { %v1349_v38 = vand.u32 4294901760, %v1127_v31  ;;  %v1129_v52 = vpop.f32.mrb[5].mxu0  ;;  %v1740_v54 = vand.u32 4294901760, %v9370_v2  ;;  %v9399_v60 = vsel %vm76_vm0, %v1244_v41, 0  ;;  %v1283_v41 = vsel %vm76_vm0, %v1228_v24, 0 }
 0x215   :  { %v1347_v11 = vand.u32 4294901760, %v1129_v52  ;;  %7585 = vmatprep.subr.bf16.mxu0 %v9375_v58  ;;  %v1734_v39 = vand.u32 4294901760, %v9377_v10  ;;  %12072 = vst [vmem:[#allocation32_spill] sm:$0xff] %v9399_v60  ;;  %v1730_v12 = vand.u32 4294901760, %v1729_v59  ;;  %v12080_v20 = vand.u32 4294901760, %v9402_v28 }
 0x216   :  { %7587 = vmatpush1.bf16.msra.mxu0 %v9368_v30  ;;  %v1741_v27 = vsub.f32 %v9370_v2, %v1740_v54  ;;  %v9404_v17 = vpack.c.bf16 %v1740_v54, %v1728_v55  ;;  %v9406_v23 = vsub.f32 %v1127_v31, %v1349_v38  ;;  %v1724_v55 = vand.u32 4294901760, %v1723_v40 }
 0x217   :  { %v9408_v49 = vsub.f32 %v1129_v52, %v1347_v11  ;;  %v1134_v43 = vpop.f32.mrb[6].mxu0  ;;  %v1735_v34 = vsub.f32 %v9377_v10, %v1734_v39  ;;  %v9411_v0 = vpack.c.bf16 %v1734_v39, %v1722_v45 }
 0x218   :  { %12074 = vst [vmem:[#allocation34_spill] sm:$0xff] %v9404_v17  ;;  %v1353_v13 = vand.u32 4294901760, %v1134_v43  ;;  %v1136_v44 = vpop.f32.mrb[7].mxu0  ;;  %v1742_v9 = vand.u32 4294901760, %v1741_v27  ;;  %v1752_v39 = vand.u32 4294901760, %v9406_v23 }
 0x219   :  { %v1746_v35 = vand.u32 4294901760, %v9408_v49  ;;  %v1351_v42 = vand.u32 4294901760, %v1136_v44  ;;  %v1736_v54 = vand.u32 4294901760, %v1735_v34 }
 0x21a   :  { %v9415_v31 = vpack.c.bf16 %v1353_v13, %v1349_v38  ;;  %v9417_v52 = vsub.f32 %v1134_v43, %v1353_v13  ;;  %v7594_v17 = vpack.c.bf16 %v1742_v9, %v1730_v12  ;;  %v1753_v34 = vsub.f32 %v9406_v23, %v1752_v39 }
 0x21b   :  { %v9421_v45 = vpack.c.bf16 %v1351_v42, %v1347_v11  ;;  %v9423_v59 = vsub.f32 %v1136_v44, %v1351_v42  ;;  %v1141_v27 = vpop.f32.mrb[8].mxu0  ;;  %v7592_v24 = vpack.c.bf16 %v1736_v54, %v1724_v55  ;;  %v1747_v62 = vsub.f32 %v9408_v49, %v1746_v35 }
 0x21c   :  { %v1764_v40 = vand.u32 4294901760, %v9417_v52  ;;  %v3441_v13 = vand.u32 4294901760, %v1141_v27  ;;  %v1143_v43 = vpop.f32.mrb[9].mxu0  ;;  %v9438_v55 = vand.u32 4294901760, %v1283_v41 }
 0x21d   :  { %v1758_v9 = vand.u32 4294901760, %v9423_v59  ;;  %v3439_v12 = vand.u32 4294901760, %v1143_v43  ;;  %7589 = vmatprep.subr.bf16.mxu0 %v9421_v45  ;;  %7728 = vmatprep.subr.bf16.mxu1 %v7592_v24  ;;  %v1748_v4 = vand.u32 4294901760, %v1747_v62  ;;  %v9463_v62 = vand.u32 4294901760, %v9399_v60 }
 0x21e   :  { %v1765_v38 = vsub.f32 %v9417_v52, %v1764_v40  ;;  %v9435_v11 = vsub.f32 %v1141_v27, %v3441_v13  ;;  %7591 = vmatpush1.bf16.msra.mxu0 %v9415_v31  ;;  %7730 = vmatpush1.bf16.msra.mxu1 %v7594_v17  ;;  %12076 = vst [vmem:[#allocation36_spill] sm:$0xff] %v9438_v55 }
 0x21f   :  { %v9440_v54 = vpack.c.bf16 %v1764_v40, %v1752_v39  ;;  %v1759_v3 = vsub.f32 %v9423_v59, %v1758_v9  ;;  %v9444_v53 = vsub.f32 %v1143_v43, %v3439_v12  ;;  %v1148_v44 = vpop.f32.mrb[10].mxu0  ;;  %7593 = vmatprep.subr.bf16.mxu0 %v7592_v24  ;;  %v9446_v42 = vpack.c.bf16 %v1758_v9, %v1746_v35 }
 0x220   :  { %12075 = vst [vmem:[#allocation35_spill] sm:$0xff] %v9435_v11  ;;  %v3828_v27 = vand.u32 4294901760, %v9435_v11  ;;  %v3445_v48 = vand.u32 4294901760, %v1148_v44  ;;  %v1150_v36 = vpop.f32.mrb[11].mxu0  ;;  %v9452_v40 = vsub.f32 %v9402_v28, %v12080_v20  ;;  %v12081_v43 = vand.u32 4294901760, %v9287_v25  ;;  %12085 = vst [vmem:[#allocation42_spill] sm:$0xff] %v9463_v62 }
 0x221   :  { %12077 = vst [vmem:[#allocation37_spill] sm:$0xff] %v9440_v54  ;;  %12078 = vst [vmem:[#allocation38_spill] sm:$0xff] %v9444_v53  ;;  %v1766_v54 = vand.u32 4294901760, %v1765_v38  ;;  %v3822_v39 = vand.u32 4294901760, %v9444_v53  ;;  %v3443_v37 = vand.u32 4294901760, %v1150_v36  ;;  %v1760_v24 = vand.u32 4294901760, %v1759_v3 }
 0x222   :  { %12079 = vst [vmem:[#allocation39_spill] sm:$0xff] %v9446_v42  ;;  %1417 = vmatmul.mubr.f32.vlgmr.msra.gmra.mrb[24].mxu0 %v12081_v43  ;;  %v9457_v35 = vpack.c.bf16 %v3445_v48, %v3441_v13  ;;  %v9459_v9 = vsub.f32 %v1148_v44, %v3445_v48  ;;  %v12084_v42 = vmov 0.0   ;;  %v9466_v20 = vsub.f32 %v1283_v41, %v9438_v55 }
 0x223   :  { %7595 = vmatpush1.bf16.msra.mxu0 %v7594_v17  ;;  %1422 = vmatprep.mubr.f32.mxu0 %v12084_v42  ;;  %v1754_v38 = vand.u32 4294901760, %v1753_v34  ;;  %v9468_v28 = vpack.c.bf16 %v3443_v37, %v3439_v12  ;;  %v9470_v33 = vsub.f32 %v1150_v36, %v3443_v37  ;;  %v1155_v25 = vpop.f32.mrb[12].mxu0  ;;  %v7596_v3 = vpack.c.bf16 %v1760_v24, %v1748_v4  ;;  %v1229_v4 = vld [vmem:[#allocation8 + $0x50] sm:$0xff] }
 0x224   :  { %12082 = vst [vmem:[#allocation40_spill] sm:$0xff] %v9457_v35  ;;  %12083 = vst [vmem:[#allocation41_spill] sm:$0xff] %v9459_v9  ;;  %v3829_v13 = vsub.f32 %v9435_v11, %v3828_v27  ;;  %v3840_v48 = vand.u32 4294901760, %v9459_v9  ;;  %v3449_v44 = vand.u32 4294901760, %v1155_v25  ;;  %v1157_v43 = vpop.f32.mrb[13].mxu0  ;;  %v1245_v35 = vld [vmem:[#allocation8 + $0xd0] sm:$0xff]  ;;  %v3823_v41 = vsub.f32 %v9444_v53, %v3822_v39 }
 0x225   :  { %12086 = vst [vmem:[#allocation43_spill] sm:$0xff] %v9468_v28  ;;  %v3834_v34 = vand.u32 4294901760, %v9470_v33  ;;  %v3447_v12 = vand.u32 4294901760, %v1157_v43  ;;  %v12087_v36 = vand.u32 4294901760, %v9295_v46  ;;  %7597 = vmatprep.subr.bf16.mxu0 %v7596_v3  ;;  %v7598_v37 = vpack.c.bf16 %v1766_v54, %v1754_v38  ;;  %7729 = vmatprep.subr.bf16.mxu1 %v7596_v3 }
 0x226   :  { %v3841_v24 = vsub.f32 %v9459_v9, %v3840_v48  ;;  %v9481_v55 = vsub.f32 %v1155_v25, %v3449_v44  ;;  %v9491_v54 = vsel %vm76_vm0, %v1245_v35, 0  ;;  %v9501_v17 = vpack.c.bf16 %v3840_v48, %v3828_v27 }
 0x227   :  { %1428 = vmatmul.mubr.f32.gmra.mrb[26].mxu0 %v12087_v36  ;;  %v3835_v60 = vsub.f32 %v9470_v33, %v3834_v34  ;;  %v9488_v7 = vsub.f32 %v1157_v43, %v3447_v12  ;;  %7731 = vmatpush1.bf16.msra.mxu1 %v7598_v37  ;;  %v1162_v46 = vpop.f32.mrb[14].mxu0  ;;  %v9493_v38 = vpack.c.bf16 %v3834_v34, %v3822_v39  ;;  %v1286_v43 = vsel %vm76_vm0, %v1229_v4, 0 }
 0x228   :  { %12088 = vst [vmem:[#allocation44_spill] sm:$0xff] %v9481_v55  ;;  %1433 = vmatprep.mubr.f32.mxu0 %v12084_v42  ;;  %7599 = vmatpush1.bf16.msra.mxu0 %v7598_v37  ;;  %v3852_v25 = vand.u32 4294901760, %v9481_v55  ;;  %v3453_v3 = vand.u32 4294901760, %v1162_v46  ;;  %v12091_v36 = vpack.c.bf16 %v9377_v10, %v9351_v22  ;;  %v1164_v11 = vpop.f32.mrb[15].mxu0  ;;  %12092 = vst [vmem:[#allocation47_spill] sm:$0xff] %v9501_v17  ;;  %v3842_v37 = vand.u32 4294901760, %v3841_v24 }
 0x229   :  { %12089 = vst [vmem:[#allocation45_spill] sm:$0xff] %v9488_v7  ;;  %12090 = vst [vmem:[#allocation46_spill] sm:$0xff] %v9493_v38  ;;  %7633 = vmatprep.subr.bf16.mxu0 %v9468_v28  ;;  %v3846_v35 = vand.u32 4294901760, %v9488_v7  ;;  %v3451_v9 = vand.u32 4294901760, %v1164_v11  ;;  %v12093_v39 = vand.u32 4294901760, %v9300_v47  ;;  %v3836_v34 = vand.u32 4294901760, %v3835_v60 }
 0x22a   :  { %7601 = vmatprep.subr.bf16.mxu1 %v12091_v36  ;;  %v3830_v38 = vand.u32 4294901760, %v3829_v13  ;;  %v9506_v53 = vpack.c.bf16 %v3453_v3, %v3449_v44  ;;  %v9508_v22 = vsub.f32 %v1162_v46, %v3453_v3  ;;  %1966 = vmatmul.mubr.f32.vlgmr.msra.gmra.mrb[0].mxu1 %v9327_v57  ;;  %v12096_v10 = vand.u32 4294901760, %v9466_v20 }
 0x22b   :  { %1439 = vmatmul.mubr.f32.gmra.mrb[28].mxu0 %v12093_v39  ;;  %v9518_v48 = vsub.f32 %v9481_v55, %v3852_v25  ;;  %v9520_v47 = vpack.c.bf16 %v3451_v9, %v3447_v12  ;;  %v9522_v60 = vsub.f32 %v1164_v11, %v3451_v9  ;;  %v12099_v13 = vpack.c.bf16 %v9370_v2, %v9338_v16  ;;  %v1169_v44 = vpop.f32.mrb[16].mxu0 }
 0x22c   :  { %12094 = vst [vmem:[#allocation48_spill] sm:$0xff] %v9506_v53  ;;  %12095 = vst [vmem:[#allocation49_spill] sm:$0xff] %v9508_v22  ;;  %1444 = vmatprep.mubr.f32.mxu0 %v12084_v42  ;;  %v9515_v27 = vsub.f32 %v9466_v20, %v12096_v10  ;;  %1971 = vmatprep.mubr.f32.mxu1 %v12084_v42  ;;  %v3824_v4 = vand.u32 4294901760, %v3823_v41  ;;  %v3847_v24 = vsub.f32 %v9488_v7, %v3846_v35  ;;  %v1171_v9 = vpop.f32.mrb[17].mxu0 }
 0x22d   :  { %12097 = vst [vmem:[#allocation50_spill] sm:$0xff] %v9520_v47  ;;  %12098 = vst [vmem:[#allocation51_spill] sm:$0xff] %v9522_v60  ;;  %7603 = vmatpush1.bf16.msra.mxu1 %v12099_v13  ;;  %v3864_v46 = vand.u32 4294901760, %v9508_v22  ;;  %v5541_v36 = vand.u32 4294901760, %v1169_v44  ;;  %v12100_v11 = vpack.c.bf16 %v9423_v59, %v9408_v49  ;;  %v3858_v16 = vand.u32 4294901760, %v9522_v60 }
 0x22e   :  { %v5539_v2 = vand.u32 4294901760, %v1171_v9  ;;  %v12101_v12 = vand.u32 4294901760, %v9308_v18  ;;  %v9538_v41 = vpack.c.bf16 %v3836_v34, %v3824_v4  ;;  %v9540_v39 = vpack.c.bf16 %v3842_v37, %v3830_v38  ;;  %1973 = vmatmul.mubr.f32.gmra.mrb[2].mxu1 %v9341_v19 }
 0x22f   :  { %7605 = vmatprep.subr.bf16.mxu1 %v12100_v11  ;;  %v3865_v10 = vsub.f32 %v9508_v22, %v3864_v46  ;;  %v9543_v13 = vsub.f32 %v1169_v44, %v5541_v36  ;;  %v9547_v49 = vand.u32 4294901760, %v1286_v43  ;;  %v3859_v18 = vsub.f32 %v9522_v60, %v3858_v16  ;;  %v1176_v37 = vpop.f32.mrb[18].mxu0  ;;  %1978 = vmatprep.mubr.f32.mxu1 %v12084_v42  ;;  %v1230_v44 = vld [vmem:[#allocation8 + $0x58] sm:$0xff] }
 0x230   :  { %1450 = vmatmul.mubr.f32.gmra.mrb[30].mxu0 %v12101_v12  ;;  %v9552_v11 = vsub.f32 %v1171_v9, %v5539_v2  ;;  %v12104_v38 = vpack.c.bf16 %v9417_v52, %v9406_v23  ;;  %v9559_v4 = vpack.c.bf16 %v3858_v16, %v3846_v35  ;;  %v5545_v3 = vand.u32 4294901760, %v1176_v37  ;;  %v1178_v59 = vpop.f32.mrb[19].mxu0 }
 0x231   :  { %12102 = vst [vmem:[#allocation52_spill] sm:$0xff] %v9543_v13  ;;  %1455 = vmatprep.mubr.f32.mxu0 %v12084_v42  ;;  %v5928_v12 = vand.u32 4294901760, %v9543_v13  ;;  %v3848_v9 = vand.u32 4294901760, %v3847_v24  ;;  %v9563_v17 = vpack.c.bf16 %v3864_v46, %v3852_v25  ;;  %v3866_v28 = vand.u32 4294901760, %v3865_v10 }
 0x232   :  { %12103 = vst [vmem:[#allocation53_spill] sm:$0xff] %v9552_v11  ;;  %7607 = vmatpush1.bf16.msra.mxu1 %v12104_v38  ;;  %12105 = vst [vmem:[#allocation54_spill] sm:$0xff] %v9559_v4  ;;  %v5922_v23 = vand.u32 4294901760, %v9552_v11  ;;  %v5543_v52 = vand.u32 4294901760, %v1178_v59  ;;  %v12107_v38 = vand.u32 4294901760, %v9319_v15  ;;  %v3860_v34 = vand.u32 4294901760, %v3859_v18 }
 0x233   :  { %7609 = vmatprep.subr.bf16.mxu1 %v9375_v58  ;;  %12106 = vst [vmem:[#allocation55_spill] sm:$0xff] %v9563_v17  ;;  %v9568_v55 = vpack.c.bf16 %v5545_v3, %v5541_v36  ;;  %v9570_v35 = vsub.f32 %v1176_v37, %v5545_v3  ;;  %1980 = vmatmul.mubr.f32.gmra.mrb[4].mxu1 %v9358_v63  ;;  %v1289_v25 = vsel %vm76_vm0, %v1230_v44, 0  ;;  %v3854_v46 = vand.u32 4294901760, %v9518_v48  ;;  %v1183_v10 = vpop.f32.mrb[20].mxu0 }
 0x234   :  { %1461 = vmatmul.mubr.f32.gmra.mrb[32].mxu0 %v12107_v38  ;;  %v9575_v24 = vsub.f32 %v1286_v43, %v9547_v49  ;;  %v9579_v16 = vpack.c.bf16 %v5543_v52, %v5539_v2  ;;  %v9581_v15 = vsub.f32 %v1178_v59, %v5543_v52  ;;  %1985 = vmatprep.mubr.f32.mxu1 %v12084_v42  ;;  %v5549_v37 = vand.u32 4294901760, %v1183_v10  ;;  %v1185_v44 = vpop.f32.mrb[21].mxu0 }
 0x235   :  { %12108 = vst [vmem:[#allocation56_spill] sm:$0xff] %v9568_v55  ;;  %12109 = vst [vmem:[#allocation57_spill] sm:$0xff] %v9570_v35  ;;  %1466 = vmatprep.mubr.f32.mxu0 %v12084_v42  ;;  %v9584_v3 = vpack.c.bf16 %v3860_v34, %v3848_v9  ;;  %v5929_v36 = vsub.f32 %v9543_v13, %v5928_v12  ;;  %v5940_v18 = vand.u32 4294901760, %v9570_v35  ;;  %v5547_v59 = vand.u32 4294901760, %v1185_v44 }
 0x236   :  { %12110 = vst [vmem:[#allocation58_spill] sm:$0xff] %v9579_v16  ;;  %12111 = vst [vmem:[#allocation59_spill] sm:$0xff] %v9581_v15  ;;  %v5923_v48 = vsub.f32 %v9552_v11, %v5922_v23  ;;  %v5934_v2 = vand.u32 4294901760, %v9581_v15  ;;  %v12112_v52 = vand.u32 4294901760, %v9336_v61  ;;  %v9594_v38 = vpack.c.bf16 %v3866_v28, %v3854_v46  ;;  %v1231_v28 = vld [vmem:[#allocation8 + $0x60] sm:$0xff] }
 0x237   :  { %v5941_v34 = vsub.f32 %v9570_v35, %v5940_v18  ;;  %v9597_v9 = vsub.f32 %v1183_v10, %v5549_v37  ;;  %1987 = vmatmul.mubr.f32.gmra.mrb[6].mxu1 %v9366_v50  ;;  %v9601_v43 = vand.u32 4294901760, %v1289_v25  ;;  %v9606_v4 = vsub.f32 %v1185_v44, %v5547_v59  ;;  %v1190_v61 = vpop.f32.mrb[22].mxu0 }
 0x238   :  { %1472 = vmatmul.mubr.f32.gmra.mrb[34].mxu0 %v12112_v52  ;;  %v5935_v17 = vsub.f32 %v9581_v15, %v5934_v2  ;;  %1992 = vmatprep.mubr.f32.mxu1 %v12084_v42  ;;  %v9609_v46 = vpack.c.bf16 %v5934_v2, %v5922_v23  ;;  %v9611_v10 = vpack.c.bf16 %v5940_v18, %v5928_v12  ;;  %v5553_v55 = vand.u32 4294901760, %v1190_v61  ;;  %v1192_v22 = vpop.f32.mrb[23].mxu0 }
 0x239   :  { %12113 = vst [vmem:[#allocation60_spill] sm:$0xff] %v9597_v9  ;;  %1477 = vmatprep.mubr.f32.mxu0 %v12084_v42  ;;  %12114 = vst [vmem:[#allocation61_spill] sm:$0xff] %v9606_v4  ;;  %v5942_v52 = vand.u32 4294901760, %v5941_v34  ;;  %v5952_v35 = vand.u32 4294901760, %v9597_v9  ;;  %v5946_v13 = vand.u32 4294901760, %v9606_v4  ;;  %v5551_v11 = vand.u32 4294901760, %v1192_v22 }
 0x23a   :  { %12115 = vst [vmem:[#allocation62_spill] sm:$0xff] %v9609_v46  ;;  %12116 = vst [vmem:[#allocation63_spill] sm:$0xff] %v9611_v10  ;;  %v12117_v44 = vand.u32 4294901760, %v9349_v21  ;;  %v5924_v15 = vand.u32 4294901760, %v5923_v48  ;;  %v5936_v60 = vand.u32 4294901760, %v5935_v17  ;;  %v5930_v16 = vand.u32 4294901760, %v5929_v36 }
 0x23b   :  { %v9618_v23 = vpack.c.bf16 %v5553_v55, %v5549_v37  ;;  %v9620_v12 = vsub.f32 %v1190_v61, %v5553_v55  ;;  %1994 = vmatmul.mubr.f32.gmra.mrb[8].mxu1 %v9380_v29  ;;  %v1292_v18 = vsel %vm76_vm0, %v1231_v28, 0  ;;  %v9625_v2 = vpack.c.bf16 %v5551_v11, %v5547_v59  ;;  %v1232_v17 = vld [vmem:[#allocation8 + $0x68] sm:$0xff]  ;;  %v1246_v61 = vld [vmem:[#allocation8 + $0xd8] sm:$0xff] }
 0x23c   :  { %1483 = vmatmul.mubr.f32.gmra.mrb[36].mxu0 %v12117_v44  ;;  %v9627_v34 = vsub.f32 %v1192_v22, %v5551_v11  ;;  %1999 = vmatprep.mubr.f32.mxu1 %v12084_v42  ;;  %v9631_v21 = vsub.f32 %v1289_v25, %v9601_v43  ;;  %v9633_v36 = vpack.c.bf16 %v5936_v60, %v5924_v15  ;;  %v12124_v25 = vand.u32 4294901760, %v9385_v32  ;;  %v1233_v60 = vld [vmem:[#allocation8 + $0x70] sm:$0xff] }
 0x23d   :  { %12118 = vst [vmem:[#allocation64_spill] sm:$0xff] %v9618_v23  ;;  %12119 = vst [vmem:[#allocation65_spill] sm:$0xff] %v9620_v12  ;;  %1488 = vmatprep.mubr.f32.mxu0 %v12084_v42  ;;  %v5953_v55 = vsub.f32 %v9597_v9, %v5952_v35  ;;  %v5964_v37 = vand.u32 4294901760, %v9620_v12  ;;  %v9639_v59 = vpack.c.bf16 %v5942_v52, %v5930_v16  ;;  %v9645_v28 = vand.u32 4294901760, %v1292_v18 }
 0x23e   :  { %12120 = vst [vmem:[#allocation66_spill] sm:$0xff] %v9625_v2  ;;  %12121 = vst [vmem:[#allocation67_spill] sm:$0xff] %v9627_v34  ;;  %v5947_v22 = vsub.f32 %v9606_v4, %v5946_v13  ;;  %v5958_v11 = vand.u32 4294901760, %v9627_v34  ;;  %v9653_v16 = vand.u32 4294901760, %v9491_v54  ;;  %v1295_v52 = vsel %vm76_vm0, %v1232_v17, 0 }
 0x23f   :  { %12122 = vst [vmem:[#allocation68_spill] sm:$0xff] %v9633_v36  ;;  %12123 = vst [vmem:[#allocation69_spill] sm:$0xff] %v9639_v59  ;;  %v5965_v15 = vsub.f32 %v9620_v12, %v5964_v37  ;;  %2001 = vmatmul.mubr.f32.gmra.mrb[10].mxu1 %v9463_v62  ;;  %v9656_v44 = vpack.c.bf16 %v5964_v37, %v5952_v35  ;;  %v9662_v48 = vsel %vm76_vm0, %v1246_v61, 0  ;;  %v5954_v10 = vand.u32 4294901760, %v5953_v55  ;;  %v1234_v55 = vld [vmem:[#allocation8 + $0x78] sm:$0xff] }
 0x240   :  { %1494 = vmatmul.mubr.f32.gmra.mrb[38].mxu0 %v12124_v25  ;;  %12125 = vst [vmem:[#allocation70_spill] sm:$0xff] %v9653_v16  ;;  %v5959_v32 = vsub.f32 %v9627_v34, %v5958_v11  ;;  %2006 = vmatprep.mubr.f32.mxu1 %v12084_v42  ;;  %v1515_v25 = vand.u32 4294901760, %v9515_v27  ;;  %v9664_v7 = vpack.c.bf16 %v5958_v11, %v5946_v13  ;;  %v12128_v9 = vand.u32 4294901760, %v9575_v24 }
 0x241   :  { %1499 = vmatprep.mubr.f32.mxu0 %v12084_v42  ;;  %12126 = vst [vmem:[#allocation71_spill] sm:$0xff] %v9656_v44  ;;  %v5966_v46 = vand.u32 4294901760, %v5965_v15  ;;  %v11771_v35 = vand.u32 4294901760, %v9631_v21  ;;  %v12129_v37 = vand.u32 4294901760, %v9452_v40  ;;  %v9673_v44 = vsub.f32 %v1292_v18, %v9645_v28 }
 0x242   :  { %12127 = vst [vmem:[#allocation72_spill] sm:$0xff] %v9664_v7  ;;  %v1525_v17 = vsub.f32 %v9575_v24, %v12128_v9  ;;  %v9675_v27 = vand.u32 4294901760, %v1295_v52  ;;  %v5948_v61 = vand.u32 4294901760, %v5947_v22  ;;  %v5960_v12 = vand.u32 4294901760, %v5959_v32 }
 0x243   :  { %2008 = vmatmul.mubr.f32.gmra.mrb[12].mxu1 %v9653_v16  ;;  %v9680_v13 = vand.u32 4294901760, %v9662_v48  ;;  %v1298_v9 = vsel %vm76_vm0, %v1233_v60, 0  ;;  %v9683_v11 = vpack.c.bf16 %v5966_v46, %v5954_v10  ;;  %v1536_v22 = vsub.f32 %v9631_v21, %v11771_v35  ;;  %v1235_v10 = vld [vmem:[#allocation8 + $0x80] sm:$0xff] }
 0x244   :  { %1505 = vmatmul.mubr.f32.gmra.mrb[40].mxu0 %v12129_v37  ;;  %2013 = vmatprep.mubr.f32.mxu1 %v12084_v42  ;;  %v9686_v40 = vpack.c.bf16 %v5960_v12, %v5948_v61  ;;  %v1526_v18 = vand.u32 4294901760, %v1525_v17  ;;  %v11770_v15 = vand.u32 4294901760, %v9673_v44  ;;  %v9693_v32 = vsub.f32 %v1295_v52, %v9675_v27 }
 0x245   :  { %1510 = vmatprep.mubr.f32.mxu0 %v12084_v42  ;;  %12130 = vst [vmem:[#allocation73_spill] sm:$0xff] %v9680_v13  ;;  %12131 = vst [vmem:[#allocation74_spill] sm:$0xff] %v9683_v11  ;;  %v9695_v37 = vand.u32 4294901760, %v1298_v9  ;;  %v1301_v46 = vsel %vm76_vm0, %v1234_v55, 0  ;;  %v1537_v60 = vand.u32 4294901760, %v1536_v22  ;;  %v1304_v61 = vsel %vm76_vm0, %v1235_v10, 0 }
 0x246   :  { %12132 = vst [vmem:[#allocation75_spill] sm:$0xff] %v9686_v40  ;;  %v9701_v12 = vand.u32 4294901760, %v1301_v46  ;;  %v1547_v52 = vsub.f32 %v9673_v44, %v11770_v15  ;;  %v1236_v55 = vld [vmem:[#allocation8 + $0x88] sm:$0xff]  ;;  %v9723_v35 = vand.u32 4294901760, %v1304_v61 }
 0x247   :  { %2015 = vmatmul.mubr.f32.gmra.mrb[14].mxu1 %v9680_v13  ;;  %v9708_v17 = vsub.f32 %v1298_v9, %v9695_v37  ;;  %v1307_v10 = vsel %vm76_vm0, %v1236_v55, 0 }
 0x248   :  { %1516 = vmatmul.mubr.f32.gmra.mrb[42].mxu0 %v1515_v25  ;;  %2101 = vmatprep.mubr.f32.mxu1 %v12084_v42  ;;  %v11772_v25 = vand.u32 4294901760, %v9693_v32  ;;  %v1548_v22 = vand.u32 4294901760, %v1547_v52  ;;  %v9736_v7 = vsub.f32 %v1304_v61, %v9723_v35  ;;  %v9738_v4 = vand.u32 4294901760, %v1307_v10 }
 0x249   :  { %1521 = vmatprep.mubr.f32.mxu0 %v12084_v42  ;;  %v11774_v15 = vand.u32 4294901760, %v9708_v17 }
 0x24a   :  { %v1558_v9 = vsub.f32 %v9693_v32, %v11772_v25  ;;  %12133 = vst [vmem:[#allocation76_spill] sm:$0xff] %v9738_v4  ;;  %v11777_v61 = vand.u32 4294901760, %v9736_v7 }
 0x24b   :  { %2104 = vmatmul.mubr.f32.vlgmr.msra.gmra.mrb[16].mxu1 %v9252_v1  ;;  %v1569_v25 = vsub.f32 %v9708_v17, %v11774_v15  ;;  %v9749_v15 = vsub.f32 %v1307_v10, %v9738_v4 }
 0x24c   :  { %1527 = vmatmul.mubr.f32.gmra.mrb[44].mxu0 %v1526_v18  ;;  %7611 = vmatpush1.bf16.msra.mxu1 %v9368_v30  ;;  %v9717_v18 = vsub.f32 %v1301_v46, %v9701_v12  ;;  %v1237_v46 = vld [vmem:[#allocation8 + $0x90] sm:$0xff]  ;;  %v1559_v52 = vand.u32 4294901760, %v1558_v9 }
 0x24d   :  { %1532 = vmatprep.mubr.f32.mxu0 %v12084_v42  ;;  %2109 = vmatprep.mubr.f32.mxu1 %v12084_v42  ;;  %v1310_v55 = vsel %vm76_vm0, %v1237_v46, 0  ;;  %v1570_v9 = vand.u32 4294901760, %v1569_v25  ;;  %v1591_v25 = vsub.f32 %v9736_v7, %v11777_v61 }
 0x24e   :  { %7613 = vmatprep.subr.bf16.mxu1 %v9421_v45  ;;  %v9751_v34 = vand.u32 4294901760, %v1310_v55 }
 0x24f   :  { %2112 = vmatmul.mubr.f32.gmra.mrb[18].mxu1 %v9258_v5 }
 0x250   :  { %1538 = vmatmul.mubr.f32.gmra.mrb[46].mxu0 %v1537_v60  ;;  %7615 = vmatpush1.bf16.msra.mxu1 %v9415_v31  ;;  %v11776_v60 = vand.u32 4294901760, %v9717_v18  ;;  %12134 = vst [vmem:[#allocation77_spill] sm:$0xff] %v9751_v34  ;;  %v9762_v10 = vsub.f32 %v1310_v55, %v9751_v34 }
 0x251   :  { %1543 = vmatprep.mubr.f32.mxu0 %v12084_v42  ;;  %2117 = vmatprep.mubr.f32.mxu1 %v12084_v42 }
 0x252   :  { %7617 = vmatprep.subr.bf16.mxu1 %v9411_v0  ;;  %v1238_v0 = vld [vmem:[#allocation8 + $0x98] sm:$0xff] }
 0x253   :  { %2120 = vmatmul.mubr.f32.gmra.mrb[20].mxu1 %v9261_v6  ;;  %v1313_v46 = vsel %vm76_vm0, %v1238_v0, 0  ;;  %v1592_v0 = vand.u32 4294901760, %v1591_v25 }
 0x254   :  { %1549 = vmatmul.mubr.f32.gmra.mrb[48].mxu0 %v1548_v22  ;;  %2125 = vmatprep.mubr.f32.mxu1 %v12084_v42  ;;  %v1580_v22 = vsub.f32 %v9717_v18, %v11776_v60  ;;  %v9764_v60 = vand.u32 4294901760, %v1313_v46 }
 0x255   :  { %1554 = vmatprep.mubr.f32.mxu0 %v12084_v42 }
 0x256   :  { %v1581_v11 = vand.u32 4294901760, %v1580_v22  ;;  %12135 = vst [vmem:[#allocation78_spill] sm:$0xff] %v9764_v60  ;;  %v9774_v61 = vsub.f32 %v1313_v46, %v9764_v60 }
 0x257   :  { %2128 = vmatmul.mubr.f32.gmra.mrb[22].mxu1 %v9264_v8 }
 0x258   :  { %1560 = vmatmul.mubr.f32.gmra.mrb[50].mxu0 %v1559_v52  ;;  %2133 = vmatprep.mubr.f32.mxu1 %v12084_v42  ;;  %v11778_v52 = vand.u32 4294901760, %v9749_v15  ;;  %v11780_v25 = vand.u32 4294901760, %v9774_v61 }
 0x259   :  { %1565 = vmatprep.mubr.f32.mxu0 %v12084_v42 }
 0x25a   :  { %v1602_v22 = vsub.f32 %v9749_v15, %v11778_v52  ;;  %v9785_v52 = vsub.f32 %v9303_v51, %v9327_v57  ;;  %v12137_v51 = vld [vmem:[#allocation22_spill] sm:$0xff] }
 0x25b   :  { %2136 = vmatmul.mubr.f32.gmra.mrb[24].mxu1 %v9272_v14  ;;  %v3324_v57 = vld [vmem:[#allocation8 + $0x108] sm:$0xff] }
 0x25c   :  { %1571 = vmatmul.mubr.f32.gmra.mrb[52].mxu0 %v1570_v9  ;;  %2141 = vmatprep.mubr.f32.mxu1 %v12084_v42  ;;  %v11779_v9 = vand.u32 4294901760, %v9762_v10  ;;  %v1603_v55 = vand.u32 4294901760, %v1602_v22  ;;  %v11782_v22 = vand.u32 4294901760, %v9785_v52 }
 0x25d   :  { %1576 = vmatprep.mubr.f32.mxu0 %v12084_v42 }
 0x25f   :  { %2144 = vmatmul.mubr.f32.gmra.mrb[26].mxu1 %v9279_v56 }
 0x260   :  { %1582 = vmatmul.mubr.f32.gmra.mrb[54].mxu0 %v1581_v11  ;;  %2149 = vmatprep.mubr.f32.mxu1 %v12084_v42  ;;  %v1613_v11 = vsub.f32 %v9762_v10, %v11779_v9  ;;  %v12136_v9 = vld [vmem:[#allocation21_spill] sm:$0xff] }
 0x261   :  { %1587 = vmatprep.mubr.f32.mxu0 %v12084_v42  ;;  %v9796_v40 = vsub.f32 %v12136_v9, %v9341_v19  ;;  %v12139_v9 = vld [vmem:[#allocation33_spill] sm:$0xff] }
 0x262   :  { %v1614_v46 = vand.u32 4294901760, %v1613_v11 }
 0x263   :  { %2152 = vmatmul.mubr.f32.gmra.mrb[28].mxu1 %v9282_v26  ;;  %v11784_v11 = vand.u32 4294901760, %v9796_v40 }
 0x264   :  { %1593 = vmatmul.mubr.f32.gmra.mrb[56].mxu0 %v1592_v0  ;;  %2157 = vmatprep.mubr.f32.mxu1 %v12084_v42  ;;  %v1624_v0 = vsub.f32 %v9774_v61, %v11780_v25  ;;  %v12138_v25 = vld [vmem:[#allocation24_spill] sm:$0xff] }
 0x265   :  { %1598 = vmatprep.mubr.f32.mxu0 %v12084_v42  ;;  %v9807_v36 = vsub.f32 %v12138_v25, %v9358_v63 }
 0x266   :  { %v1625_v59 = vand.u32 4294901760, %v1624_v0 }
 0x267   :  { %2160 = vmatmul.mubr.f32.gmra.mrb[30].mxu1 %v12137_v51  ;;  %v11787_v0 = vand.u32 4294901760, %v9807_v36 }
 0x268   :  { %1604 = vmatmul.mubr.f32.gmra.mrb[58].mxu0 %v1603_v55  ;;  %2165 = vmatprep.mubr.f32.mxu1 %v12084_v42  ;;  %v1635_v55 = vsub.f32 %v9785_v52, %v11782_v22  ;;  %v12140_v22 = vld [vmem:[#allocation26_spill] sm:$0xff] }
 0x269   :  { %1609 = vmatprep.mubr.f32.mxu0 %v12084_v42  ;;  %v9818_v2 = vsub.f32 %v12140_v22, %v9366_v50 }
 0x26a   :  { %v1636_v23 = vand.u32 4294901760, %v1635_v55 }
 0x26b   :  { %2168 = vmatmul.mubr.f32.gmra.mrb[32].mxu1 %v12139_v9  ;;  %v11790_v55 = vand.u32 4294901760, %v9818_v2 }
 0x26c   :  { %1615 = vmatmul.mubr.f32.gmra.mrb[60].mxu0 %v1614_v46  ;;  %2173 = vmatprep.mubr.f32.mxu1 %v12084_v42  ;;  %v1646_v46 = vsub.f32 %v9796_v40, %v11784_v11  ;;  %v12141_v11 = vld [vmem:[#allocation28_spill] sm:$0xff] }
 0x26d   :  { %1620 = vmatprep.mubr.f32.mxu0 %v12084_v42  ;;  %v9829_v63 = vsub.f32 %v12141_v11, %v9380_v29  ;;  %v12158_v29 = vld [vmem:[#allocation37_spill] sm:$0xff] }
 0x26e   :  { %v1647_v25 = vand.u32 4294901760, %v1646_v46 }
 0x26f   :  { %2176 = vmatmul.mubr.f32.gmra.mrb[34].mxu1 %v9466_v20  ;;  %v11791_v46 = vand.u32 4294901760, %v9829_v63 }
 0x270   :  { %1626 = vmatmul.mubr.f32.gmra.mrb[62].mxu0 %v1625_v59  ;;  %2181 = vmatprep.mubr.f32.mxu1 %v12084_v42  ;;  %v1657_v59 = vsub.f32 %v9807_v36, %v11787_v0  ;;  %v12142_v0 = vld [vmem:[#allocation32_spill] sm:$0xff] }
 0x271   :  { %1631 = vmatprep.mubr.f32.mxu0 %v12084_v42  ;;  %v9840_v50 = vsub.f32 %v12142_v0, %v9463_v62  ;;  %v12157_v62 = vand.u32 4294901760, %v9258_v5  ;;  %v12160_v5 = vand.u32 4294901760, %v9264_v8 }
 0x272   :  { %v1658_v22 = vand.u32 4294901760, %v1657_v59 }
 0x273   :  { %2184 = vmatmul.mubr.f32.gmra.mrb[36].mxu1 %v9575_v24  ;;  %v11792_v59 = vand.u32 4294901760, %v9840_v50 }
 0x274   :  { %1637 = vmatmul.mubr.f32.gmra.mrb[64].mxu0 %v1636_v23  ;;  %2189 = vmatprep.mubr.f32.mxu1 %v12084_v42  ;;  %v1668_v23 = vsub.f32 %v9818_v2, %v11790_v55  ;;  %v9851_v55 = vsub.f32 %v9491_v54, %v9653_v16  ;;  %v12156_v16 = vld [vmem:[#allocation39_spill] sm:$0xff] }
 0x275   :  { %1642 = vmatprep.mubr.f32.mxu0 %v12084_v42 }
 0x276   :  { %v1669_v11 = vand.u32 4294901760, %v1668_v23  ;;  %v11794_v23 = vand.u32 4294901760, %v9851_v55 }
 0x277   :  { %2192 = vmatmul.mubr.f32.gmra.mrb[38].mxu1 %v9631_v21 }
 0x278   :  { %1648 = vmatmul.mubr.f32.gmra.mrb[66].mxu0 %v1647_v25  ;;  %2197 = vmatprep.mubr.f32.mxu1 %v12084_v42  ;;  %v1679_v25 = vsub.f32 %v9829_v63, %v11791_v46  ;;  %v9862_v46 = vsub.f32 %v9662_v48, %v9680_v13  ;;  %v12155_v13 = vld [vmem:[#allocation34_spill] sm:$0xff] }
 0x279   :  { %1653 = vmatprep.mubr.f32.mxu0 %v12084_v42 }
 0x27a   :  { %v1680_v0 = vand.u32 4294901760, %v1679_v25  ;;  %v11793_v25 = vand.u32 4294901760, %v9862_v46 }
 0x27b   :  { %2200 = vmatmul.mubr.f32.gmra.mrb[40].mxu1 %v9673_v44 }
 0x27c   :  { %1659 = vmatmul.mubr.f32.gmra.mrb[68].mxu0 %v1658_v22  ;;  %2205 = vmatprep.mubr.f32.mxu1 %v12084_v42  ;;  %v1690_v22 = vsub.f32 %v9840_v50, %v11792_v59  ;;  %v1712_v59 = vsub.f32 %v9862_v46, %v11793_v25  ;;  %v12150_v25 = vld [vmem:[#allocation19_spill] sm:$0xff] }
 0x27d   :  { %1664 = vmatprep.mubr.f32.mxu0 %v12084_v42 }
 0x27e   :  { %v1691_v54 = vand.u32 4294901760, %v1690_v22  ;;  %v12143_v22 = vld [vmem:[#allocation13_spill] sm:$0xff] }
 0x27f   :  { %2208 = vmatmul.mubr.f32.gmra.mrb[42].mxu1 %v9693_v32 }
 0x280   :  { %1670 = vmatmul.mubr.f32.gmra.mrb[70].mxu0 %v1669_v11  ;;  %2213 = vmatprep.mubr.f32.mxu1 %v12084_v42  ;;  %v1701_v11 = vsub.f32 %v9851_v55, %v11794_v23  ;;  %v12151_v23 = vld [vmem:[#allocation20_spill] sm:$0xff] }
 0x281   :  { %1675 = vmatprep.mubr.f32.mxu0 %v12084_v42 }
 0x282   :  { %v1702_v48 = vand.u32 4294901760, %v1701_v11  ;;  %v12146_v11 = vld [vmem:[#allocation15_spill] sm:$0xff] }
 0x283   :  { %2216 = vmatmul.mubr.f32.gmra.mrb[44].mxu1 %v9708_v17 }
 0x284   :  { %1681 = vmatmul.mubr.f32.gmra.mrb[72].mxu0 %v1680_v0  ;;  %2221 = vmatprep.mubr.f32.mxu1 %v12084_v42  ;;  %v1713_v0 = vand.u32 4294901760, %v1712_v59  ;;  %v12145_v59 = vld [vmem:[#allocation14_spill] sm:$0xff] }
 0x285   :  { %1686 = vmatprep.mubr.f32.mxu0 %v12084_v42 }
 0x287   :  { %2224 = vmatmul.mubr.f32.gmra.mrb[46].mxu1 %v9717_v18 }
 0x288   :  { %1692 = vmatmul.mubr.f32.gmra.mrb[74].mxu0 %v1691_v54  ;;  %2229 = vmatprep.mubr.f32.mxu1 %v12084_v42  ;;  %v12144_v54 = vld [vmem:[#allocation40_spill] sm:$0xff] }
 0x289   :  { %1697 = vmatprep.mubr.f32.mxu0 %v12084_v42 }
 0x28b   :  { %2232 = vmatmul.mubr.f32.gmra.mrb[48].mxu1 %v9736_v7 }
 0x28c   :  { %1703 = vmatmul.mubr.f32.gmra.mrb[76].mxu0 %v1702_v48  ;;  %2237 = vmatprep.mubr.f32.mxu1 %v12084_v42  ;;  %v12147_v48 = vld [vmem:[#allocation16_spill] sm:$0xff] }
 0x28d   :  { %1708 = vmatprep.mubr.f32.mxu0 %v12084_v42 }
 0x28f   :  { %2240 = vmatmul.mubr.f32.gmra.mrb[50].mxu1 %v9749_v15 }
 0x290   :  { %1714 = vmatmul.mubr.f32.gmra.mrb[78].mxu0 %v1713_v0  ;;  %2245 = vmatprep.mubr.f32.mxu1 %v12084_v42  ;;  %v12149_v0 = vld [vmem:[#allocation18_spill] sm:$0xff] }
 0x291   :  { %1824 = vmatprep.mubr.f32.mxu0 %v12084_v42 }
 0x293   :  { %2248 = vmatmul.mubr.f32.gmra.mrb[52].mxu1 %v9762_v10 }
 0x294   :  { %1826 = vmatmul.mubr.f32.vlgmr.msra.gmra.mrb[24].mxu0 %v12143_v22  ;;  %2253 = vmatprep.mubr.f32.mxu1 %v12084_v42 }
 0x295   :  { %7635 = vmatpush1.bf16.msra.mxu0 %v12144_v54  ;;  %1831 = vmatprep.mubr.f32.mxu0 %v12084_v42  ;;  %v12154_v54 = vand.u32 4294901760, %v9252_v1  ;;  %v12159_v1 = vand.u32 4294901760, %v9261_v6 }
 0x296   :  { %7637 = vmatprep.subr.bf16.mxu0 %v9520_v47  ;;  %v12153_v47 = vld [vmem:[#allocation36_spill] sm:$0xff] }
 0x297   :  { %2256 = vmatmul.mubr.f32.gmra.mrb[54].mxu1 %v9774_v61 }
 0x298   :  { %1833 = vmatmul.mubr.f32.gmra.mrb[26].mxu0 %v12145_v59  ;;  %2261 = vmatprep.mubr.f32.mxu1 %v12084_v42 }
 0x299   :  { %7639 = vmatpush1.bf16.msra.mxu0 %v9506_v53  ;;  %1838 = vmatprep.mubr.f32.mxu0 %v12084_v42  ;;  %v12152_v53 = vld [vmem:[#allocation30_spill] sm:$0xff] }
 0x29a   :  { %7641 = vmatprep.subr.bf16.mxu0 %v9538_v41  ;;  %v12148_v41 = vld [vmem:[#allocation17_spill] sm:$0xff] }
 0x29b   :  { %2264 = vmatmul.mubr.f32.gmra.mrb[0].mxu1 %v9785_v52 }
 0x29c   :  { %1840 = vmatmul.mubr.f32.gmra.mrb[28].mxu0 %v12146_v11  ;;  %2269 = vmatprep.mubr.f32.mxu1 %v12084_v42 }
 0x29d   :  { %1845 = vmatprep.mubr.f32.mxu0 %v12084_v42 }
 0x29f   :  { %2272 = vmatmul.mubr.f32.gmra.mrb[2].mxu1 %v9796_v40 }
 0x2a0   :  { %1847 = vmatmul.mubr.f32.gmra.mrb[30].mxu0 %v12147_v48  ;;  %2277 = vmatprep.mubr.f32.mxu1 %v12084_v42 }
 0x2a1   :  { %1852 = vmatprep.mubr.f32.mxu0 %v12084_v42 }
 0x2a3   :  { %2280 = vmatmul.mubr.f32.gmra.mrb[4].mxu1 %v9807_v36 }
 0x2a4   :  { %1854 = vmatmul.mubr.f32.gmra.mrb[32].mxu0 %v12148_v41  ;;  %2285 = vmatprep.mubr.f32.mxu1 %v12084_v42 }
 0x2a5   :  { %1859 = vmatprep.mubr.f32.mxu0 %v12084_v42 }
 0x2a7   :  { %2288 = vmatmul.mubr.f32.gmra.mrb[6].mxu1 %v9818_v2 }
 0x2a8   :  { %1861 = vmatmul.mubr.f32.gmra.mrb[34].mxu0 %v12149_v0  ;;  %2293 = vmatprep.mubr.f32.mxu1 %v12084_v42 }
 0x2a9   :  { %1866 = vmatprep.mubr.f32.mxu0 %v12084_v42 }
 0x2ab   :  { %2296 = vmatmul.mubr.f32.gmra.mrb[8].mxu1 %v9829_v63 }
 0x2ac   :  { %1868 = vmatmul.mubr.f32.gmra.mrb[36].mxu0 %v12150_v25  ;;  %2301 = vmatprep.mubr.f32.mxu1 %v12084_v42 }
 0x2ad   :  { %1873 = vmatprep.mubr.f32.mxu0 %v12084_v42 }
 0x2af   :  { %2304 = vmatmul.mubr.f32.gmra.mrb[10].mxu1 %v9840_v50 }
 0x2b0   :  { %1875 = vmatmul.mubr.f32.gmra.mrb[38].mxu0 %v12151_v23  ;;  %2309 = vmatprep.mubr.f32.mxu1 %v12084_v42 }
 0x2b1   :  { %1880 = vmatprep.mubr.f32.mxu0 %v12084_v42 }
 0x2b3   :  { %2312 = vmatmul.mubr.f32.gmra.mrb[12].mxu1 %v9851_v55 }
 0x2b4   :  { %1882 = vmatmul.mubr.f32.gmra.mrb[40].mxu0 %v12152_v53  ;;  %2317 = vmatprep.mubr.f32.mxu1 %v12084_v42 }
 0x2b5   :  { %1887 = vmatprep.mubr.f32.mxu0 %v12084_v42 }
 0x2b7   :  { %2320 = vmatmul.mubr.f32.gmra.mrb[14].mxu1 %v9862_v46 }
 0x2b8   :  { %1889 = vmatmul.mubr.f32.gmra.mrb[42].mxu0 %v12153_v47  ;;  %2398 = vmatprep.mubr.f32.mxu1 %v12084_v42 }
 0x2b9   :  { %1894 = vmatprep.mubr.f32.mxu0 %v12084_v42 }
 0x2bb   :  { %2402 = vmatmul.mubr.f32.vlgmr.msra.gmra.mrb[16].mxu1 %v12154_v54 }
 0x2bc   :  { %1896 = vmatmul.mubr.f32.gmra.mrb[44].mxu0 %v9547_v49  ;;  %7619 = vmatpush1.bf16.msra.mxu1 %v12155_v13 }
 0x2bd   :  { %1901 = vmatprep.mubr.f32.mxu0 %v12084_v42  ;;  %2407 = vmatprep.mubr.f32.mxu1 %v12084_v42 }
 0x2be   :  { %7621 = vmatprep.subr.bf16.mxu1 %v12156_v16  ;;  %v12163_v16 = vand.u32 4294901760, %v9279_v56 }
 0x2bf   :  { %2411 = vmatmul.mubr.f32.gmra.mrb[18].mxu1 %v12157_v62  ;;  %v3320_v62 = vld [vmem:[#allocation8 + $0xe8] sm:$0xff] }
 0x2c0   :  { %1903 = vmatmul.mubr.f32.gmra.mrb[46].mxu0 %v9601_v43  ;;  %7623 = vmatpush1.bf16.msra.mxu1 %v12158_v29  ;;  %v3319_v29 = vld [vmem:[#allocation8 + $0xe0] sm:$0xff]  ;;  %v3359_v13 = vsel %vm76_vm0, %v3320_v62, 0 }
 0x2c1   :  { %1908 = vmatprep.mubr.f32.mxu0 %v12084_v42  ;;  %2416 = vmatprep.mubr.f32.mxu1 %v12084_v42  ;;  %v3356_v6 = vsel %vm76_vm0, %v3319_v29, 0  ;;  %v3322_v29 = vld [vmem:[#allocation8 + $0xf8] sm:$0xff] }
 0x2c2   :  { %7625 = vmatprep.subr.bf16.mxu1 %v9375_v58  ;;  %v12161_v58 = vand.u32 4294901760, %v9272_v14  ;;  %v9961_v8 = vand.u32 4294901760, %v3356_v6  ;;  %v3321_v14 = vld [vmem:[#allocation8 + $0xf0] sm:$0xff] }
 0x2c3   :  { %2420 = vmatmul.mubr.f32.gmra.mrb[20].mxu1 %v12159_v1  ;;  %v9972_v1 = vand.u32 4294901760, %v3359_v13  ;;  %v3362_v56 = vsel %vm76_vm0, %v3321_v14, 0  ;;  %v3323_v14 = vld [vmem:[#allocation8 + $0x100] sm:$0xff] }
 0x2c4   :  { %1910 = vmatmul.mubr.f32.gmra.mrb[48].mxu0 %v9645_v28  ;;  %2425 = vmatprep.mubr.f32.mxu1 %v12084_v42  ;;  %12162 = vst [vmem:[#allocation21_spill] sm:$0xff] %v9961_v8  ;;  %v9970_v54 = vsub.f32 %v3356_v6, %v9961_v8  ;;  %v9984_v6 = vand.u32 4294901760, %v3362_v56 }
 0x2c5   :  { %1915 = vmatprep.mubr.f32.mxu0 %v12084_v42  ;;  %12165 = vst [vmem:[#allocation24_spill] sm:$0xff] %v9972_v1  ;;  %v9982_v62 = vsub.f32 %v3359_v13, %v9972_v1 }
 0x2c6   :  { %12164 = vst [vmem:[#allocation22_spill] sm:$0xff] %v9970_v54  ;;  %12167 = vst [vmem:[#allocation33_spill] sm:$0xff] %v9984_v6 }
 0x2c7   :  { %2429 = vmatmul.mubr.f32.gmra.mrb[22].mxu1 %v12160_v5  ;;  %v12166_v5 = vand.u32 4294901760, %v9282_v26  ;;  %v12168_v26 = vand.u32 4294901760, %v12137_v51  ;;  %v11820_v19 = vand.u32 4294901760, %v9982_v62  ;;  %v3368_v51 = vsel %vm76_vm0, %v3323_v14, 0 }
 0x2c8   :  { %1917 = vmatmul.mubr.f32.gmra.mrb[50].mxu0 %v9675_v27  ;;  %2434 = vmatprep.mubr.f32.mxu1 %v12084_v42  ;;  %v12173_v14 = vand.u32 4294901760, %v9466_v20 }
 0x2c9   :  { %1922 = vmatprep.mubr.f32.mxu0 %v12084_v42 }
 0x2cb   :  { %2438 = vmatmul.mubr.f32.gmra.mrb[24].mxu1 %v12161_v58  ;;  %v11815_v58 = vand.u32 4294901760, %v9970_v54 }
 0x2cc   :  { %1924 = vmatmul.mubr.f32.gmra.mrb[52].mxu0 %v9695_v37  ;;  %2443 = vmatprep.mubr.f32.mxu1 %v12084_v42 }
 0x2cd   :  { %1929 = vmatprep.mubr.f32.mxu0 %v12084_v42  ;;  %v3515_v13 = vsub.f32 %v9970_v54, %v11815_v58 }
 0x2cf   :  { %2447 = vmatmul.mubr.f32.gmra.mrb[26].mxu1 %v12163_v16  ;;  %v3365_v16 = vsel %vm76_vm0, %v3322_v29, 0  ;;  %v9999_v29 = vsub.f32 %v3362_v56, %v9984_v6  ;;  %v3516_v58 = vand.u32 4294901760, %v3515_v13  ;;  %v3526_v56 = vsub.f32 %v9982_v62, %v11820_v19 }
 0x2d0   :  { %1931 = vmatmul.mubr.f32.gmra.mrb[54].mxu0 %v9701_v12  ;;  %2452 = vmatprep.mubr.f32.mxu1 %v12084_v42 }
 0x2d1   :  { %1936 = vmatprep.mubr.f32.mxu0 %v12084_v42  ;;  %12170 = vst [vmem:[#allocation28_spill] sm:$0xff] %v9999_v29 }
 0x2d3   :  { %2456 = vmatmul.mubr.f32.gmra.mrb[28].mxu1 %v12166_v5  ;;  %v9991_v5 = vand.u32 4294901760, %v3365_v16 }
 0x2d4   :  { %1938 = vmatmul.mubr.f32.gmra.mrb[56].mxu0 %v9723_v35  ;;  %2461 = vmatprep.mubr.f32.mxu1 %v12084_v42 }
 0x2d5   :  { %1943 = vmatprep.mubr.f32.mxu0 %v12084_v42  ;;  %12169 = vst [vmem:[#allocation26_spill] sm:$0xff] %v9991_v5 }
 0x2d7   :  { %2465 = vmatmul.mubr.f32.gmra.mrb[30].mxu1 %v12168_v26  ;;  %v12171_v26 = vand.u32 4294901760, %v12139_v9  ;;  %v11821_v9 = vand.u32 4294901760, %v9999_v29 }
 0x2d8   :  { %1945 = vmatmul.mubr.f32.gmra.mrb[58].mxu0 %v9738_v4  ;;  %2470 = vmatprep.mubr.f32.mxu1 %v12084_v42  ;;  %v10009_v4 = vand.u32 4294901760, %v3368_v51 }
 0x2d9   :  { %1950 = vmatprep.mubr.f32.mxu0 %v12084_v42  ;;  %v3537_v19 = vsub.f32 %v9999_v29, %v11821_v9  ;;  %v3327_v9 = vld [vmem:[#allocation8 + $0x120] sm:$0xff]  ;;  %v12178_v29 = vld [vmem:[#allocation38_spill] sm:$0xff] }
 0x2da   :  { %12172 = vst [vmem:[#allocation32_spill] sm:$0xff] %v10009_v4  ;;  %v10023_v13 = vsub.f32 %v3368_v51, %v10009_v4  ;;  %v3326_v51 = vld [vmem:[#allocation8 + $0x118] sm:$0xff] }
 0x2db   :  { %2474 = vmatmul.mubr.f32.gmra.mrb[32].mxu1 %v12171_v26  ;;  %v3371_v26 = vsel %vm76_vm0, %v3324_v57, 0 }
 0x2dc   :  { %1952 = vmatmul.mubr.f32.gmra.mrb[60].mxu0 %v9751_v34  ;;  %2479 = vmatprep.mubr.f32.mxu1 %v12084_v42  ;;  %v10007_v34 = vsub.f32 %v3365_v16, %v9991_v5  ;;  %v3325_v16 = vld [vmem:[#allocation8 + $0x110] sm:$0xff]  ;;  %v10028_v20 = vand.u32 4294901760, %v3371_v26 }
 0x2dd   :  { %1957 = vmatprep.mubr.f32.mxu0 %v12084_v42  ;;  %v3374_v57 = vsel %vm76_vm0, %v3325_v16, 0  ;;  %v3377_v16 = vsel %vm76_vm0, %v3326_v51, 0 }
 0x2de   :  { %v11824_v54 = vand.u32 4294901760, %v10007_v34  ;;  %12174 = vst [vmem:[#allocation13_spill] sm:$0xff] %v10028_v20 }
 0x2df   :  { %2483 = vmatmul.mubr.f32.gmra.mrb[34].mxu1 %v12173_v14  ;;  %v12175_v14 = vand.u32 4294901760, %v9575_v24  ;;  %v3538_v24 = vand.u32 4294901760, %v3537_v19 }
 0x2e0   :  { %1959 = vmatmul.mubr.f32.gmra.mrb[62].mxu0 %v9764_v60  ;;  %2488 = vmatprep.mubr.f32.mxu1 %v12084_v42  ;;  %v3527_v60 = vand.u32 4294901760, %v3526_v56  ;;  %v11826_v56 = vand.u32 4294901760, %v10023_v13 }
 0x2e1   :  { %3511 = vmatprep.mubr.f32.mxu0 %v12084_v42 }
 0x2e3   :  { %2492 = vmatmul.mubr.f32.gmra.mrb[36].mxu1 %v12175_v14  ;;  %v10042_v14 = vsub.f32 %v3371_v26, %v10028_v20  ;;  %v10062_v26 = vand.u32 4294901760, %v3377_v16 }
 0x2e4   :  { %3517 = vmatmul.mubr.f32.vlgmr.msra.gmra.mrb[80].mxu0 %v3516_v58  ;;  %2497 = vmatprep.mubr.f32.mxu1 %v12084_v42  ;;  %v3548_v58 = vsub.f32 %v10007_v34, %v11824_v54  ;;  %v12179_v54 = vpack.c.bf16 %v9470_v33, %v12178_v29  ;;  %v3380_v33 = vsel %vm76_vm0, %v3327_v9, 0  ;;  %v3328_v29 = vld [vmem:[#allocation8 + $0x128] sm:$0xff] }
 0x2e5   :  { %7643 = vmatpush1.bf16.msra.mxu0 %v9540_v39  ;;  %3522 = vmatprep.mubr.f32.mxu0 %v12084_v42  ;;  %v10044_v39 = vand.u32 4294901760, %v3374_v57  ;;  %12181 = vst [vmem:[#allocation16_spill] sm:$0xff] %v10062_v26  ;;  %v10076_v9 = vsub.f32 %v3377_v16, %v10062_v26 }
 0x2e6   :  { %7645 = vmatprep.subr.bf16.mxu0 %v9584_v3  ;;  %v12177_v3 = vand.u32 4294901760, %v9631_v21  ;;  %v3549_v19 = vand.u32 4294901760, %v3548_v58  ;;  %v11825_v21 = vand.u32 4294901760, %v10042_v14  ;;  %v10069_v58 = vand.u32 4294901760, %v3380_v33 }
 0x2e7   :  { %12176 = vst [vmem:[#allocation14_spill] sm:$0xff] %v10044_v39  ;;  %12184 = vst [vmem:[#allocation18_spill] sm:$0xff] %v10076_v9 }
 0x2e8   :  { %3528 = vmatmul.mubr.f32.gmra.mrb[82].mxu0 %v3527_v60  ;;  %2501 = vmatmul.mubr.f32.gmra.mrb[38].mxu1 %v12177_v3  ;;  %v3559_v60 = vsub.f32 %v10023_v13, %v11826_v56  ;;  %12183 = vst [vmem:[#allocation17_spill] sm:$0xff] %v10069_v58  ;;  %v12185_v3 = vand.u32 4294901760, %v9693_v32  ;;  %v12188_v32 = vand.u32 4294901760, %v9708_v17  ;;  %v3331_v56 = vld [vmem:[#allocation8 + $0x140] sm:$0xff] }
 0x2e9   :  { %7647 = vmatpush1.bf16.msra.mxu0 %v9594_v38  ;;  %2506 = vmatprep.mubr.f32.mxu1 %v12084_v42  ;;  %v10060_v38 = vsub.f32 %v3374_v57, %v10044_v39  ;;  %v3570_v57 = vsub.f32 %v10042_v14, %v11825_v21 }
 0x2ea   :  { %7649 = vmatprep.subr.bf16.mxu0 %v12179_v54  ;;  %3533 = vmatprep.mubr.f32.mxu0 %v12084_v42  ;;  %v12182_v54 = vand.u32 4294901760, %v9673_v44  ;;  %v3560_v51 = vand.u32 4294901760, %v3559_v60  ;;  %v3383_v44 = vsel %vm76_vm0, %v3328_v29, 0  ;;  %v3329_v60 = vld [vmem:[#allocation8 + $0x130] sm:$0xff]  ;;  %v11828_v29 = vand.u32 4294901760, %v10076_v9 }
 0x2eb   :  { %12180 = vst [vmem:[#allocation15_spill] sm:$0xff] %v10060_v38  ;;  %v3571_v21 = vand.u32 4294901760, %v3570_v57 }
 0x2ec   :  { %3539 = vmatmul.mubr.f32.gmra.mrb[84].mxu0 %v3538_v24  ;;  %2510 = vmatmul.mubr.f32.gmra.mrb[40].mxu1 %v12182_v54  ;;  %v11827_v24 = vand.u32 4294901760, %v10060_v38  ;;  %v10086_v54 = vand.u32 4294901760, %v3383_v44 }
 0x2ed   :  { %3544 = vmatprep.mubr.f32.mxu0 %v12084_v42  ;;  %2515 = vmatprep.mubr.f32.mxu1 %v12084_v42 }
 0x2ee   :  { %12187 = vst [vmem:[#allocation20_spill] sm:$0xff] %v10086_v54  ;;  %v3581_v16 = vsub.f32 %v10060_v38, %v11827_v24  ;;  %v3592_v24 = vsub.f32 %v10076_v9, %v11828_v29  ;;  %v3332_v38 = vld [vmem:[#allocation8 + $0x148] sm:$0xff] }
 0x2f0   :  { %3550 = vmatmul.mubr.f32.gmra.mrb[86].mxu0 %v3549_v19  ;;  %2519 = vmatmul.mubr.f32.gmra.mrb[42].mxu1 %v12185_v3  ;;  %v10084_v19 = vsub.f32 %v3380_v33, %v10069_v58  ;;  %v3386_v3 = vsel %vm76_vm0, %v3329_v60, 0  ;;  %v3330_v33 = vld [vmem:[#allocation8 + $0x138] sm:$0xff]  ;;  %v3582_v57 = vand.u32 4294901760, %v3581_v16  ;;  %v3593_v29 = vand.u32 4294901760, %v3592_v24 }
 0x2f1   :  { %3555 = vmatprep.mubr.f32.mxu0 %v12084_v42  ;;  %2524 = vmatprep.mubr.f32.mxu1 %v12084_v42  ;;  %v10104_v17 = vand.u32 4294901760, %v3386_v3  ;;  %v3389_v60 = vsel %vm76_vm0, %v3330_v33, 0  ;;  %v3392_v33 = vsel %vm76_vm0, %v3331_v56, 0  ;;  %v12198_v56 = vand.u32 4294901760, %v9749_v15 }
 0x2f2   :  { %12186 = vst [vmem:[#allocation19_spill] sm:$0xff] %v10084_v19 }
 0x2f3   :  { %12190 = vst [vmem:[#allocation36_spill] sm:$0xff] %v10104_v17  ;;  %v10116_v9 = vsub.f32 %v3386_v3, %v10104_v17 }
 0x2f4   :  { %3561 = vmatmul.mubr.f32.gmra.mrb[88].mxu0 %v3560_v51  ;;  %2528 = vmatmul.mubr.f32.gmra.mrb[44].mxu1 %v12188_v32  ;;  %v10099_v51 = vsub.f32 %v3383_v44, %v10086_v54  ;;  %v12191_v32 = vand.u32 4294901760, %v9717_v18  ;;  %v12192_v44 = vand.u32 4294901760, %v10084_v19  ;;  %v10118_v18 = vand.u32 4294901760, %v3389_v60 }
 0x2f5   :  { %3566 = vmatprep.mubr.f32.mxu0 %v12084_v42  ;;  %2533 = vmatprep.mubr.f32.mxu1 %v12084_v42  ;;  %12193 = vst [vmem:[#allocation34_spill] sm:$0xff] %v10116_v9  ;;  %v11838_v3 = vand.u32 4294901760, %v10116_v9 }
 0x2f6   :  { %12189 = vst [vmem:[#allocation30_spill] sm:$0xff] %v10099_v51  ;;  %v11835_v16 = vand.u32 4294901760, %v10099_v51  ;;  %12194 = vst [vmem:[#allocation39_spill] sm:$0xff] %v10118_v18 }
 0x2f8   :  { %3572 = vmatmul.mubr.f32.gmra.mrb[90].mxu0 %v3571_v21  ;;  %2537 = vmatmul.mubr.f32.gmra.mrb[46].mxu1 %v12191_v32  ;;  %v3603_v21 = vsub.f32 %v10084_v19, %v12192_v44  ;;  %v12195_v32 = vand.u32 4294901760, %v9736_v7  ;;  %v3614_v24 = vsub.f32 %v10099_v51, %v11835_v16  ;;  %v10132_v7 = vand.u32 4294901760, %v3392_v33 }
 0x2f9   :  { %3577 = vmatprep.mubr.f32.mxu0 %v12084_v42  ;;  %2542 = vmatprep.mubr.f32.mxu1 %v12084_v42 }
 0x2fa   :  { %v3604_v44 = vand.u32 4294901760, %v3603_v21  ;;  %12197 = vst [vmem:[#allocation38_spill] sm:$0xff] %v10132_v7  ;;  %v3333_v21 = vld [vmem:[#allocation8 + $0x150] sm:$0xff]  ;;  %v3615_v19 = vand.u32 4294901760, %v3614_v24  ;;  %v3334_v24 = vld [vmem:[#allocation8 + $0x158] sm:$0xff] }
 0x2fb   :  { %v3398_v15 = vsel %vm76_vm0, %v3333_v21, 0 }
 0x2fc   :  { %3583 = vmatmul.mubr.f32.gmra.mrb[92].mxu0 %v3582_v57  ;;  %2546 = vmatmul.mubr.f32.gmra.mrb[48].mxu1 %v12195_v32  ;;  %v10130_v57 = vsub.f32 %v3389_v60, %v10118_v18  ;;  %v3395_v32 = vsel %vm76_vm0, %v3332_v38, 0  ;;  %v10146_v38 = vsub.f32 %v3392_v33, %v10132_v7  ;;  %v10156_v51 = vand.u32 4294901760, %v3398_v15 }
 0x2fd   :  { %3588 = vmatprep.mubr.f32.mxu0 %v12084_v42  ;;  %2551 = vmatprep.mubr.f32.mxu1 %v12084_v42  ;;  %v10139_v16 = vand.u32 4294901760, %v3395_v32 }
 0x2fe   :  { %12196 = vst [vmem:[#allocation37_spill] sm:$0xff] %v10130_v57  ;;  %v11841_v60 = vand.u32 4294901760, %v10130_v57  ;;  %12200 = vst [vmem:[#allocation80_spill] sm:$0xff] %v10146_v38  ;;  %v11842_v21 = vand.u32 4294901760, %v10146_v38 }
 0x2ff   :  { %12199 = vst [vmem:[#allocation79_spill] sm:$0xff] %v10139_v16  ;;  %12203 = vst [vmem:[#allocation82_spill] sm:$0xff] %v10156_v51 }
 0x300   :  { %3594 = vmatmul.mubr.f32.gmra.mrb[94].mxu0 %v3593_v29  ;;  %2555 = vmatmul.mubr.f32.gmra.mrb[50].mxu1 %v12198_v56  ;;  %v3625_v29 = vsub.f32 %v10116_v9, %v11838_v3  ;;  %v12201_v56 = vand.u32 4294901760, %v9762_v10  ;;  %v3636_v33 = vsub.f32 %v10130_v57, %v11841_v60  ;;  %v12204_v10 = vand.u32 4294901760, %v9774_v61  ;;  %v3336_v9 = vld [vmem:[#allocation8 + $0x168] sm:$0xff]  ;;  %v3337_v57 = vld [vmem:[#allocation8 + $0x170] sm:$0xff] }
 0x301   :  { %3599 = vmatprep.mubr.f32.mxu0 %v12084_v42  ;;  %2560 = vmatprep.mubr.f32.mxu1 %v12084_v42  ;;  %v3647_v60 = vsub.f32 %v10146_v38, %v11842_v21 }
 0x302   :  { %v3626_v3 = vand.u32 4294901760, %v3625_v29  ;;  %v3637_v29 = vand.u32 4294901760, %v3636_v33 }
 0x303   :  { %v3648_v21 = vand.u32 4294901760, %v3647_v60 }
 0x304   :  { %3605 = vmatmul.mubr.f32.gmra.mrb[96].mxu0 %v3604_v44  ;;  %2564 = vmatmul.mubr.f32.gmra.mrb[52].mxu1 %v12201_v56  ;;  %v10154_v44 = vsub.f32 %v3395_v32, %v10139_v16  ;;  %v3401_v56 = vsel %vm76_vm0, %v3334_v24, 0  ;;  %v3335_v32 = vld [vmem:[#allocation8 + $0x160] sm:$0xff] }
 0x305   :  { %3610 = vmatprep.mubr.f32.mxu0 %v12084_v42  ;;  %2569 = vmatprep.mubr.f32.mxu1 %v12084_v42  ;;  %v10174_v61 = vand.u32 4294901760, %v3401_v56  ;;  %v3404_v24 = vsel %vm76_vm0, %v3335_v32, 0  ;;  %v3407_v32 = vsel %vm76_vm0, %v3336_v9, 0  ;;  %v12214_v9 = vand.u32 4294901760, %v9807_v36 }
 0x306   :  { %12202 = vst [vmem:[#allocation81_spill] sm:$0xff] %v10154_v44 }
 0x307   :  { %12206 = vst [vmem:[#allocation84_spill] sm:$0xff] %v10174_v61  ;;  %v10186_v38 = vsub.f32 %v3401_v56, %v10174_v61 }
 0x308   :  { %3616 = vmatmul.mubr.f32.gmra.mrb[98].mxu0 %v3615_v19  ;;  %2573 = vmatmul.mubr.f32.gmra.mrb[54].mxu1 %v12204_v10  ;;  %v10169_v19 = vsub.f32 %v3398_v15, %v10156_v51  ;;  %v12207_v10 = vand.u32 4294901760, %v9785_v52  ;;  %v12208_v15 = vand.u32 4294901760, %v10154_v44  ;;  %v10188_v52 = vand.u32 4294901760, %v3404_v24 }
 0x309   :  { %3621 = vmatprep.mubr.f32.mxu0 %v12084_v42  ;;  %2578 = vmatprep.mubr.f32.mxu1 %v12084_v42  ;;  %12209 = vst [vmem:[#allocation85_spill] sm:$0xff] %v10186_v38  ;;  %v11852_v56 = vand.u32 4294901760, %v10186_v38 }
 0x30a   :  { %12205 = vst [vmem:[#allocation83_spill] sm:$0xff] %v10169_v19  ;;  %v11849_v33 = vand.u32 4294901760, %v10169_v19  ;;  %12210 = vst [vmem:[#allocation86_spill] sm:$0xff] %v10188_v52 }
 0x30c   :  { %3627 = vmatmul.mubr.f32.gmra.mrb[100].mxu0 %v3626_v3  ;;  %2582 = vmatmul.mubr.f32.gmra.mrb[0].mxu1 %v12207_v10  ;;  %v3658_v3 = vsub.f32 %v10154_v44, %v12208_v15  ;;  %v12211_v10 = vand.u32 4294901760, %v9796_v40  ;;  %v3669_v60 = vsub.f32 %v10169_v19, %v11849_v33  ;;  %v10202_v40 = vand.u32 4294901760, %v3407_v32 }
 0x30d   :  { %3632 = vmatprep.mubr.f32.mxu0 %v12084_v42  ;;  %2587 = vmatprep.mubr.f32.mxu1 %v12084_v42 }
 0x30e   :  { %v3659_v15 = vand.u32 4294901760, %v3658_v3  ;;  %12213 = vst [vmem:[#allocation88_spill] sm:$0xff] %v10202_v40  ;;  %v3338_v3 = vld [vmem:[#allocation8 + $0x178] sm:$0xff]  ;;  %v3670_v44 = vand.u32 4294901760, %v3669_v60  ;;  %v3339_v60 = vld [vmem:[#allocation8 + $0x180] sm:$0xff] }
 0x30f   :  { %v3413_v36 = vsel %vm76_vm0, %v3338_v3, 0 }
 0x310   :  { %3638 = vmatmul.mubr.f32.gmra.mrb[102].mxu0 %v3637_v29  ;;  %2591 = vmatmul.mubr.f32.gmra.mrb[2].mxu1 %v12211_v10  ;;  %v10200_v29 = vsub.f32 %v3404_v24, %v10188_v52  ;;  %v3410_v10 = vsel %vm76_vm0, %v3337_v57, 0  ;;  %v10216_v57 = vsub.f32 %v3407_v32, %v10202_v40  ;;  %v10226_v19 = vand.u32 4294901760, %v3413_v36 }
 0x311   :  { %3643 = vmatprep.mubr.f32.mxu0 %v12084_v42  ;;  %2596 = vmatprep.mubr.f32.mxu1 %v12084_v42  ;;  %v10209_v33 = vand.u32 4294901760, %v3410_v10 }
 0x312   :  { %12212 = vst [vmem:[#allocation87_spill] sm:$0xff] %v10200_v29  ;;  %v11855_v24 = vand.u32 4294901760, %v10200_v29  ;;  %12216 = vst [vmem:[#allocation90_spill] sm:$0xff] %v10216_v57  ;;  %v11856_v3 = vand.u32 4294901760, %v10216_v57 }
 0x313   :  { %12215 = vst [vmem:[#allocation89_spill] sm:$0xff] %v10209_v33  ;;  %12219 = vst [vmem:[#allocation92_spill] sm:$0xff] %v10226_v19 }
 0x314   :  { %3649 = vmatmul.mubr.f32.gmra.mrb[104].mxu0 %v3648_v21  ;;  %2600 = vmatmul.mubr.f32.gmra.mrb[4].mxu1 %v12214_v9  ;;  %v3680_v21 = vsub.f32 %v10186_v38, %v11852_v56  ;;  %v12217_v9 = vand.u32 4294901760, %v9818_v2  ;;  %v3691_v32 = vsub.f32 %v10200_v29, %v11855_v24  ;;  %v12220_v2 = vand.u32 4294901760, %v9829_v63  ;;  %v3341_v38 = vld [vmem:[#allocation8 + $0x190] sm:$0xff]  ;;  %v3342_v29 = vld [vmem:[#allocation8 + $0x198] sm:$0xff] }
 0x315   :  { %3654 = vmatprep.mubr.f32.mxu0 %v12084_v42  ;;  %2605 = vmatprep.mubr.f32.mxu1 %v12084_v42  ;;  %v3702_v24 = vsub.f32 %v10216_v57, %v11856_v3 }
 0x316   :  { %v3681_v56 = vand.u32 4294901760, %v3680_v21  ;;  %v3692_v21 = vand.u32 4294901760, %v3691_v32 }
 0x317   :  { %v3703_v3 = vand.u32 4294901760, %v3702_v24 }
 0x318   :  { %3660 = vmatmul.mubr.f32.gmra.mrb[106].mxu0 %v3659_v15  ;;  %2609 = vmatmul.mubr.f32.gmra.mrb[6].mxu1 %v12217_v9  ;;  %v10224_v15 = vsub.f32 %v3410_v10, %v10209_v33  ;;  %v3416_v9 = vsel %vm76_vm0, %v3339_v60, 0  ;;  %v3340_v10 = vld [vmem:[#allocation8 + $0x188] sm:$0xff] }
 0x319   :  { %3665 = vmatprep.mubr.f32.mxu0 %v12084_v42  ;;  %2614 = vmatprep.mubr.f32.mxu1 %v12084_v42  ;;  %v10244_v63 = vand.u32 4294901760, %v3416_v9  ;;  %v3419_v60 = vsel %vm76_vm0, %v3340_v10, 0  ;;  %v3422_v10 = vsel %vm76_vm0, %v3341_v38, 0  ;;  %v12229_v38 = vand.u32 4294901760, %v9862_v46 }
 0x31a   :  { %12218 = vst [vmem:[#allocation91_spill] sm:$0xff] %v10224_v15 }
 0x31b   :  { %12221 = vst [vmem:[#allocation93_spill] sm:$0xff] %v10244_v63  ;;  %v10256_v57 = vsub.f32 %v3416_v9, %v10244_v63 }
 0x31c   :  { %3671 = vmatmul.mubr.f32.gmra.mrb[108].mxu0 %v3670_v44  ;;  %2618 = vmatmul.mubr.f32.gmra.mrb[8].mxu1 %v12220_v2  ;;  %v10239_v44 = vsub.f32 %v3413_v36, %v10226_v19  ;;  %v12222_v2 = vand.u32 4294901760, %v9840_v50  ;;  %v12223_v36 = vand.u32 4294901760, %v10224_v15  ;;  %v10258_v50 = vand.u32 4294901760, %v3419_v60 }
 0x31d   :  { %3676 = vmatprep.mubr.f32.mxu0 %v12084_v42  ;;  %2623 = vmatprep.mubr.f32.mxu1 %v12084_v42  ;;  %12224 = vst [vmem:[#allocation94_spill] sm:$0xff] %v10256_v57  ;;  %v11864_v9 = vand.u32 4294901760, %v10256_v57 }
 0x31e   :  { %v11863_v32 = vand.u32 4294901760, %v10239_v44  ;;  %12225 = vst [vmem:[#allocation95_spill] sm:$0xff] %v10258_v50 }
 0x320   :  { %3682 = vmatmul.mubr.f32.gmra.mrb[110].mxu0 %v3681_v56  ;;  %2627 = vmatmul.mubr.f32.gmra.mrb[10].mxu1 %v12222_v2  ;;  %v3713_v56 = vsub.f32 %v10224_v15, %v12223_v36  ;;  %v12226_v2 = vand.u32 4294901760, %v9851_v55  ;;  %v3724_v24 = vsub.f32 %v10239_v44, %v11863_v32  ;;  %v10272_v55 = vand.u32 4294901760, %v3422_v10 }
 0x321   :  { %3687 = vmatprep.mubr.f32.mxu0 %v12084_v42  ;;  %2632 = vmatprep.mubr.f32.mxu1 %v12084_v42 }
 0x322   :  { %v3714_v36 = vand.u32 4294901760, %v3713_v56  ;;  %12228 = vst [vmem:[#allocation97_spill] sm:$0xff] %v10272_v55  ;;  %v3343_v56 = vld [vmem:[#allocation8 + $0x1a0] sm:$0xff] }
 0x323   :  { %v3428_v46 = vsel %vm76_vm0, %v3343_v56, 0 }
 0x324   :  { %3693 = vmatmul.mubr.f32.gmra.mrb[112].mxu0 %v3692_v21  ;;  %2636 = vmatmul.mubr.f32.gmra.mrb[12].mxu1 %v12226_v2  ;;  %v10270_v21 = vsub.f32 %v3419_v60, %v10258_v50  ;;  %v3425_v2 = vsel %vm76_vm0, %v3342_v29, 0  ;;  %v3735_v60 = vsub.f32 %v10256_v57, %v11864_v9  ;;  %v10286_v29 = vsub.f32 %v3422_v10, %v10272_v55 }
 0x325   :  { %3698 = vmatprep.mubr.f32.mxu0 %v12084_v42  ;;  %2641 = vmatprep.mubr.f32.mxu1 %v12084_v42  ;;  %v10279_v15 = vand.u32 4294901760, %v3425_v2  ;;  %v10301_v57 = vand.u32 4294901760, %v3428_v46 }
 0x326   :  { %12227 = vst [vmem:[#allocation96_spill] sm:$0xff] %v10270_v21  ;;  %v11867_v32 = vand.u32 4294901760, %v10270_v21  ;;  %12231 = vst [vmem:[#allocation99_spill] sm:$0xff] %v10286_v29  ;;  %v11870_v9 = vand.u32 4294901760, %v10286_v29 }
 0x327   :  { %12230 = vst [vmem:[#allocation98_spill] sm:$0xff] %v10279_v15  ;;  %12232 = vst [vmem:[#allocation100_spill] sm:$0xff] %v10301_v57 }
 0x328   :  { %3704 = vmatmul.mubr.f32.gmra.mrb[114].mxu0 %v3703_v3  ;;  %2645 = vmatmul.mubr.f32.gmra.mrb[14].mxu1 %v12229_v38  ;;  %v3725_v3 = vand.u32 4294901760, %v3724_v24  ;;  %v10295_v24 = vsub.f32 %v3425_v2, %v10279_v15  ;;  %v3736_v38 = vand.u32 4294901760, %v3735_v60  ;;  %v3746_v10 = vsub.f32 %v10270_v21, %v11867_v32  ;;  %v12233_v2 = vld [vmem:[#allocation58_spill] sm:$0xff] }
 0x329   :  { %3709 = vmatprep.mubr.f32.mxu0 %v12084_v42  ;;  %2739 = vmatprep.mubr.f32.mxu1 %v12084_v42  ;;  %v3757_v60 = vsub.f32 %v10286_v29, %v11870_v9  ;;  %v10314_v32 = vsub.f32 %v3428_v46, %v10301_v57 }
 0x32a   :  { %v11873_v56 = vand.u32 4294901760, %v10295_v24 }
 0x32b   :  { %12234 = vst [vmem:[#allocation101_spill] sm:$0xff] %v10314_v32  ;;  %v11874_v46 = vand.u32 4294901760, %v10314_v32 }
 0x32c   :  { %3715 = vmatmul.mubr.f32.gmra.mrb[116].mxu0 %v3714_v36  ;;  %2741 = vmatmul.mubr.f32.vlgmr.msra.gmra.mrb[16].mxu1 %v12143_v22  ;;  %v3344_v36 = vld [vmem:[#allocation8 + $0x1a8] sm:$0xff] }
 0x32d   :  { %3720 = vmatprep.mubr.f32.mxu0 %v12084_v42  ;;  %7627 = vmatpush1.bf16.msra.mxu1 %v9368_v30  ;;  %v3431_v30 = vsel %vm76_vm0, %v3344_v36, 0  ;;  %v3346_v36 = vld [vmem:[#allocation8 + $0x1b8] sm:$0xff] }
 0x32e   :  { %2746 = vmatprep.mubr.f32.mxu1 %v12084_v42  ;;  %7629 = vmatprep.subr.bf16.mxu1 %v9421_v45  ;;  %v3345_v45 = vld [vmem:[#allocation8 + $0x1b0] sm:$0xff]  ;;  %v10316_v21 = vand.u32 4294901760, %v3431_v30 }
 0x330   :  { %3726 = vmatmul.mubr.f32.gmra.mrb[118].mxu0 %v3725_v3  ;;  %2748 = vmatmul.mubr.f32.gmra.mrb[18].mxu1 %v12145_v59  ;;  %v3747_v3 = vand.u32 4294901760, %v3746_v10  ;;  %12235 = vst [vmem:[#allocation102_spill] sm:$0xff] %v10316_v21  ;;  %v3758_v10 = vand.u32 4294901760, %v3757_v60  ;;  %v10327_v9 = vsub.f32 %v3431_v30, %v10316_v21 }
 0x331   :  { %3731 = vmatprep.mubr.f32.mxu0 %v12084_v42  ;;  %7631 = vmatpush1.bf16.msra.mxu1 %v9415_v31  ;;  %v3434_v31 = vsel %vm76_vm0, %v3345_v45, 0  ;;  %v3437_v45 = vsel %vm76_vm0, %v3346_v36, 0 }
 0x332   :  { %2753 = vmatprep.mubr.f32.mxu1 %v12084_v42  ;;  %7681 = vmatprep.subr.bf16.mxu1 %v12233_v2  ;;  %v10329_v2 = vand.u32 4294901760, %v3434_v31  ;;  %v11875_v60 = vand.u32 4294901760, %v10327_v9 }
 0x334   :  { %3737 = vmatmul.mubr.f32.gmra.mrb[120].mxu0 %v3736_v38  ;;  %2755 = vmatmul.mubr.f32.gmra.mrb[20].mxu1 %v12146_v11  ;;  %v3768_v38 = vsub.f32 %v10295_v24, %v11873_v56  ;;  %12236 = vst [vmem:[#allocation103_spill] sm:$0xff] %v10329_v2  ;;  %v10340_v30 = vsub.f32 %v3434_v31, %v10329_v2  ;;  %v10342_v56 = vand.u32 4294901760, %v3437_v45 }
 0x335   :  { %3742 = vmatprep.mubr.f32.mxu0 %v12084_v42  ;;  %2760 = vmatprep.mubr.f32.mxu1 %v12084_v42 }
 0x336   :  { %v3769_v29 = vand.u32 4294901760, %v3768_v38  ;;  %12237 = vst [vmem:[#allocation104_spill] sm:$0xff] %v10342_v56  ;;  %v3790_v38 = vsub.f32 %v10327_v9, %v11875_v60 }
 0x338   :  { %3748 = vmatmul.mubr.f32.gmra.mrb[122].mxu0 %v3747_v3  ;;  %2762 = vmatmul.mubr.f32.gmra.mrb[22].mxu1 %v12147_v48  ;;  %v3779_v3 = vsub.f32 %v10314_v32, %v11874_v46  ;;  %v10352_v46 = vsub.f32 %v3437_v45, %v10342_v56  ;;  %v3791_v31 = vand.u32 4294901760, %v3790_v38  ;;  %v12239_v38 = vld [vmem:[#allocation41_spill] sm:$0xff] }
 0x339   :  { %3753 = vmatprep.mubr.f32.mxu0 %v12084_v42  ;;  %2767 = vmatprep.mubr.f32.mxu1 %v12084_v42 }
 0x33a   :  { %v3780_v36 = vand.u32 4294901760, %v3779_v3  ;;  %12238 = vst [vmem:[#allocation105_spill] sm:$0xff] %v10352_v46  ;;  %v11876_v3 = vand.u32 4294901760, %v10352_v46 }
 0x33c   :  { %3759 = vmatmul.mubr.f32.gmra.mrb[124].mxu0 %v3758_v10  ;;  %2769 = vmatmul.mubr.f32.gmra.mrb[24].mxu1 %v12148_v41  ;;  %v11877_v10 = vand.u32 4294901760, %v10340_v30  ;;  %v3812_v60 = vsub.f32 %v10352_v46, %v11876_v3  ;;  %v12248_v46 = vld [vmem:[#allocation43_spill] sm:$0xff] }
 0x33d   :  { %3764 = vmatprep.mubr.f32.mxu0 %v12084_v42  ;;  %2774 = vmatprep.mubr.f32.mxu1 %v12084_v42 }
 0x340   :  { %3770 = vmatmul.mubr.f32.gmra.mrb[126].mxu0 %v3769_v29  ;;  %2776 = vmatmul.mubr.f32.gmra.mrb[26].mxu1 %v12149_v0  ;;  %v3801_v29 = vsub.f32 %v10340_v30, %v11877_v10  ;;  %v12246_v10 = vld [vmem:[#allocation44_spill] sm:$0xff] }
 0x341   :  { %3775 = vmatprep.mubr.f32.mxu0 %v12084_v42  ;;  %2781 = vmatprep.mubr.f32.mxu1 %v12084_v42 }
 0x342   :  { %v3802_v45 = vand.u32 4294901760, %v3801_v29  ;;  %v12242_v29 = vld [vmem:[#allocation51_spill] sm:$0xff] }
 0x344   :  { %3781 = vmatmul.mubr.f32.gmra.mrb[128].mxu0 %v3780_v36  ;;  %2783 = vmatmul.mubr.f32.gmra.mrb[28].mxu1 %v12150_v25  ;;  %v3813_v36 = vand.u32 4294901760, %v3812_v60 }
 0x345   :  { %3786 = vmatprep.mubr.f32.mxu0 %v12084_v42  ;;  %2788 = vmatprep.mubr.f32.mxu1 %v12084_v42 }
 0x348   :  { %3792 = vmatmul.mubr.f32.gmra.mrb[130].mxu0 %v3791_v31  ;;  %2790 = vmatmul.mubr.f32.gmra.mrb[30].mxu1 %v12151_v23  ;;  %v12240_v31 = vld [vmem:[#allocation35_spill] sm:$0xff] }
 0x349   :  { %3797 = vmatprep.mubr.f32.mxu0 %v12084_v42  ;;  %2795 = vmatprep.mubr.f32.mxu1 %v12084_v42  ;;  %v12241_v60 = vpack.c.bf16 %v12239_v38, %v12240_v31  ;;  %v12252_v38 = vld [vmem:[#allocation23_spill] sm:$0xff]  ;;  %v12253_v31 = vld [vmem:[#allocation25_spill] sm:$0xff] }
 0x34c   :  { %3803 = vmatmul.mubr.f32.gmra.mrb[132].mxu0 %v3802_v45  ;;  %2797 = vmatmul.mubr.f32.gmra.mrb[32].mxu1 %v12152_v53  ;;  %v12243_v45 = vld [vmem:[#allocation45_spill] sm:$0xff] }
 0x34d   :  { %3808 = vmatprep.mubr.f32.mxu0 %v12084_v42  ;;  %2802 = vmatprep.mubr.f32.mxu1 %v12084_v42  ;;  %v12244_v3 = vpack.c.bf16 %v12242_v29, %v12243_v45  ;;  %v12255_v29 = vld [vmem:[#allocation29_spill] sm:$0xff]  ;;  %v12256_v45 = vld [vmem:[#allocation31_spill] sm:$0xff] }
 0x350   :  { %3814 = vmatmul.mubr.f32.gmra.mrb[134].mxu0 %v3813_v36  ;;  %2804 = vmatmul.mubr.f32.gmra.mrb[34].mxu1 %v12153_v47  ;;  %v12245_v36 = vld [vmem:[#allocation49_spill] sm:$0xff] }
 0x351   :  { %3924 = vmatprep.mubr.f32.mxu0 %v12084_v42  ;;  %2809 = vmatprep.mubr.f32.mxu1 %v12084_v42 }
 0x354   :  { %3926 = vmatmul.mubr.f32.vlgmr.msra.gmra.mrb[80].mxu0 %v9961_v8  ;;  %2811 = vmatmul.mubr.f32.gmra.mrb[36].mxu1 %v9547_v49  ;;  %v12247_v8 = vpack.c.bf16 %v12245_v36, %v12246_v10  ;;  %v12250_v10 = vld [vmem:[#allocation77_spill] sm:$0xff]  ;;  %v10446_v36 = vpop.f32.mrb[64].mxu0 }
 0x355   :  { %7651 = vmatpush1.bf16.msra.mxu0 %v12241_v60  ;;  %2816 = vmatprep.mubr.f32.mxu1 %v12084_v42  ;;  %v12254_v60 = vld [vmem:[#allocation27_spill] sm:$0xff]  ;;  %12257 = vst [vmem:[#allocation41_spill] sm:$0xff] %v10446_v36 }
 0x356   :  { %7653 = vmatprep.subr.bf16.mxu0 %v12244_v3  ;;  %3931 = vmatprep.mubr.f32.mxu0 %v12084_v42  ;;  %v12251_v3 = vld [vmem:[#allocation78_spill] sm:$0xff] }
 0x358   :  { %3933 = vmatmul.mubr.f32.gmra.mrb[82].mxu0 %v9972_v1  ;;  %2818 = vmatmul.mubr.f32.gmra.mrb[38].mxu1 %v9601_v43 }
 0x359   :  { %7655 = vmatpush1.bf16.msra.mxu0 %v12247_v8  ;;  %2823 = vmatprep.mubr.f32.mxu1 %v12084_v42  ;;  %v12249_v8 = vld [vmem:[#allocation76_spill] sm:$0xff] }
 0x35a   :  { %7657 = vmatprep.subr.bf16.mxu0 %v12248_v46  ;;  %3938 = vmatprep.mubr.f32.mxu0 %v12084_v42 }
 0x35c   :  { %3940 = vmatmul.mubr.f32.gmra.mrb[84].mxu0 %v9984_v6  ;;  %2825 = vmatmul.mubr.f32.gmra.mrb[40].mxu1 %v9645_v28 }
 0x35d   :  { %3945 = vmatprep.mubr.f32.mxu0 %v12084_v42  ;;  %2830 = vmatprep.mubr.f32.mxu1 %v12084_v42 }
 0x360   :  { %3947 = vmatmul.mubr.f32.gmra.mrb[86].mxu0 %v9991_v5  ;;  %2832 = vmatmul.mubr.f32.gmra.mrb[42].mxu1 %v9675_v27 }
 0x361   :  { %3952 = vmatprep.mubr.f32.mxu0 %v12084_v42  ;;  %2837 = vmatprep.mubr.f32.mxu1 %v12084_v42 }
 0x364   :  { %3954 = vmatmul.mubr.f32.gmra.mrb[88].mxu0 %v10009_v4  ;;  %2839 = vmatmul.mubr.f32.gmra.mrb[44].mxu1 %v9695_v37 }
 0x365   :  { %3959 = vmatprep.mubr.f32.mxu0 %v12084_v42  ;;  %2844 = vmatprep.mubr.f32.mxu1 %v12084_v42 }
 0x368   :  { %3961 = vmatmul.mubr.f32.gmra.mrb[90].mxu0 %v10028_v20  ;;  %2846 = vmatmul.mubr.f32.gmra.mrb[46].mxu1 %v9701_v12 }
 0x369   :  { %3966 = vmatprep.mubr.f32.mxu0 %v12084_v42  ;;  %2851 = vmatprep.mubr.f32.mxu1 %v12084_v42 }
 0x36c   :  { %3968 = vmatmul.mubr.f32.gmra.mrb[92].mxu0 %v10044_v39  ;;  %2853 = vmatmul.mubr.f32.gmra.mrb[48].mxu1 %v9723_v35 }
 0x36d   :  { %3973 = vmatprep.mubr.f32.mxu0 %v12084_v42  ;;  %2858 = vmatprep.mubr.f32.mxu1 %v12084_v42 }
 0x370   :  { %3975 = vmatmul.mubr.f32.gmra.mrb[94].mxu0 %v10062_v26  ;;  %2860 = vmatmul.mubr.f32.gmra.mrb[50].mxu1 %v12249_v8  ;;  %v12294_v26 = vld [vmem:[#allocation28_spill] sm:$0xff] }
 0x371   :  { %3980 = vmatprep.mubr.f32.mxu0 %v12084_v42  ;;  %2865 = vmatprep.mubr.f32.mxu1 %v12084_v42 }
 0x374   :  { %3982 = vmatmul.mubr.f32.gmra.mrb[96].mxu0 %v10069_v58  ;;  %2867 = vmatmul.mubr.f32.gmra.mrb[52].mxu1 %v12250_v10 }
 0x375   :  { %3987 = vmatprep.mubr.f32.mxu0 %v12084_v42  ;;  %2872 = vmatprep.mubr.f32.mxu1 %v12084_v42 }
 0x378   :  { %3989 = vmatmul.mubr.f32.gmra.mrb[98].mxu0 %v10086_v54  ;;  %2874 = vmatmul.mubr.f32.gmra.mrb[54].mxu1 %v12251_v3  ;;  %v12263_v54 = vld [vmem:[#allocation70_spill] sm:$0xff] }
 0x379   :  { %3994 = vmatprep.mubr.f32.mxu0 %v12084_v42  ;;  %2879 = vmatprep.mubr.f32.mxu1 %v12084_v42 }
 0x37c   :  { %3996 = vmatmul.mubr.f32.gmra.mrb[100].mxu0 %v10104_v17  ;;  %2881 = vmatmul.mubr.f32.gmra.mrb[0].mxu1 %v12252_v38 }
 0x37d   :  { %4001 = vmatprep.mubr.f32.mxu0 %v12084_v42  ;;  %2886 = vmatprep.mubr.f32.mxu1 %v12084_v42 }
 0x380   :  { %4003 = vmatmul.mubr.f32.gmra.mrb[102].mxu0 %v10118_v18  ;;  %2888 = vmatmul.mubr.f32.gmra.mrb[2].mxu1 %v12253_v31 }
 0x381   :  { %4008 = vmatprep.mubr.f32.mxu0 %v12084_v42  ;;  %2893 = vmatprep.mubr.f32.mxu1 %v12084_v42 }
 0x384   :  { %4010 = vmatmul.mubr.f32.gmra.mrb[104].mxu0 %v10132_v7  ;;  %2895 = vmatmul.mubr.f32.gmra.mrb[4].mxu1 %v12254_v60  ;;  %v10449_v7 = vpop.f32.mrb[65].mxu0 }
 0x385   :  { %4015 = vmatprep.mubr.f32.mxu0 %v12084_v42  ;;  %2900 = vmatprep.mubr.f32.mxu1 %v12084_v42  ;;  %12258 = vst [vmem:[#allocation35_spill] sm:$0xff] %v10449_v7  ;;  %v10454_v18 = vpop.f32.mrb[66].mxu0 }
 0x386   :  { %12260 = vst [vmem:[#allocation51_spill] sm:$0xff] %v10454_v18 }
 0x388   :  { %4017 = vmatmul.mubr.f32.gmra.mrb[106].mxu0 %v10139_v16  ;;  %2902 = vmatmul.mubr.f32.gmra.mrb[6].mxu1 %v12255_v29  ;;  %v12259_v16 = vld [vmem:[#allocation42_spill] sm:$0xff] }
 0x389   :  { %4022 = vmatprep.mubr.f32.mxu0 %v12084_v42  ;;  %2907 = vmatprep.mubr.f32.mxu1 %v12084_v42 }
 0x38c   :  { %4024 = vmatmul.mubr.f32.gmra.mrb[108].mxu0 %v10156_v51  ;;  %2909 = vmatmul.mubr.f32.gmra.mrb[8].mxu1 %v12256_v45  ;;  %v10456_v51 = vpop.f32.mrb[67].mxu0 }
 0x38d   :  { %4029 = vmatprep.mubr.f32.mxu0 %v12084_v42  ;;  %2914 = vmatprep.mubr.f32.mxu1 %v12084_v42  ;;  %12261 = vst [vmem:[#allocation45_spill] sm:$0xff] %v10456_v51  ;;  %v10459_v17 = vpop.f32.mrb[68].mxu0  ;;  %v12268_v51 = vld [vmem:[#allocation73_spill] sm:$0xff] }
 0x38e   :  { %12262 = vst [vmem:[#allocation49_spill] sm:$0xff] %v10459_v17 }
 0x390   :  { %4031 = vmatmul.mubr.f32.gmra.mrb[110].mxu0 %v10174_v61  ;;  %2916 = vmatmul.mubr.f32.gmra.mrb[10].mxu1 %v12259_v16  ;;  %v10463_v61 = vpop.f32.mrb[69].mxu0 }
 0x391   :  { %4036 = vmatprep.mubr.f32.mxu0 %v12084_v42  ;;  %2921 = vmatprep.mubr.f32.mxu1 %v12084_v42  ;;  %12264 = vst [vmem:[#allocation44_spill] sm:$0xff] %v10463_v61  ;;  %v10466_v58 = vpop.f32.mrb[70].mxu0 }
 0x392   :  { %12265 = vst [vmem:[#allocation43_spill] sm:$0xff] %v10466_v58  ;;  %v10468_v7 = vpop.f32.mrb[71].mxu0 }
 0x393   :  { %12266 = vst [vmem:[#allocation76_spill] sm:$0xff] %v10468_v7  ;;  %v10471_v18 = vpop.f32.mrb[72].mxu0  ;;  %v12276_v7 = vld [vmem:[#allocation66_spill] sm:$0xff] }
 0x394   :  { %4038 = vmatmul.mubr.f32.gmra.mrb[112].mxu0 %v10188_v52  ;;  %2923 = vmatmul.mubr.f32.gmra.mrb[12].mxu1 %v12263_v54  ;;  %12267 = vst [vmem:[#allocation77_spill] sm:$0xff] %v10471_v18  ;;  %v10475_v52 = vpop.f32.mrb[73].mxu0  ;;  %v12274_v18 = vld [vmem:[#allocation56_spill] sm:$0xff] }
 0x395   :  { %4043 = vmatprep.mubr.f32.mxu0 %v12084_v42  ;;  %2928 = vmatprep.mubr.f32.mxu1 %v12084_v42  ;;  %12269 = vst [vmem:[#allocation78_spill] sm:$0xff] %v10475_v52  ;;  %v10478_v17 = vpop.f32.mrb[74].mxu0 }
 0x396   :  { %12270 = vst [vmem:[#allocation23_spill] sm:$0xff] %v10478_v17  ;;  %v10480_v61 = vpop.f32.mrb[75].mxu0 }
 0x397   :  { %12271 = vst [vmem:[#allocation25_spill] sm:$0xff] %v10480_v61  ;;  %v10483_v58 = vpop.f32.mrb[76].mxu0 }
 0x398   :  { %4045 = vmatmul.mubr.f32.gmra.mrb[114].mxu0 %v10202_v40  ;;  %2930 = vmatmul.mubr.f32.gmra.mrb[14].mxu1 %v12268_v51  ;;  %12272 = vst [vmem:[#allocation27_spill] sm:$0xff] %v10483_v58  ;;  %v10487_v40 = vpop.f32.mrb[77].mxu0  ;;  %v12288_v58 = vld [vmem:[#allocation50_spill] sm:$0xff] }
 0x399   :  { %4050 = vmatprep.mubr.f32.mxu0 %v12084_v42  ;;  %3008 = vmatprep.mubr.f32.mxu1 %v12084_v42  ;;  %12273 = vst [vmem:[#allocation29_spill] sm:$0xff] %v10487_v40  ;;  %v10491_v52 = vpop.f32.mrb[78].mxu0  ;;  %v12278_v40 = vld [vmem:[#allocation64_spill] sm:$0xff] }
 0x39a   :  { %12275 = vst [vmem:[#allocation31_spill] sm:$0xff] %v10491_v52  ;;  %v10494_v17 = vpop.f32.mrb[79].mxu0  ;;  %v12279_v52 = vld [vmem:[#allocation68_spill] sm:$0xff] }
 0x39b   :  { %12277 = vst [vmem:[#allocation42_spill] sm:$0xff] %v10494_v17 }
 0x39c   :  { %4052 = vmatmul.mubr.f32.gmra.mrb[116].mxu0 %v10209_v33  ;;  %3010 = vmatmul.mubr.f32.vlgmr.msra.gmra.mrb[16].mxu1 %v12143_v22  ;;  %v10497_v33 = vpop.f32.mrb[24].mxu0 }
 0x39d   :  { %4057 = vmatprep.mubr.f32.mxu0 %v12084_v42  ;;  %7683 = vmatpush1.bf16.msra.mxu1 %v12274_v18  ;;  %v10501_v22 = vpop.f32.mrb[25].mxu0 }
 0x39e   :  { %3015 = vmatprep.mubr.f32.mxu1 %v12084_v42  ;;  %7685 = vmatprep.subr.bf16.mxu1 %v12276_v7  ;;  %v10505_v18 = vpop.f32.mrb[26].mxu0 }
 0x39f   :  { %v10508_v7 = vpop.f32.mrb[27].mxu0 }
 0x3a0   :  { %4059 = vmatmul.mubr.f32.gmra.mrb[118].mxu0 %v10226_v19  ;;  %3017 = vmatmul.mubr.f32.gmra.mrb[18].mxu1 %v12145_v59  ;;  %v10513_v59 = vpop.f32.mrb[28].mxu0 }
 0x3a1   :  { %4064 = vmatprep.mubr.f32.mxu0 %v12084_v42  ;;  %7687 = vmatpush1.bf16.msra.mxu1 %v12278_v40  ;;  %v10516_v19 = vpop.f32.mrb[29].mxu0  ;;  %v12286_v40 = vld [vmem:[#allocation40_spill] sm:$0xff] }
 0x3a2   :  { %3022 = vmatprep.mubr.f32.mxu1 %v12084_v42  ;;  %7689 = vmatprep.subr.bf16.mxu1 %v12279_v52  ;;  %v10521_v52 = vpop.f32.mrb[30].mxu0 }
 0x3a4   :  { %4066 = vmatmul.mubr.f32.gmra.mrb[120].mxu0 %v10244_v63  ;;  %3024 = vmatmul.mubr.f32.gmra.mrb[20].mxu1 %v12146_v11  ;;  %v10524_v63 = vpop.f32.mrb[31].mxu0 }
 0x3a5   :  { %4071 = vmatprep.mubr.f32.mxu0 %v12084_v42  ;;  %3029 = vmatprep.mubr.f32.mxu1 %v12084_v42  ;;  %v10529_v11 = vpop.f32.mrb[32].mxu0 }
 0x3a8   :  { %4073 = vmatmul.mubr.f32.gmra.mrb[122].mxu0 %v10258_v50  ;;  %3031 = vmatmul.mubr.f32.gmra.mrb[22].mxu1 %v12147_v48  ;;  %v10532_v50 = vpop.f32.mrb[33].mxu0 }
 0x3a9   :  { %4078 = vmatprep.mubr.f32.mxu0 %v12084_v42  ;;  %3036 = vmatprep.mubr.f32.mxu1 %v12084_v42  ;;  %v10537_v48 = vpop.f32.mrb[34].mxu0 }
 0x3ac   :  { %4080 = vmatmul.mubr.f32.gmra.mrb[124].mxu0 %v10272_v55  ;;  %3038 = vmatmul.mubr.f32.gmra.mrb[24].mxu1 %v12148_v41  ;;  %v10540_v55 = vpop.f32.mrb[35].mxu0 }
 0x3ad   :  { %4085 = vmatprep.mubr.f32.mxu0 %v12084_v42  ;;  %3043 = vmatprep.mubr.f32.mxu1 %v12084_v42  ;;  %v10546_v41 = vpop.f32.mrb[36].mxu0 }
 0x3b0   :  { %4087 = vmatmul.mubr.f32.gmra.mrb[126].mxu0 %v10279_v15  ;;  %3045 = vmatmul.mubr.f32.gmra.mrb[26].mxu1 %v12149_v0  ;;  %v10548_v15 = vpop.f32.mrb[37].mxu0 }
 0x3b1   :  { %4092 = vmatprep.mubr.f32.mxu0 %v12084_v42  ;;  %3050 = vmatprep.mubr.f32.mxu1 %v12084_v42  ;;  %v10554_v0 = vpop.f32.mrb[38].mxu0 }
 0x3b4   :  { %4094 = vmatmul.mubr.f32.gmra.mrb[128].mxu0 %v10301_v57  ;;  %3052 = vmatmul.mubr.f32.gmra.mrb[28].mxu1 %v12150_v25  ;;  %v10556_v57 = vpop.f32.mrb[39].mxu0 }
 0x3b5   :  { %4099 = vmatprep.mubr.f32.mxu0 %v12084_v42  ;;  %3057 = vmatprep.mubr.f32.mxu1 %v12084_v42  ;;  %12280 = vst [vmem:[#allocation70_spill] sm:$0xff] %v10556_v57  ;;  %v10561_v25 = vpop.f32.mrb[40].mxu0  ;;  %v12337_v57 = vld [vmem:[#allocation59_spill] sm:$0xff] }
 0x3b6   :  { %12281 = vst [vmem:[#allocation73_spill] sm:$0xff] %v10561_v25  ;;  %v5427_v25 = vld [vmem:[#allocation8 + $0x200] sm:$0xff] }
 0x3b8   :  { %4101 = vmatmul.mubr.f32.gmra.mrb[130].mxu0 %v10316_v21  ;;  %3059 = vmatmul.mubr.f32.gmra.mrb[30].mxu1 %v12151_v23  ;;  %v10564_v21 = vpop.f32.mrb[41].mxu0 }
 0x3b9   :  { %4106 = vmatprep.mubr.f32.mxu0 %v12084_v42  ;;  %3064 = vmatprep.mubr.f32.mxu1 %v12084_v42  ;;  %12282 = vst [vmem:[#allocation68_spill] sm:$0xff] %v10564_v21  ;;  %v10569_v23 = vpop.f32.mrb[42].mxu0 }
 0x3ba   :  { %12283 = vst [vmem:[#allocation106_spill] sm:$0xff] %v10569_v23  ;;  %v12331_v23 = vld [vmem:[#allocation69_spill] sm:$0xff] }
 0x3bc   :  { %4108 = vmatmul.mubr.f32.gmra.mrb[132].mxu0 %v10329_v2  ;;  %3066 = vmatmul.mubr.f32.gmra.mrb[32].mxu1 %v12152_v53  ;;  %v10572_v2 = vpop.f32.mrb[43].mxu0  ;;  %v12285_v53 = vld [vmem:[#allocation22_spill] sm:$0xff] }
 0x3bd   :  { %4113 = vmatprep.mubr.f32.mxu0 %v12084_v42  ;;  %3071 = vmatprep.mubr.f32.mxu1 %v12084_v42  ;;  %12284 = vst [vmem:[#allocation107_spill] sm:$0xff] %v10572_v2  ;;  %v10577_v17 = vpop.f32.mrb[44].mxu0  ;;  %v12332_v2 = vld [vmem:[#allocation75_spill] sm:$0xff] }
 0x3be   :  { %12287 = vst [vmem:[#allocation22_spill] sm:$0xff] %v10577_v17  ;;  %v5425_v17 = vld [vmem:[#allocation8 + $0x1f0] sm:$0xff] }
 0x3c0   :  { %4115 = vmatmul.mubr.f32.gmra.mrb[134].mxu0 %v10342_v56  ;;  %3073 = vmatmul.mubr.f32.gmra.mrb[34].mxu1 %v12153_v47  ;;  %v10581_v47 = vpop.f32.mrb[45].mxu0  ;;  %v12290_v56 = vld [vmem:[#allocation48_spill] sm:$0xff] }
 0x3c1   :  { %4201 = vmatprep.mubr.f32.mxu0 %v12084_v42  ;;  %3078 = vmatprep.mubr.f32.mxu1 %v12084_v42  ;;  %12289 = vst [vmem:[#allocation108_spill] sm:$0xff] %v10581_v47  ;;  %v10587_v61 = vpop.f32.mrb[46].mxu0 }
 0x3c2   :  { %12291 = vst [vmem:[#allocation109_spill] sm:$0xff] %v10587_v61  ;;  %v10591_v36 = vpop.f32.mrb[47].mxu0  ;;  %v12325_v61 = vld [vmem:[#allocation90_spill] sm:$0xff] }
 0x3c3   :  { %v10597_v39 = vpop.f32.mrb[48].mxu0 }
 0x3c4   :  { %4204 = vmatmul.mubr.f32.vlgmr.msra.gmra.mrb[80].mxu0 %v12285_v53  ;;  %3080 = vmatmul.mubr.f32.gmra.mrb[36].mxu1 %v9547_v49  ;;  %v12292_v49 = vld [vmem:[#allocation46_spill] sm:$0xff]  ;;  %12295 = vst [vmem:[#allocation28_spill] sm:$0xff] %v10597_v39 }
 0x3c5   :  { %7659 = vmatpush1.bf16.msra.mxu0 %v12286_v40  ;;  %3085 = vmatprep.mubr.f32.mxu1 %v12084_v42  ;;  %12293 = vst [vmem:[#allocation46_spill] sm:$0xff] %v10591_v36  ;;  %v5424_v36 = vld [vmem:[#allocation8 + $0x1e8] sm:$0xff] }
 0x3c6   :  { %7661 = vmatprep.subr.bf16.mxu0 %v12288_v58  ;;  %4209 = vmatprep.mubr.f32.mxu0 %v12084_v42  ;;  %v5422_v58 = vld [vmem:[#allocation8 + $0x1d8] sm:$0xff] }
 0x3c7   :  { %v5465_v40 = vsel %vm76_vm0, %v5422_v58, 0 }
 0x3c8   :  { %4212 = vmatmul.mubr.f32.gmra.mrb[82].mxu0 %v9982_v62  ;;  %3087 = vmatmul.mubr.f32.gmra.mrb[38].mxu1 %v9601_v43  ;;  %v10600_v43 = vpop.f32.mrb[49].mxu0 }
 0x3c9   :  { %7663 = vmatpush1.bf16.msra.mxu0 %v12290_v56  ;;  %3092 = vmatprep.mubr.f32.mxu1 %v12084_v42  ;;  %12296 = vst [vmem:[#allocation110_spill] sm:$0xff] %v10600_v43  ;;  %v10700_v43 = vand.u32 4294901760, %v5465_v40 }
 0x3ca   :  { %7665 = vmatprep.subr.bf16.mxu0 %v12292_v49  ;;  %4217 = vmatprep.mubr.f32.mxu0 %v12084_v42  ;;  %v10605_v49 = vpop.f32.mrb[50].mxu0 }
 0x3cb   :  { %12297 = vst [vmem:[#allocation111_spill] sm:$0xff] %v10605_v49  ;;  %v10608_v20 = vpop.f32.mrb[51].mxu0  ;;  %v5423_v49 = vld [vmem:[#allocation8 + $0x1e0] sm:$0xff] }
 0x3cc   :  { %4220 = vmatmul.mubr.f32.gmra.mrb[84].mxu0 %v12294_v26  ;;  %3094 = vmatmul.mubr.f32.gmra.mrb[40].mxu1 %v9645_v28  ;;  %12298 = vst [vmem:[#allocation112_spill] sm:$0xff] %v10608_v20  ;;  %v10613_v28 = vpop.f32.mrb[52].mxu0  ;;  %v12321_v20 = vld [vmem:[#allocation85_spill] sm:$0xff]  ;;  %v5468_v58 = vsel %vm76_vm0, %v5423_v49, 0 }
 0x3cd   :  { %4225 = vmatprep.mubr.f32.mxu0 %v12084_v42  ;;  %3099 = vmatprep.mubr.f32.mxu1 %v12084_v42  ;;  %12299 = vst [vmem:[#allocation113_spill] sm:$0xff] %v10613_v28  ;;  %v10616_v4 = vpop.f32.mrb[53].mxu0  ;;  %v12319_v28 = vld [vmem:[#allocation83_spill] sm:$0xff]  ;;  %v10717_v47 = vand.u32 4294901760, %v5468_v58 }
 0x3ce   :  { %12300 = vst [vmem:[#allocation114_spill] sm:$0xff] %v10616_v4 }
 0x3cf   :  { %12327 = vst [vmem:[#allocation83_spill] sm:$0xff] %v10717_v47 }
 0x3d0   :  { %4228 = vmatmul.mubr.f32.gmra.mrb[86].mxu0 %v10007_v34  ;;  %3101 = vmatmul.mubr.f32.gmra.mrb[42].mxu1 %v9675_v27  ;;  %v10621_v27 = vpop.f32.mrb[54].mxu0 }
 0x3d1   :  { %4233 = vmatprep.mubr.f32.mxu0 %v12084_v42  ;;  %3106 = vmatprep.mubr.f32.mxu1 %v12084_v42  ;;  %12301 = vst [vmem:[#allocation115_spill] sm:$0xff] %v10621_v27  ;;  %v10624_v5 = vpop.f32.mrb[55].mxu0 }
 0x3d2   :  { %12302 = vst [vmem:[#allocation116_spill] sm:$0xff] %v10624_v5  ;;  %v10629_v6 = vpop.f32.mrb[56].mxu0 }
 0x3d3   :  { %v10632_v4 = vpop.f32.mrb[57].mxu0 }
 0x3d4   :  { %4236 = vmatmul.mubr.f32.gmra.mrb[88].mxu0 %v10023_v13  ;;  %3108 = vmatmul.mubr.f32.gmra.mrb[44].mxu1 %v9695_v37  ;;  %v12303_v37 = vld [vmem:[#allocation15_spill] sm:$0xff]  ;;  %12305 = vst [vmem:[#allocation117_spill] sm:$0xff] %v10632_v4  ;;  %v10637_v27 = vpop.f32.mrb[58].mxu0 }
 0x3d5   :  { %4241 = vmatprep.mubr.f32.mxu0 %v12084_v42  ;;  %3113 = vmatprep.mubr.f32.mxu1 %v12084_v42  ;;  %12304 = vst [vmem:[#allocation15_spill] sm:$0xff] %v10629_v6  ;;  %v10640_v5 = vpop.f32.mrb[59].mxu0 }
 0x3d6   :  { %12308 = vst [vmem:[#allocation118_spill] sm:$0xff] %v10640_v5  ;;  %v10645_v6 = vpop.f32.mrb[60].mxu0 }
 0x3d7   :  { %v10648_v4 = vpop.f32.mrb[61].mxu0 }
 0x3d8   :  { %4244 = vmatmul.mubr.f32.gmra.mrb[90].mxu0 %v10042_v14  ;;  %3115 = vmatmul.mubr.f32.gmra.mrb[46].mxu1 %v9701_v12  ;;  %v12306_v12 = vld [vmem:[#allocation18_spill] sm:$0xff]  ;;  %12311 = vst [vmem:[#allocation119_spill] sm:$0xff] %v10648_v4  ;;  %v12316_v4 = vld [vmem:[#allocation37_spill] sm:$0xff] }
 0x3d9   :  { %4249 = vmatprep.mubr.f32.mxu0 %v12084_v42  ;;  %3120 = vmatprep.mubr.f32.mxu1 %v12084_v42  ;;  %12307 = vst [vmem:[#allocation18_spill] sm:$0xff] %v10637_v27  ;;  %v10653_v27 = vpop.f32.mrb[62].mxu0 }
 0x3da   :  { %v10656_v5 = vpop.f32.mrb[63].mxu0 }
 0x3db   :  { %12314 = vst [vmem:[#allocation120_spill] sm:$0xff] %v10656_v5  ;;  %v5420_v5 = vld [vmem:[#allocation8 + $0x1c8] sm:$0xff] }
 0x3dc   :  { %4252 = vmatmul.mubr.f32.gmra.mrb[92].mxu0 %v12303_v37  ;;  %3122 = vmatmul.mubr.f32.gmra.mrb[48].mxu1 %v9723_v35  ;;  %v12309_v35 = vld [vmem:[#allocation19_spill] sm:$0xff]  ;;  %v5459_v56 = vsel %vm76_vm0, %v5420_v5, 0 }
 0x3dd   :  { %4257 = vmatprep.mubr.f32.mxu0 %v12084_v42  ;;  %3127 = vmatprep.mubr.f32.mxu1 %v12084_v42  ;;  %12310 = vst [vmem:[#allocation19_spill] sm:$0xff] %v10645_v6  ;;  %v12318_v6 = vld [vmem:[#allocation81_spill] sm:$0xff]  ;;  %v10684_v1 = vand.u32 4294901760, %v5459_v56 }
 0x3e0   :  { %4260 = vmatmul.mubr.f32.gmra.mrb[94].mxu0 %v12306_v12  ;;  %3129 = vmatmul.mubr.f32.gmra.mrb[50].mxu1 %v12249_v8  ;;  %v12312_v8 = vld [vmem:[#allocation30_spill] sm:$0xff] }
 0x3e1   :  { %4265 = vmatprep.mubr.f32.mxu0 %v12084_v42  ;;  %3134 = vmatprep.mubr.f32.mxu1 %v12084_v42  ;;  %12313 = vst [vmem:[#allocation30_spill] sm:$0xff] %v10653_v27  ;;  %v12317_v27 = vld [vmem:[#allocation80_spill] sm:$0xff] }
 0x3e4   :  { %4268 = vmatmul.mubr.f32.gmra.mrb[96].mxu0 %v12309_v35  ;;  %3136 = vmatmul.mubr.f32.gmra.mrb[52].mxu1 %v12250_v10  ;;  %v12315_v10 = vld [vmem:[#allocation34_spill] sm:$0xff] }
 0x3e5   :  { %4273 = vmatprep.mubr.f32.mxu0 %v12084_v42  ;;  %3141 = vmatprep.mubr.f32.mxu1 %v12084_v42 }
 0x3e8   :  { %4276 = vmatmul.mubr.f32.gmra.mrb[98].mxu0 %v12312_v8  ;;  %3143 = vmatmul.mubr.f32.gmra.mrb[54].mxu1 %v12251_v3  ;;  %v5419_v3 = vld [vmem:[#allocation8 + $0x1c0] sm:$0xff] }
 0x3e9   :  { %4281 = vmatprep.mubr.f32.mxu0 %v12084_v42  ;;  %3148 = vmatprep.mubr.f32.mxu1 %v12084_v42 }
 0x3ec   :  { %4284 = vmatmul.mubr.f32.gmra.mrb[100].mxu0 %v12315_v10  ;;  %3150 = vmatmul.mubr.f32.gmra.mrb[0].mxu1 %v12252_v38  ;;  %v5456_v38 = vsel %vm76_vm0, %v5419_v3, 0 }
 0x3ed   :  { %4289 = vmatprep.mubr.f32.mxu0 %v12084_v42  ;;  %3155 = vmatprep.mubr.f32.mxu1 %v12084_v42 }
 0x3f0   :  { %4292 = vmatmul.mubr.f32.gmra.mrb[102].mxu0 %v12316_v4  ;;  %3157 = vmatmul.mubr.f32.gmra.mrb[2].mxu1 %v12253_v31  ;;  %v10674_v31 = vand.u32 4294901760, %v5456_v38 }
 0x3f1   :  { %4297 = vmatprep.mubr.f32.mxu0 %v12084_v42  ;;  %3162 = vmatprep.mubr.f32.mxu1 %v12084_v42 }
 0x3f2   :  { %v10682_v3 = vsub.f32 %v5456_v38, %v10674_v31 }
 0x3f4   :  { %4300 = vmatmul.mubr.f32.gmra.mrb[104].mxu0 %v12317_v27  ;;  %3164 = vmatmul.mubr.f32.gmra.mrb[4].mxu1 %v12254_v60  ;;  %v5421_v60 = vld [vmem:[#allocation8 + $0x1d0] sm:$0xff]  ;;  %12320 = vst [vmem:[#allocation34_spill] sm:$0xff] %v10682_v3  ;;  %v11936_v5 = vand.u32 4294901760, %v10682_v3 }
 0x3f5   :  { %4305 = vmatprep.mubr.f32.mxu0 %v12084_v42  ;;  %3169 = vmatprep.mubr.f32.mxu1 %v12084_v42 }
 0x3f8   :  { %4308 = vmatmul.mubr.f32.gmra.mrb[106].mxu0 %v12318_v6  ;;  %3171 = vmatmul.mubr.f32.gmra.mrb[6].mxu1 %v12255_v29  ;;  %v5462_v29 = vsel %vm76_vm0, %v5421_v60, 0  ;;  %v12323_v60 = vld [vmem:[#allocation87_spill] sm:$0xff] }
 0x3f9   :  { %4313 = vmatprep.mubr.f32.mxu0 %v12084_v42  ;;  %3176 = vmatprep.mubr.f32.mxu1 %v12084_v42  ;;  %v10695_v38 = vand.u32 4294901760, %v5462_v29 }
 0x3fb   :  { %v10709_v39 = vsub.f32 %v5462_v29, %v10695_v38 }
 0x3fc   :  { %4316 = vmatmul.mubr.f32.gmra.mrb[108].mxu0 %v12319_v28  ;;  %3178 = vmatmul.mubr.f32.gmra.mrb[8].mxu1 %v12256_v45  ;;  %v10693_v45 = vsub.f32 %v5459_v56, %v10684_v1 }
 0x3fd   :  { %4321 = vmatprep.mubr.f32.mxu0 %v12084_v42  ;;  %3183 = vmatprep.mubr.f32.mxu1 %v12084_v42  ;;  %12324 = vst [vmem:[#allocation80_spill] sm:$0xff] %v10709_v39  ;;  %v11942_v49 = vand.u32 4294901760, %v10709_v39 }
 0x3fe   :  { %12322 = vst [vmem:[#allocation37_spill] sm:$0xff] %v10693_v45  ;;  %v11939_v56 = vand.u32 4294901760, %v10693_v45 }
 0x400   :  { %4324 = vmatmul.mubr.f32.gmra.mrb[110].mxu0 %v12321_v20  ;;  %3185 = vmatmul.mubr.f32.gmra.mrb[10].mxu1 %v12259_v16  ;;  %v5615_v16 = vsub.f32 %v10682_v3, %v11936_v5  ;;  %v5626_v29 = vsub.f32 %v10693_v45, %v11939_v56  ;;  %v5471_v3 = vsel %vm76_vm0, %v5424_v36, 0  ;;  %v5637_v56 = vsub.f32 %v10709_v39, %v11942_v49 }
 0x401   :  { %4329 = vmatprep.mubr.f32.mxu0 %v12084_v42  ;;  %3190 = vmatprep.mubr.f32.mxu1 %v12084_v42  ;;  %v10736_v45 = vand.u32 4294901760, %v5471_v3  ;;  %v5474_v36 = vsel %vm76_vm0, %v5425_v17, 0  ;;  %v12336_v17 = vld [vmem:[#allocation74_spill] sm:$0xff] }
 0x402   :  { %v5616_v5 = vand.u32 4294901760, %v5615_v16  ;;  %v5627_v16 = vand.u32 4294901760, %v5626_v29  ;;  %v5638_v49 = vand.u32 4294901760, %v5637_v56  ;;  %v10751_v39 = vand.u32 4294901760, %v5474_v36 }
 0x403   :  { %12330 = vst [vmem:[#allocation87_spill] sm:$0xff] %v10736_v45 }
 0x404   :  { %4332 = vmatmul.mubr.f32.gmra.mrb[112].mxu0 %v12323_v60  ;;  %3192 = vmatmul.mubr.f32.gmra.mrb[12].mxu1 %v12263_v54  ;;  %v10715_v54 = vsub.f32 %v5465_v40, %v10700_v43  ;;  %v12328_v40 = vld [vmem:[#allocation91_spill] sm:$0xff] }
 0x405   :  { %4337 = vmatprep.mubr.f32.mxu0 %v12084_v42  ;;  %3197 = vmatprep.mubr.f32.mxu1 %v12084_v42  ;;  %12335 = vst [vmem:[#allocation91_spill] sm:$0xff] %v10751_v39 }
 0x406   :  { %12326 = vst [vmem:[#allocation81_spill] sm:$0xff] %v10715_v54 }
 0x408   :  { %4340 = vmatmul.mubr.f32.gmra.mrb[114].mxu0 %v12325_v61  ;;  %3199 = vmatmul.mubr.f32.gmra.mrb[14].mxu1 %v12268_v51  ;;  %v10730_v51 = vsub.f32 %v5468_v58, %v10717_v47  ;;  %v5426_v58 = vld [vmem:[#allocation8 + $0x1f8] sm:$0xff] }
 0x409   :  { %4345 = vmatprep.mubr.f32.mxu0 %v12084_v42  ;;  %5611 = vmatprep.mubr.f32.mxu1 %v12084_v42 }
 0x40a   :  { %12329 = vst [vmem:[#allocation85_spill] sm:$0xff] %v10730_v51  ;;  %v12341_v56 = vand.u32 4294901760, %v10730_v51 }
 0x40c   :  { %4348 = vmatmul.mubr.f32.gmra.mrb[116].mxu0 %v12328_v40  ;;  %5617 = vmatmul.mubr.f32.vlgmr.msra.gmra.mrb[56].mxu1 %v5616_v5  ;;  %v12333_v5 = vand.u32 4294901760, %v10715_v54 }
 0x40d   :  { %4353 = vmatprep.mubr.f32.mxu0 %v12084_v42  ;;  %7691 = vmatpush1.bf16.msra.mxu1 %v12331_v23  ;;  %v10749_v23 = vsub.f32 %v5471_v3, %v10736_v45  ;;  %v5659_v3 = vsub.f32 %v10730_v51, %v12341_v56  ;;  %v10766_v45 = vsub.f32 %v5474_v36, %v10751_v39  ;;  %v5429_v51 = vld [vmem:[#allocation8 + $0x210] sm:$0xff] }
 0x40e   :  { %5622 = vmatprep.mubr.f32.mxu1 %v12084_v42  ;;  %7693 = vmatprep.subr.bf16.mxu1 %v12332_v2  ;;  %v5648_v29 = vsub.f32 %v10715_v54, %v12333_v5  ;;  %v5477_v2 = vsel %vm76_vm0, %v5426_v58, 0  ;;  %v12338_v5 = vld [vmem:[#allocation53_spill] sm:$0xff] }
 0x40f   :  { %12334 = vst [vmem:[#allocation90_spill] sm:$0xff] %v10749_v23  ;;  %v12339_v54 = vpack.c.bf16 %v12337_v57, %v12338_v5  ;;  %12342 = vst [vmem:[#allocation69_spill] sm:$0xff] %v10766_v45  ;;  %v10768_v58 = vand.u32 4294901760, %v5477_v2  ;;  %v5480_v57 = vsel %vm76_vm0, %v5427_v25, 0  ;;  %v5660_v5 = vand.u32 4294901760, %v5659_v3  ;;  %v12347_v3 = vld [vmem:[#allocation99_spill] sm:$0xff] }
 0x410   :  { %4356 = vmatmul.mubr.f32.gmra.mrb[118].mxu0 %v10239_v44  ;;  %5628 = vmatmul.mubr.f32.gmra.mrb[58].mxu1 %v5627_v16  ;;  %v12340_v16 = vld [vmem:[#allocation94_spill] sm:$0xff]  ;;  %v5649_v21 = vand.u32 4294901760, %v5648_v29  ;;  %v12344_v29 = vld [vmem:[#allocation96_spill] sm:$0xff]  ;;  %v10773_v47 = vand.u32 4294901760, %v5480_v57  ;;  %v11960_v36 = vand.u32 4294901760, %v10766_v45 }
 0x411   :  { %4361 = vmatprep.mubr.f32.mxu0 %v12084_v42  ;;  %7695 = vmatpush1.bf16.msra.mxu1 %v12336_v17  ;;  %v11955_v17 = vand.u32 4294901760, %v10749_v23  ;;  %12343 = vst [vmem:[#allocation75_spill] sm:$0xff] %v10768_v58  ;;  %v10781_v56 = vsub.f32 %v5477_v2, %v10768_v58  ;;  %v5430_v58 = vld [vmem:[#allocation8 + $0x218] sm:$0xff] }
 0x412   :  { %5633 = vmatprep.mubr.f32.mxu1 %v12084_v42  ;;  %7697 = vmatprep.subr.bf16.mxu1 %v12339_v54  ;;  %v5428_v54 = vld [vmem:[#allocation8 + $0x208] sm:$0xff]  ;;  %12345 = vst [vmem:[#allocation74_spill] sm:$0xff] %v10773_v47  ;;  %v5681_v2 = vsub.f32 %v10766_v45, %v11960_v36 }
 0x413   :  { %12346 = vst [vmem:[#allocation59_spill] sm:$0xff] %v10781_v56  ;;  %v5483_v25 = vsel %vm76_vm0, %v5428_v54, 0  ;;  %v11965_v54 = vand.u32 4294901760, %v10781_v56 }
 0x414   :  { %4364 = vmatmul.mubr.f32.gmra.mrb[120].mxu0 %v12340_v16  ;;  %5639 = vmatmul.mubr.f32.gmra.mrb[60].mxu1 %v5638_v49  ;;  %v5670_v49 = vsub.f32 %v10749_v23, %v11955_v17  ;;  %v10789_v39 = vand.u32 4294901760, %v5483_v25  ;;  %v5486_v23 = vsel %vm76_vm0, %v5429_v51, 0  ;;  %v5489_v51 = vsel %vm76_vm0, %v5430_v58, 0 }
 0x415   :  { %4369 = vmatprep.mubr.f32.mxu0 %v12084_v42  ;;  %5644 = vmatprep.mubr.f32.mxu1 %v12084_v42  ;;  %v5692_v36 = vsub.f32 %v10781_v56, %v11965_v54  ;;  %v10807_v45 = vand.u32 4294901760, %v5486_v23  ;;  %v10820_v56 = vand.u32 4294901760, %v5489_v51 }
 0x416   :  { %12349 = vst [vmem:[#allocation94_spill] sm:$0xff] %v10789_v39  ;;  %v5671_v17 = vand.u32 4294901760, %v5670_v49  ;;  %v5682_v49 = vand.u32 4294901760, %v5681_v2 }
 0x417   :  { %12351 = vst [vmem:[#allocation99_spill] sm:$0xff] %v10807_v45  ;;  %v5693_v2 = vand.u32 4294901760, %v5692_v36  ;;  %v10818_v54 = vsub.f32 %v5486_v23, %v10807_v45  ;;  %12353 = vst [vmem:[#allocation122_spill] sm:$0xff] %v10820_v56  ;;  %v10831_v36 = vsub.f32 %v5489_v51, %v10820_v56 }
 0x418   :  { %4372 = vmatmul.mubr.f32.gmra.mrb[122].mxu0 %v12344_v29  ;;  %5650 = vmatmul.mubr.f32.gmra.mrb[62].mxu1 %v5649_v21  ;;  %v10787_v21 = vsub.f32 %v5480_v57, %v10773_v47  ;;  %v5431_v47 = vld [vmem:[#allocation8 + $0x220] sm:$0xff] }
 0x419   :  { %4377 = vmatprep.mubr.f32.mxu0 %v12084_v42  ;;  %5655 = vmatprep.mubr.f32.mxu1 %v12084_v42  ;;  %12352 = vst [vmem:[#allocation121_spill] sm:$0xff] %v10818_v54  ;;  %v5492_v58 = vsel %vm76_vm0, %v5431_v47, 0  ;;  %v11981_v23 = vand.u32 4294901760, %v10818_v54  ;;  %12354 = vst [vmem:[#allocation123_spill] sm:$0xff] %v10831_v36 }
 0x41a   :  { %12348 = vst [vmem:[#allocation53_spill] sm:$0xff] %v10787_v21  ;;  %v11971_v57 = vand.u32 4294901760, %v10787_v21 }
 0x41b   :  { %v5725_v51 = vsub.f32 %v10818_v54, %v11981_v23 }
 0x41c   :  { %4380 = vmatmul.mubr.f32.gmra.mrb[124].mxu0 %v12347_v3  ;;  %5661 = vmatmul.mubr.f32.gmra.mrb[64].mxu1 %v5660_v5  ;;  %v10801_v5 = vsub.f32 %v5483_v25, %v10789_v39  ;;  %v5432_v39 = vld [vmem:[#allocation8 + $0x228] sm:$0xff] }
 0x41d   :  { %4385 = vmatprep.mubr.f32.mxu0 %v12084_v42  ;;  %5666 = vmatprep.mubr.f32.mxu1 %v12084_v42  ;;  %v5495_v47 = vsel %vm76_vm0, %v5432_v39, 0  ;;  %v5726_v23 = vand.u32 4294901760, %v5725_v51  ;;  %v12361_v51 = vld [vmem:[#allocation47_spill] sm:$0xff] }
 0x41e   :  { %12350 = vst [vmem:[#allocation96_spill] sm:$0xff] %v10801_v5  ;;  %v11976_v25 = vand.u32 4294901760, %v10801_v5  ;;  %v10838_v45 = vand.u32 4294901760, %v5495_v47 }
 0x420   :  { %4388 = vmatmul.mubr.f32.gmra.mrb[126].mxu0 %v10295_v24  ;;  %5672 = vmatmul.mubr.f32.gmra.mrb[66].mxu1 %v5671_v17  ;;  %v5703_v17 = vsub.f32 %v10787_v21, %v11971_v57  ;;  %v10833_v57 = vand.u32 4294901760, %v5492_v58  ;;  %v5433_v21 = vld [vmem:[#allocation8 + $0x230] sm:$0xff]  ;;  %12356 = vst [vmem:[#allocation125_spill] sm:$0xff] %v10838_v45 }
 0x421   :  { %4393 = vmatprep.mubr.f32.mxu0 %v12084_v42  ;;  %5677 = vmatprep.mubr.f32.mxu1 %v12084_v42  ;;  %v5498_v39 = vsel %vm76_vm0, %v5433_v21, 0 }
 0x422   :  { %12355 = vst [vmem:[#allocation124_spill] sm:$0xff] %v10833_v57  ;;  %v10854_v56 = vand.u32 4294901760, %v5498_v39 }
 0x424   :  { %4396 = vmatmul.mubr.f32.gmra.mrb[128].mxu0 %v10314_v32  ;;  %5683 = vmatmul.mubr.f32.gmra.mrb[68].mxu1 %v5682_v49  ;;  %v5704_v32 = vand.u32 4294901760, %v5703_v17  ;;  %v5714_v49 = vsub.f32 %v10801_v5, %v11976_v25  ;;  %v10846_v25 = vsub.f32 %v5492_v58, %v10833_v57  ;;  %v5434_v5 = vld [vmem:[#allocation8 + $0x238] sm:$0xff]  ;;  %12358 = vst [vmem:[#allocation126_spill] sm:$0xff] %v10854_v56  ;;  %v5435_v57 = vld [vmem:[#allocation8 + $0x240] sm:$0xff] }
 0x425   :  { %4401 = vmatprep.mubr.f32.mxu0 %v12084_v42  ;;  %5688 = vmatprep.mubr.f32.mxu1 %v12084_v42  ;;  %v5501_v54 = vsel %vm76_vm0, %v5434_v5, 0  ;;  %v12363_v5 = vld [vmem:[#allocation54_spill] sm:$0xff] }
 0x426   :  { %v5715_v17 = vand.u32 4294901760, %v5714_v49  ;;  %v12357_v49 = vld [vmem:[#allocation105_spill] sm:$0xff]  ;;  %v11991_v21 = vand.u32 4294901760, %v10846_v25 }
 0x428   :  { %4404 = vmatmul.mubr.f32.gmra.mrb[130].mxu0 %v10327_v9  ;;  %5694 = vmatmul.mubr.f32.gmra.mrb[70].mxu1 %v5693_v2  ;;  %v11988_v2 = vand.u32 4294901760, %v10831_v36 }
 0x429   :  { %4409 = vmatprep.mubr.f32.mxu0 %v12084_v42  ;;  %5699 = vmatprep.mubr.f32.mxu1 %v12084_v42 }
 0x42a   :  { %v5736_v58 = vsub.f32 %v10831_v36, %v11988_v2  ;;  %v5747_v2 = vsub.f32 %v10846_v25, %v11991_v21  ;;  %v10873_v36 = vand.u32 4294901760, %v5501_v54 }
 0x42c   :  { %4412 = vmatmul.mubr.f32.gmra.mrb[132].mxu0 %v10340_v30  ;;  %5705 = vmatmul.mubr.f32.gmra.mrb[72].mxu1 %v5704_v32  ;;  %v10852_v32 = vsub.f32 %v5495_v47, %v10838_v45  ;;  %v12359_v47 = vand.u32 4294901760, %v12285_v53  ;;  %12362 = vst [vmem:[#allocation47_spill] sm:$0xff] %v10873_v36  ;;  %v5504_v53 = vsel %vm76_vm0, %v5435_v57, 0  ;;  %v10887_v21 = vsub.f32 %v5501_v54, %v10873_v36 }
 0x42d   :  { %4417 = vmatprep.mubr.f32.mxu0 %v12084_v42  ;;  %5710 = vmatprep.mubr.f32.mxu1 %v12084_v42  ;;  %v10889_v57 = vand.u32 4294901760, %v5504_v53 }
 0x42e   :  { %v11992_v45 = vand.u32 4294901760, %v10852_v32  ;;  %12366 = vst [vmem:[#allocation54_spill] sm:$0xff] %v10887_v21 }
 0x430   :  { %4420 = vmatmul.mubr.f32.gmra.mrb[134].mxu0 %v12357_v49  ;;  %5716 = vmatmul.mubr.f32.gmra.mrb[74].mxu1 %v5715_v17  ;;  %v10867_v17 = vsub.f32 %v5498_v39, %v10854_v56  ;;  %v5737_v49 = vand.u32 4294901760, %v5736_v58  ;;  %v5436_v39 = vld [vmem:[#allocation8 + $0x248] sm:$0xff] }
 0x431   :  { %4498 = vmatprep.mubr.f32.mxu0 %v12084_v42  ;;  %5721 = vmatprep.mubr.f32.mxu1 %v12084_v42 }
 0x432   :  { %12360 = vst [vmem:[#allocation127_spill] sm:$0xff] %v10867_v17  ;;  %v11993_v58 = vand.u32 4294901760, %v10867_v17 }
 0x434   :  { %4502 = vmatmul.mubr.f32.vlgmr.msra.gmra.mrb[80].mxu0 %v12359_v47  ;;  %5727 = vmatmul.mubr.f32.gmra.mrb[76].mxu1 %v5726_v23  ;;  %v12364_v47 = vand.u32 4294901760, %v9982_v62  ;;  %v5758_v23 = vsub.f32 %v10852_v32, %v11992_v45  ;;  %v5507_v62 = vsel %vm76_vm0, %v5436_v39, 0  ;;  %v12368_v45 = vand.u32 4294901760, %v12294_v26  ;;  %v5438_v26 = vld [vmem:[#allocation8 + $0x258] sm:$0xff] }
 0x435   :  { %7667 = vmatpush1.bf16.msra.mxu0 %v12361_v51  ;;  %4507 = vmatprep.mubr.f32.mxu0 %v12084_v42  ;;  %v12365_v51 = vld [vmem:[#allocation55_spill] sm:$0xff]  ;;  %v5769_v54 = vsub.f32 %v10867_v17, %v11993_v58  ;;  %v5513_v17 = vsel %vm76_vm0, %v5438_v26, 0 }
 0x436   :  { %7669 = vmatprep.subr.bf16.mxu0 %v12363_v5  ;;  %5732 = vmatprep.mubr.f32.mxu1 %v12084_v42  ;;  %v5748_v5 = vand.u32 4294901760, %v5747_v2  ;;  %12367 = vst [vmem:[#allocation55_spill] sm:$0xff] %v10889_v57  ;;  %v10903_v2 = vsub.f32 %v5504_v53, %v10889_v57 }
 0x438   :  { %4511 = vmatmul.mubr.f32.gmra.mrb[82].mxu0 %v12364_v47  ;;  %5738 = vmatmul.mubr.f32.gmra.mrb[78].mxu1 %v5737_v49  ;;  %v5437_v47 = vld [vmem:[#allocation8 + $0x250] sm:$0xff]  ;;  %12369 = vst [vmem:[#allocation128_spill] sm:$0xff] %v10903_v2  ;;  %v10905_v49 = vand.u32 4294901760, %v5507_v62 }
 0x439   :  { %7671 = vmatpush1.bf16.msra.mxu0 %v12365_v51  ;;  %4516 = vmatprep.mubr.f32.mxu0 %v12084_v42  ;;  %v5759_v51 = vand.u32 4294901760, %v5758_v23  ;;  %v5510_v39 = vsel %vm76_vm0, %v5437_v47, 0  ;;  %v5770_v23 = vand.u32 4294901760, %v5769_v54  ;;  %v12374_v54 = vand.u32 4294901760, %v10023_v13 }
 0x43a   :  { %7673 = vmatprep.subr.bf16.mxu0 %v12248_v46  ;;  %5743 = vmatprep.mubr.f32.mxu1 %v12084_v42  ;;  %v11996_v46 = vand.u32 4294901760, %v10887_v21  ;;  %12370 = vst [vmem:[#allocation129_spill] sm:$0xff] %v10905_v49  ;;  %v10911_v58 = vand.u32 4294901760, %v5510_v39  ;;  %v10919_v47 = vsub.f32 %v5507_v62, %v10905_v49 }
 0x43c   :  { %4520 = vmatmul.mubr.f32.gmra.mrb[84].mxu0 %v12368_v45  ;;  %5749 = vmatmul.mubr.f32.gmra.mrb[80].mxu1 %v5748_v5  ;;  %v12371_v45 = vand.u32 4294901760, %v10007_v34  ;;  %12372 = vst [vmem:[#allocation130_spill] sm:$0xff] %v10911_v58  ;;  %v5780_v53 = vsub.f32 %v10887_v21, %v11996_v46  ;;  %v11999_v5 = vand.u32 4294901760, %v10903_v2  ;;  %12373 = vst [vmem:[#allocation131_spill] sm:$0xff] %v10919_v47  ;;  %v5439_v34 = vld [vmem:[#allocation8 + $0x260] sm:$0xff]  ;;  %v12002_v26 = vand.u32 4294901760, %v10919_v47 }
 0x43d   :  { %4525 = vmatprep.mubr.f32.mxu0 %v12084_v42  ;;  %5754 = vmatprep.mubr.f32.mxu1 %v12084_v42  ;;  %v5516_v13 = vsel %vm76_vm0, %v5439_v34, 0  ;;  %v5441_v34 = vld [vmem:[#allocation8 + $0x270] sm:$0xff] }
 0x43e   :  { %v5781_v46 = vand.u32 4294901760, %v5780_v53  ;;  %v5791_v62 = vsub.f32 %v10903_v2, %v11999_v5  ;;  %v5802_v5 = vsub.f32 %v10919_v47, %v12002_v26  ;;  %v10947_v2 = vand.u32 4294901760, %v5516_v13 }
 0x440   :  { %4529 = vmatmul.mubr.f32.gmra.mrb[86].mxu0 %v12371_v45  ;;  %5760 = vmatmul.mubr.f32.gmra.mrb[82].mxu1 %v5759_v51  ;;  %v10926_v51 = vsub.f32 %v5510_v39, %v10911_v58  ;;  %v10928_v45 = vand.u32 4294901760, %v5513_v17  ;;  %v12377_v39 = vand.u32 4294901760, %v10042_v14  ;;  %v5792_v53 = vand.u32 4294901760, %v5791_v62  ;;  %12379 = vst [vmem:[#allocation135_spill] sm:$0xff] %v10947_v2 }
 0x441   :  { %4534 = vmatprep.mubr.f32.mxu0 %v12084_v42  ;;  %5765 = vmatprep.mubr.f32.mxu1 %v12084_v42  ;;  %v5803_v62 = vand.u32 4294901760, %v5802_v5  ;;  %v10959_v26 = vsub.f32 %v5516_v13, %v10947_v2 }
 0x442   :  { %12375 = vst [vmem:[#allocation132_spill] sm:$0xff] %v10926_v51  ;;  %12376 = vst [vmem:[#allocation133_spill] sm:$0xff] %v10928_v45  ;;  %v12005_v21 = vand.u32 4294901760, %v10926_v51 }
 0x443   :  { %12381 = vst [vmem:[#allocation136_spill] sm:$0xff] %v10959_v26  ;;  %v12011_v5 = vand.u32 4294901760, %v10959_v26 }
 0x444   :  { %4538 = vmatmul.mubr.f32.gmra.mrb[88].mxu0 %v12374_v54  ;;  %5771 = vmatmul.mubr.f32.gmra.mrb[84].mxu1 %v5770_v23  ;;  %v5440_v54 = vld [vmem:[#allocation8 + $0x268] sm:$0xff]  ;;  %v10941_v23 = vsub.f32 %v5513_v17, %v10928_v45  ;;  %v5813_v17 = vsub.f32 %v10926_v51, %v12005_v21 }
 0x445   :  { %4543 = vmatprep.mubr.f32.mxu0 %v12084_v42  ;;  %5776 = vmatprep.mubr.f32.mxu1 %v12084_v42  ;;  %v5519_v14 = vsel %vm76_vm0, %v5440_v54, 0  ;;  %v5442_v54 = vld [vmem:[#allocation8 + $0x278] sm:$0xff] }
 0x446   :  { %12378 = vst [vmem:[#allocation134_spill] sm:$0xff] %v10941_v23  ;;  %v10961_v47 = vand.u32 4294901760, %v5519_v14  ;;  %v5814_v21 = vand.u32 4294901760, %v5813_v17  ;;  %v12386_v17 = vand.u32 4294901760, %v12309_v35 }
 0x448   :  { %4547 = vmatmul.mubr.f32.gmra.mrb[90].mxu0 %v12377_v39  ;;  %5782 = vmatmul.mubr.f32.gmra.mrb[86].mxu1 %v5781_v46  ;;  %v12380_v39 = vand.u32 4294901760, %v12303_v37  ;;  %v12008_v46 = vand.u32 4294901760, %v10941_v23  ;;  %12382 = vst [vmem:[#allocation137_spill] sm:$0xff] %v10961_v47  ;;  %v5522_v37 = vsel %vm76_vm0, %v5441_v34, 0  ;;  %v10973_v13 = vsub.f32 %v5519_v14, %v10961_v47 }
 0x449   :  { %4552 = vmatprep.mubr.f32.mxu0 %v12084_v42  ;;  %5787 = vmatprep.mubr.f32.mxu1 %v12084_v42  ;;  %v10975_v51 = vand.u32 4294901760, %v5522_v37  ;;  %v5525_v34 = vsel %vm76_vm0, %v5442_v54, 0  ;;  %v5835_v14 = vsub.f32 %v10959_v26, %v12011_v5 }
 0x44a   :  { %12384 = vst [vmem:[#allocation138_spill] sm:$0xff] %v10973_v13 }
 0x44b   :  { %12385 = vst [vmem:[#allocation139_spill] sm:$0xff] %v10975_v51  ;;  %v10989_v54 = vsub.f32 %v5522_v37, %v10975_v51 }
 0x44c   :  { %4556 = vmatmul.mubr.f32.gmra.mrb[92].mxu0 %v12380_v39  ;;  %5793 = vmatmul.mubr.f32.gmra.mrb[88].mxu1 %v5792_v53  ;;  %v12383_v39 = vand.u32 4294901760, %v12306_v12  ;;  %v5824_v53 = vsub.f32 %v10941_v23, %v12008_v46  ;;  %v5443_v12 = vld [vmem:[#allocation8 + $0x280] sm:$0xff]  ;;  %v12014_v46 = vand.u32 4294901760, %v10973_v13  ;;  %v12389_v23 = vand.u32 4294901760, %v12312_v8 }
 0x44d   :  { %4561 = vmatprep.mubr.f32.mxu0 %v12084_v42  ;;  %5798 = vmatprep.mubr.f32.mxu1 %v12084_v42  ;;  %12388 = vst [vmem:[#allocation141_spill] sm:$0xff] %v10989_v54  ;;  %v5528_v35 = vsel %vm76_vm0, %v5443_v12, 0  ;;  %v12017_v5 = vand.u32 4294901760, %v10989_v54 }
 0x44e   :  { %v5846_v37 = vsub.f32 %v10973_v13, %v12014_v46  ;;  %v11003_v26 = vand.u32 4294901760, %v5528_v35 }
 0x450   :  { %4565 = vmatmul.mubr.f32.gmra.mrb[94].mxu0 %v12383_v39  ;;  %5804 = vmatmul.mubr.f32.gmra.mrb[90].mxu1 %v5803_v62  ;;  %v10981_v39 = vand.u32 4294901760, %v5525_v34  ;;  %v5825_v62 = vand.u32 4294901760, %v5824_v53  ;;  %v5836_v53 = vand.u32 4294901760, %v5835_v14  ;;  %12390 = vst [vmem:[#allocation142_spill] sm:$0xff] %v11003_v26  ;;  %v5857_v14 = vsub.f32 %v10989_v54, %v12017_v5 }
 0x451   :  { %4570 = vmatprep.mubr.f32.mxu0 %v12084_v42  ;;  %5809 = vmatprep.mubr.f32.mxu1 %v12084_v42  ;;  %v11015_v46 = vsub.f32 %v5528_v35, %v11003_v26 }
 0x452   :  { %12387 = vst [vmem:[#allocation140_spill] sm:$0xff] %v10981_v39 }
 0x453   :  { %v12023_v35 = vand.u32 4294901760, %v11015_v46 }
 0x454   :  { %4574 = vmatmul.mubr.f32.gmra.mrb[96].mxu0 %v12386_v17  ;;  %5815 = vmatmul.mubr.f32.gmra.mrb[92].mxu1 %v5814_v21  ;;  %v5444_v17 = vld [vmem:[#allocation8 + $0x288] sm:$0xff]  ;;  %v10996_v21 = vsub.f32 %v5525_v34, %v10981_v39  ;;  %v12391_v34 = vand.u32 4294901760, %v12315_v10 }
 0x455   :  { %4579 = vmatprep.mubr.f32.mxu0 %v12084_v42  ;;  %5820 = vmatprep.mubr.f32.mxu1 %v12084_v42  ;;  %v5531_v8 = vsel %vm76_vm0, %v5444_v17, 0  ;;  %v5446_v17 = vld [vmem:[#allocation8 + $0x298] sm:$0xff] }
 0x456   :  { %v12020_v12 = vand.u32 4294901760, %v10996_v21  ;;  %v11017_v13 = vand.u32 4294901760, %v5531_v8 }
 0x458   :  { %4583 = vmatmul.mubr.f32.gmra.mrb[98].mxu0 %v12389_v23  ;;  %5826 = vmatmul.mubr.f32.gmra.mrb[94].mxu1 %v5825_v62  ;;  %v5445_v23 = vld [vmem:[#allocation8 + $0x290] sm:$0xff]  ;;  %v5847_v62 = vand.u32 4294901760, %v5846_v37  ;;  %12392 = vst [vmem:[#allocation143_spill] sm:$0xff] %v11017_v13  ;;  %v5858_v37 = vand.u32 4294901760, %v5857_v14  ;;  %v11029_v5 = vsub.f32 %v5531_v8, %v11017_v13 }
 0x459   :  { %4588 = vmatprep.mubr.f32.mxu0 %v12084_v42  ;;  %5831 = vmatprep.mubr.f32.mxu1 %v12084_v42  ;;  %v5534_v10 = vsel %vm76_vm0, %v5445_v23, 0  ;;  %v12395_v23 = vand.u32 4294901760, %v12317_v27  ;;  %v12397_v27 = vand.u32 4294901760, %v12318_v6 }
 0x45a   :  { %v11031_v54 = vand.u32 4294901760, %v5534_v10  ;;  %v12021_v8 = vand.u32 4294901760, %v11029_v5 }
 0x45c   :  { %4592 = vmatmul.mubr.f32.gmra.mrb[100].mxu0 %v12391_v34  ;;  %5837 = vmatmul.mubr.f32.gmra.mrb[96].mxu1 %v5836_v53  ;;  %v12393_v34 = vand.u32 4294901760, %v12316_v4  ;;  %v5868_v53 = vsub.f32 %v10996_v21, %v12020_v12  ;;  %12394 = vst [vmem:[#allocation144_spill] sm:$0xff] %v11031_v54  ;;  %v5537_v4 = vsel %vm76_vm0, %v5446_v17, 0  ;;  %v11043_v14 = vsub.f32 %v5534_v10, %v11031_v54 }
 0x45d   :  { %4597 = vmatprep.mubr.f32.mxu0 %v12084_v42  ;;  %5842 = vmatprep.mubr.f32.mxu1 %v12084_v42  ;;  %v11045_v12 = vand.u32 4294901760, %v5537_v4 }
 0x45f   :  { %12396 = vst [vmem:[#allocation145_spill] sm:$0xff] %v11045_v12  ;;  %v11056_v10 = vsub.f32 %v5537_v4, %v11045_v12  ;;  %v12399_v4 = vand.u32 4294901760, %v12321_v20 }
 0x460   :  { %4601 = vmatmul.mubr.f32.gmra.mrb[102].mxu0 %v12393_v34  ;;  %5848 = vmatmul.mubr.f32.gmra.mrb[98].mxu1 %v5847_v62  ;;  %v5869_v34 = vand.u32 4294901760, %v5868_v53  ;;  %v5879_v62 = vsub.f32 %v11015_v46, %v12023_v35  ;;  %v5890_v53 = vsub.f32 %v11029_v5, %v12021_v8 }
 0x461   :  { %4606 = vmatprep.mubr.f32.mxu0 %v12084_v42  ;;  %5853 = vmatprep.mubr.f32.mxu1 %v12084_v42 }
 0x462   :  { %v5880_v17 = vand.u32 4294901760, %v5879_v62  ;;  %v5891_v6 = vand.u32 4294901760, %v5890_v53  ;;  %v12024_v62 = vand.u32 4294901760, %v11056_v10 }
 0x464   :  { %4610 = vmatmul.mubr.f32.gmra.mrb[104].mxu0 %v12395_v23  ;;  %5859 = vmatmul.mubr.f32.gmra.mrb[100].mxu1 %v5858_v37  ;;  %v12022_v37 = vand.u32 4294901760, %v11043_v14  ;;  %v12398_v23 = vand.u32 4294901760, %v12319_v28  ;;  %v5912_v53 = vsub.f32 %v11056_v10, %v12024_v62 }
 0x465   :  { %4615 = vmatprep.mubr.f32.mxu0 %v12084_v42  ;;  %5864 = vmatprep.mubr.f32.mxu1 %v12084_v42 }
 0x468   :  { %4619 = vmatmul.mubr.f32.gmra.mrb[106].mxu0 %v12397_v27  ;;  %5870 = vmatmul.mubr.f32.gmra.mrb[102].mxu1 %v5869_v34  ;;  %v5901_v34 = vsub.f32 %v11043_v14, %v12022_v37 }
 0x469   :  { %4624 = vmatprep.mubr.f32.mxu0 %v12084_v42  ;;  %5875 = vmatprep.mubr.f32.mxu1 %v12084_v42 }
 0x46c   :  { %4628 = vmatmul.mubr.f32.gmra.mrb[108].mxu0 %v12398_v23  ;;  %5881 = vmatmul.mubr.f32.gmra.mrb[104].mxu1 %v5880_v17  ;;  %v5902_v17 = vand.u32 4294901760, %v5901_v34  ;;  %v5913_v34 = vand.u32 4294901760, %v5912_v53 }
 0x46d   :  { %4633 = vmatprep.mubr.f32.mxu0 %v12084_v42  ;;  %5886 = vmatprep.mubr.f32.mxu1 %v12084_v42 }
 0x46f   :  { %v3011_v27 = vpop.f32.mrb[16].mxu1 }
 0x470   :  { %4637 = vmatmul.mubr.f32.gmra.mrb[110].mxu0 %v12399_v4  ;;  %v7732_v8 = vadd.f32 %v3011_v27, %v10497_v33  ;;  %v3013_v28 = vpop.f32.mrb[17].mxu1  ;;  %5892 = vmatmul.mubr.f32.gmra.mrb[106].mxu1 %v5891_v6  ;;  %v12400_v4 = vand.u32 4294901760, %v12323_v60  ;;  %v12401_v60 = vand.u32 4294901760, %v12325_v61 }
 0x471   :  { %4642 = vmatprep.mubr.f32.mxu0 %v12084_v42  ;;  %v7733_v23 = vadd.f32 %v3013_v28, %v10501_v22  ;;  %5897 = vmatprep.mubr.f32.mxu1 %v12084_v42 }
 0x472   :  { %v3205_v37 = vadd.f32 -2.117904, %v7732_v8 }
 0x473   :  { %v3206_v35 = vadd.f32 -2.117904, %v7733_v23  ;;  %v3018_v20 = vpop.f32.mrb[18].mxu1  ;;  %v12402_v23 = vand.u32 4294901760, %v12328_v40 }
 0x474   :  { %4646 = vmatmul.mubr.f32.gmra.mrb[112].mxu0 %v12400_v4  ;;  %3261 = vst [vmem:[#allocation9] sm:$0xff] %v3205_v37  ;;  %v7734_v33 = vadd.f32 %v3018_v20, %v10505_v18  ;;  %v3020_v6 = vpop.f32.mrb[19].mxu1  ;;  %5903 = vmatmul.mubr.f32.gmra.mrb[108].mxu1 %v5902_v17  ;;  %v12403_v20 = vld [vmem:[#allocation57_spill] sm:$0xff]  ;;  %v12404_v4 = vld [vmem:[#allocation52_spill] sm:$0xff] }
 0x475   :  { %4651 = vmatprep.mubr.f32.mxu0 %v12084_v42  ;;  %3263 = vst.msk [vmem:[#allocation9 + $0x8] sm:$0xff] %vm3262_vm1, %v3206_v35  ;;  %v7735_v22 = vadd.f32 %v3020_v6, %v10508_v7  ;;  %5908 = vmatprep.mubr.f32.mxu1 %v12084_v42  ;;  %v12406_v6 = vld [vmem:[#allocation67_spill] sm:$0xff] }
 0x476   :  { %v3207_v8 = vadd.f32 -2.117904, %v7734_v33  ;;  %v12405_v33 = vpack.c.bf16 %v12403_v20, %v12404_v4 }
 0x477   :  { %v3208_v27 = vadd.f32 -2.117904, %v7735_v22  ;;  %v3025_v28 = vpop.f32.mrb[20].mxu1 }
 0x478   :  { %4655 = vmatmul.mubr.f32.gmra.mrb[114].mxu0 %v12401_v60  ;;  %3264 = vst [vmem:[#allocation9 + $0x10] sm:$0xff] %v3207_v8  ;;  %v7736_v18 = vadd.f32 %v3025_v28, %v10513_v59  ;;  %v3027_v37 = vpop.f32.mrb[21].mxu1  ;;  %5914 = vmatmul.mubr.f32.gmra.mrb[110].mxu1 %v5913_v34  ;;  %v12407_v34 = vld [vmem:[#allocation61_spill] sm:$0xff] }
 0x479   :  { %4660 = vmatprep.mubr.f32.mxu0 %v12084_v42  ;;  %3265 = vst.msk [vmem:[#allocation9 + $0x18] sm:$0xff] %vm3262_vm1, %v3208_v27  ;;  %v7737_v35 = vadd.f32 %v3027_v37, %v10516_v19  ;;  %6024 = vmatprep.mubr.f32.mxu1 %v12084_v42  ;;  %v12408_v22 = vpack.c.bf16 %v12406_v6, %v12407_v34  ;;  %v12409_v27 = vand.u32 4294901760, %v10239_v44  ;;  %v12411_v37 = vld [vmem:[#allocation60_spill] sm:$0xff] }
 0x47a   :  { %v3209_v7 = vadd.f32 -2.117904, %v7736_v18  ;;  %v12410_v18 = vld [vmem:[#allocation65_spill] sm:$0xff] }
 0x47b   :  { %v3210_v17 = vadd.f32 -2.117904, %v7737_v35  ;;  %v3032_v53 = vpop.f32.mrb[22].mxu1  ;;  %v12412_v35 = vpack.c.bf16 %v12410_v18, %v12411_v37  ;;  %v12421_v18 = vld [vmem:[#allocation87_spill] sm:$0xff]  ;;  %v12422_v37 = vld [vmem:[#allocation68_spill] sm:$0xff] }
 0x47c   :  { %4664 = vmatmul.mubr.f32.gmra.mrb[116].mxu0 %v12402_v23  ;;  %3266 = vst [vmem:[#allocation9 + $0x20] sm:$0xff] %v3209_v7  ;;  %v7738_v61 = vadd.f32 %v3032_v53, %v10521_v52  ;;  %v3034_v59 = vpop.f32.mrb[23].mxu1  ;;  %6026 = vmatmul.mubr.f32.vlgmr.msra.gmra.mrb[56].mxu1 %v10674_v31  ;;  %v12413_v7 = vld [vmem:[#allocation58_spill] sm:$0xff]  ;;  %v12414_v53 = vand.u32 4294901760, %v12340_v16  ;;  %v12415_v16 = vand.u32 4294901760, %v12344_v29  ;;  %v12416_v29 = vand.u32 4294901760, %v12347_v3 }
 0x47d   :  { %4669 = vmatprep.mubr.f32.mxu0 %v12084_v42  ;;  %3267 = vst.msk [vmem:[#allocation9 + $0x28] sm:$0xff] %vm3262_vm1, %v3210_v17  ;;  %v7739_v19 = vadd.f32 %v3034_v59, %v10524_v63  ;;  %7699 = vmatpush1.bf16.msra.mxu1 %v12405_v33  ;;  %v12419_v3 = vand.u32 4294901760, %v10295_v24 }
 0x47e   :  { %6031 = vmatprep.mubr.f32.mxu1 %v12084_v42  ;;  %v3211_v40 = vadd.f32 -2.117904, %v7738_v61  ;;  %7701 = vmatprep.subr.bf16.mxu1 %v12408_v22  ;;  %v12417_v22 = vld [vmem:[#allocation83_spill] sm:$0xff] }
 0x47f   :  { %v3212_v52 = vadd.f32 -2.117904, %v7739_v19  ;;  %v3039_v8 = vpop.f32.mrb[24].mxu1 }
 0x480   :  { %4673 = vmatmul.mubr.f32.gmra.mrb[118].mxu0 %v12409_v27  ;;  %3268 = vst [vmem:[#allocation9 + $0x30] sm:$0xff] %v3211_v40  ;;  %v7740_v28 = vadd.f32 %v3039_v8, %v10529_v11  ;;  %v3041_v63 = vpop.f32.mrb[25].mxu1  ;;  %6033 = vmatmul.mubr.f32.gmra.mrb[58].mxu1 %v10684_v1 }
 0x481   :  { %4678 = vmatprep.mubr.f32.mxu0 %v12084_v42  ;;  %3269 = vst.msk [vmem:[#allocation9 + $0x38] sm:$0xff] %vm3262_vm1, %v3212_v52  ;;  %v7741_v60 = vadd.f32 %v3041_v63, %v10532_v50  ;;  %7703 = vmatpush1.bf16.msra.mxu1 %v12412_v35  ;;  %v12418_v52 = vld [vmem:[#allocation70_spill] sm:$0xff]  ;;  %v12420_v63 = vld [vmem:[#allocation73_spill] sm:$0xff] }
 0x482   :  { %6038 = vmatprep.mubr.f32.mxu1 %v12084_v42  ;;  %v3213_v44 = vadd.f32 -2.117904, %v7740_v28  ;;  %7705 = vmatprep.subr.bf16.mxu1 %v12413_v7 }
 0x483   :  { %v3214_v17 = vadd.f32 -2.117904, %v7741_v60  ;;  %v3046_v11 = vpop.f32.mrb[26].mxu1 }
 0x484   :  { %4682 = vmatmul.mubr.f32.gmra.mrb[120].mxu0 %v12414_v53  ;;  %3270 = vst [vmem:[#allocation9 + $0x40] sm:$0xff] %v3213_v44  ;;  %v7742_v23 = vadd.f32 %v3046_v11, %v10537_v48  ;;  %v3048_v61 = vpop.f32.mrb[27].mxu1  ;;  %6040 = vmatmul.mubr.f32.gmra.mrb[60].mxu1 %v10695_v38  ;;  %v12423_v53 = vld [vmem:[#allocation101_spill] sm:$0xff] }
 0x485   :  { %4687 = vmatprep.mubr.f32.mxu0 %v12084_v42  ;;  %3271 = vst.msk [vmem:[#allocation9 + $0x48] sm:$0xff] %vm3262_vm1, %v3214_v17  ;;  %v7743_v50 = vadd.f32 %v3048_v61, %v10540_v55  ;;  %6045 = vmatprep.mubr.f32.mxu1 %v12084_v42  ;;  %v12424_v24 = vand.u32 4294901760, %v12423_v53 }
 0x486   :  { %v3215_v59 = vadd.f32 -2.117904, %v7742_v23  ;;  %v12425_v23 = vld [vmem:[#allocation106_spill] sm:$0xff] }
 0x487   :  { %v3216_v19 = vadd.f32 -2.117904, %v7743_v50  ;;  %v3053_v20 = vpop.f32.mrb[28].mxu1 }
 0x488   :  { %4691 = vmatmul.mubr.f32.gmra.mrb[122].mxu0 %v12415_v16  ;;  %3272 = vst [vmem:[#allocation9 + $0x50] sm:$0xff] %v3215_v59  ;;  %v7744_v48 = vadd.f32 %v3053_v20, %v10546_v41  ;;  %v3055_v4 = vpop.f32.mrb[29].mxu1  ;;  %6047 = vmatmul.mubr.f32.gmra.mrb[62].mxu1 %v10700_v43  ;;  %v12426_v59 = vld [vmem:[#allocation91_spill] sm:$0xff] }
 0x489   :  { %4696 = vmatprep.mubr.f32.mxu0 %v12084_v42  ;;  %3273 = vst.msk [vmem:[#allocation9 + $0x58] sm:$0xff] %vm3262_vm1, %v3216_v19  ;;  %v7745_v55 = vadd.f32 %v3055_v4, %v10548_v15  ;;  %6052 = vmatprep.mubr.f32.mxu1 %v12084_v42  ;;  %v12427_v19 = vld [vmem:[#allocation107_spill] sm:$0xff] }
 0x48a   :  { %v3217_v33 = vadd.f32 -2.117904, %v7744_v48 }
 0x48b   :  { %v3218_v40 = vadd.f32 -2.117904, %v7745_v55  ;;  %v3060_v6 = vpop.f32.mrb[30].mxu1  ;;  %v12428_v55 = vand.u32 4294901760, %v10327_v9  ;;  %v12432_v9 = vand.u32 4294901760, %v10340_v30 }
 0x48c   :  { %4700 = vmatmul.mubr.f32.gmra.mrb[124].mxu0 %v12416_v29  ;;  %3274 = vst [vmem:[#allocation9 + $0x60] sm:$0xff] %v3217_v33  ;;  %v7746_v41 = vadd.f32 %v3060_v6, %v10554_v0  ;;  %v3062_v34 = vpop.f32.mrb[31].mxu1  ;;  %6054 = vmatmul.mubr.f32.gmra.mrb[64].mxu1 %v12417_v22  ;;  %v12429_v33 = vld [vmem:[#allocation22_spill] sm:$0xff]  ;;  %v12430_v29 = vld [vmem:[#allocation75_spill] sm:$0xff] }
 0x48d   :  { %4705 = vmatprep.mubr.f32.mxu0 %v12084_v42  ;;  %3275 = vst.msk [vmem:[#allocation9 + $0x68] sm:$0xff] %vm3262_vm1, %v3218_v40  ;;  %v7747_v15 = vadd.f32 %v3062_v34, %v12418_v52  ;;  %6059 = vmatprep.mubr.f32.mxu1 %v12084_v42 }
 0x48e   :  { %v3219_v8 = vadd.f32 -2.117904, %v7746_v41  ;;  %v12431_v41 = vld [vmem:[#allocation108_spill] sm:$0xff] }
 0x48f   :  { %v3220_v27 = vadd.f32 -2.117904, %v7747_v15  ;;  %v3067_v28 = vpop.f32.mrb[32].mxu1 }
 0x490   :  { %4709 = vmatmul.mubr.f32.gmra.mrb[126].mxu0 %v12419_v3  ;;  %3276 = vst [vmem:[#allocation9 + $0x70] sm:$0xff] %v3219_v8  ;;  %v7748_v0 = vadd.f32 %v3067_v28, %v12420_v63  ;;  %v3069_v60 = vpop.f32.mrb[33].mxu1  ;;  %6061 = vmatmul.mubr.f32.gmra.mrb[66].mxu1 %v12421_v18  ;;  %v12434_v63 = vld [vmem:[#allocation74_spill] sm:$0xff] }
 0x491   :  { %4714 = vmatprep.mubr.f32.mxu0 %v12084_v42  ;;  %3277 = vst.msk [vmem:[#allocation9 + $0x78] sm:$0xff] %vm3262_vm1, %v3220_v27  ;;  %v7749_v35 = vadd.f32 %v3069_v60, %v12422_v37  ;;  %6066 = vmatprep.mubr.f32.mxu1 %v12084_v42  ;;  %v12433_v27 = vld [vmem:[#allocation109_spill] sm:$0xff] }
 0x492   :  { %v3221_v44 = vadd.f32 -2.117904, %v7748_v0  ;;  %v12435_v0 = vld [vmem:[#allocation46_spill] sm:$0xff] }
 0x493   :  { %v3222_v17 = vadd.f32 -2.117904, %v7749_v35  ;;  %v3074_v11 = vpop.f32.mrb[34].mxu1 }
 0x494   :  { %4718 = vmatmul.mubr.f32.gmra.mrb[128].mxu0 %v12424_v24  ;;  %3278 = vst [vmem:[#allocation9 + $0x80] sm:$0xff] %v3221_v44  ;;  %v7750_v61 = vadd.f32 %v3074_v11, %v12425_v23  ;;  %v3076_v50 = vpop.f32.mrb[35].mxu1  ;;  %6068 = vmatmul.mubr.f32.gmra.mrb[68].mxu1 %v12426_v59  ;;  %v12438_v11 = vld [vmem:[#allocation28_spill] sm:$0xff]  ;;  %v12439_v23 = vld [vmem:[#allocation94_spill] sm:$0xff] }
 0x495   :  { %4723 = vmatprep.mubr.f32.mxu0 %v12084_v42  ;;  %3279 = vst.msk [vmem:[#allocation9 + $0x88] sm:$0xff] %vm3262_vm1, %v3222_v17  ;;  %v7751_v20 = vadd.f32 %v3076_v50, %v12427_v19  ;;  %6073 = vmatprep.mubr.f32.mxu1 %v12084_v42  ;;  %v12436_v17 = vld [vmem:[#allocation105_spill] sm:$0xff] }
 0x496   :  { %v3223_v16 = vadd.f32 -2.117904, %v7750_v61  ;;  %v12437_v30 = vand.u32 4294901760, %v12436_v17  ;;  %v12440_v61 = vld [vmem:[#allocation110_spill] sm:$0xff] }
 0x497   :  { %v3224_v48 = vadd.f32 -2.117904, %v7751_v20  ;;  %v3081_v4 = vpop.f32.mrb[36].mxu1 }
 0x498   :  { %4727 = vmatmul.mubr.f32.gmra.mrb[130].mxu0 %v12428_v55  ;;  %3280 = vst [vmem:[#allocation9 + $0x90] sm:$0xff] %v3223_v16  ;;  %v7752_v40 = vadd.f32 %v3081_v4, %v12429_v33  ;;  %v3083_v6 = vpop.f32.mrb[37].mxu1  ;;  %6075 = vmatmul.mubr.f32.gmra.mrb[70].mxu1 %v12430_v29  ;;  %v12442_v4 = vld [vmem:[#allocation111_spill] sm:$0xff] }
 0x499   :  { %4732 = vmatprep.mubr.f32.mxu0 %v12084_v42  ;;  %3281 = vst.msk [vmem:[#allocation9 + $0x98] sm:$0xff] %vm3262_vm1, %v3224_v48  ;;  %v7753_v34 = vadd.f32 %v3083_v6, %v12431_v41  ;;  %6080 = vmatprep.mubr.f32.mxu1 %v12084_v42  ;;  %v12441_v48 = vld [vmem:[#allocation21_spill] sm:$0xff]  ;;  %v12444_v6 = vld [vmem:[#allocation99_spill] sm:$0xff]  ;;  %v12445_v41 = vld [vmem:[#allocation112_spill] sm:$0xff] }
 0x49a   :  { %v3225_v52 = vadd.f32 -2.117904, %v7752_v40  ;;  %v12443_v40 = vld [vmem:[#allocation40_spill] sm:$0xff] }
 0x49b   :  { %v3226_v15 = vadd.f32 -2.117904, %v7753_v34  ;;  %v3088_v8 = vpop.f32.mrb[38].mxu1 }
 0x49c   :  { %4736 = vmatmul.mubr.f32.gmra.mrb[132].mxu0 %v12432_v9  ;;  %3282 = vst [vmem:[#allocation9 + $0xa0] sm:$0xff] %v3225_v52  ;;  %v7754_v28 = vadd.f32 %v3088_v8, %v12433_v27  ;;  %v3090_v3 = vpop.f32.mrb[39].mxu1  ;;  %6082 = vmatmul.mubr.f32.gmra.mrb[72].mxu1 %v12434_v63  ;;  %v12446_v52 = vld [vmem:[#allocation50_spill] sm:$0xff]  ;;  %v12447_v27 = vld [vmem:[#allocation24_spill] sm:$0xff] }
 0x49d   :  { %4741 = vmatprep.mubr.f32.mxu0 %v12084_v42  ;;  %3283 = vst.msk [vmem:[#allocation9 + $0xa8] sm:$0xff] %vm3262_vm1, %v3226_v15  ;;  %v7755_v60 = vadd.f32 %v3090_v3, %v12435_v0  ;;  %6087 = vmatprep.mubr.f32.mxu1 %v12084_v42 }
 0x49e   :  { %v3227_v37 = vadd.f32 -2.117904, %v7754_v28  ;;  %v12448_v28 = vld [vmem:[#allocation113_spill] sm:$0xff] }
 0x49f   :  { %v3228_v35 = vadd.f32 -2.117904, %v7755_v60  ;;  %v3095_v44 = vpop.f32.mrb[40].mxu1  ;;  %v12449_v60 = vld [vmem:[#allocation48_spill] sm:$0xff] }
 0x4a0   :  { %4745 = vmatmul.mubr.f32.gmra.mrb[134].mxu0 %v12437_v30  ;;  %3284 = vst [vmem:[#allocation9 + $0xb0] sm:$0xff] %v3227_v37  ;;  %v7756_v53 = vadd.f32 %v3095_v44, %v12438_v11  ;;  %v3097_v24 = vpop.f32.mrb[41].mxu1  ;;  %6089 = vmatmul.mubr.f32.gmra.mrb[74].mxu1 %v12439_v23  ;;  %v12450_v37 = vld [vmem:[#allocation122_spill] sm:$0xff] }
 0x4a1   :  { %4839 = vmatprep.mubr.f32.mxu0 %v12084_v42  ;;  %3285 = vst.msk [vmem:[#allocation9 + $0xb8] sm:$0xff] %vm3262_vm1, %v3228_v35  ;;  %v7757_v50 = vadd.f32 %v3097_v24, %v12440_v61  ;;  %6094 = vmatprep.mubr.f32.mxu1 %v12084_v42  ;;  %v12451_v35 = vld [vmem:[#allocation114_spill] sm:$0xff]  ;;  %v12453_v24 = vld [vmem:[#allocation115_spill] sm:$0xff] }
 0x4a2   :  { %v3229_v19 = vadd.f32 -2.117904, %v7756_v53  ;;  %v12452_v53 = vld [vmem:[#allocation33_spill] sm:$0xff] }
 0x4a3   :  { %v3230_v20 = vadd.f32 -2.117904, %v7757_v50  ;;  %v3102_v16 = vpop.f32.mrb[42].mxu1 }
 0x4a4   :  { %4841 = vmatmul.mubr.f32.vlgmr.msra.gmra.mrb[80].mxu0 %v12441_v48  ;;  %3286 = vst [vmem:[#allocation9 + $0xc0] sm:$0xff] %v3229_v19  ;;  %v7758_v55 = vadd.f32 %v3102_v16, %v12442_v4  ;;  %v3104_v33 = vpop.f32.mrb[43].mxu1  ;;  %6096 = vmatmul.mubr.f32.gmra.mrb[76].mxu1 %v12444_v6  ;;  %v12454_v19 = vld [vmem:[#allocation124_spill] sm:$0xff] }
 0x4a5   :  { %7675 = vmatpush1.bf16.msra.mxu0 %v12443_v40  ;;  %3287 = vst.msk [vmem:[#allocation9 + $0xc8] sm:$0xff] %vm3262_vm1, %v3230_v20  ;;  %v7759_v34 = vadd.f32 %v3104_v33, %v12445_v41  ;;  %4846 = vmatprep.mubr.f32.mxu0 %v12084_v42  ;;  %v12455_v20 = vld [vmem:[#allocation116_spill] sm:$0xff]  ;;  %v12456_v40 = vld [vmem:[#allocation26_spill] sm:$0xff]  ;;  %v12457_v41 = vld [vmem:[#allocation15_spill] sm:$0xff] }
 0x4a6   :  { %7677 = vmatprep.subr.bf16.mxu0 %v12446_v52  ;;  %v3231_v15 = vadd.f32 -2.117904, %v7758_v55  ;;  %6101 = vmatprep.mubr.f32.mxu1 %v12084_v42 }
 0x4a7   :  { %v3232_v8 = vadd.f32 -2.117904, %v7759_v34  ;;  %v3109_v9 = vpop.f32.mrb[44].mxu1 }
 0x4a8   :  { %4848 = vmatmul.mubr.f32.gmra.mrb[82].mxu0 %v12447_v27  ;;  %3288 = vst [vmem:[#allocation9 + $0xd0] sm:$0xff] %v3231_v15  ;;  %v7760_v3 = vadd.f32 %v3109_v9, %v12448_v28  ;;  %v3111_v0 = vpop.f32.mrb[45].mxu1  ;;  %6103 = vmatmul.mubr.f32.gmra.mrb[78].mxu1 %v12450_v37  ;;  %v12458_v15 = vld [vmem:[#allocation125_spill] sm:$0xff] }
 0x4a9   :  { %7679 = vmatpush1.bf16.msra.mxu0 %v12449_v60  ;;  %3289 = vst.msk [vmem:[#allocation9 + $0xd8] sm:$0xff] %vm3262_vm1, %v3232_v8  ;;  %v7761_v44 = vadd.f32 %v3111_v0, %v12451_v35  ;;  %4853 = vmatprep.mubr.f32.mxu0 %v12084_v42  ;;  %v12459_v8 = vld [vmem:[#allocation117_spill] sm:$0xff]  ;;  %v12460_v60 = vld [vmem:[#allocation32_spill] sm:$0xff]  ;;  %v12461_v35 = vld [vmem:[#allocation18_spill] sm:$0xff] }
 0x4aa   :  { %6108 = vmatprep.mubr.f32.mxu1 %v12084_v42  ;;  %v3233_v17 = vadd.f32 -2.117904, %v7760_v3 }
 0x4ab   :  { %v3234_v30 = vadd.f32 -2.117904, %v7761_v44  ;;  %v3116_v11 = vpop.f32.mrb[46].mxu1 }
 0x4ac   :  { %4855 = vmatmul.mubr.f32.gmra.mrb[84].mxu0 %v12452_v53  ;;  %3290 = vst [vmem:[#allocation9 + $0xe0] sm:$0xff] %v3233_v17  ;;  %v7762_v61 = vadd.f32 %v3116_v11, %v12453_v24  ;;  %v3118_v50 = vpop.f32.mrb[47].mxu1  ;;  %6110 = vmatmul.mubr.f32.gmra.mrb[80].mxu1 %v12454_v19  ;;  %v12521_v19 = vld [vmem:[#allocation123_spill] sm:$0xff] }
 0x4ad   :  { %4860 = vmatprep.mubr.f32.mxu0 %v12084_v42  ;;  %3291 = vst.msk [vmem:[#allocation9 + $0xe8] sm:$0xff] %vm3262_vm1, %v3234_v30  ;;  %v7763_v16 = vadd.f32 %v3118_v50, %v12455_v20  ;;  %6115 = vmatprep.mubr.f32.mxu1 %v12084_v42  ;;  %v12462_v30 = vld [vmem:[#allocation118_spill] sm:$0xff]  ;;  %v12463_v20 = vld [vmem:[#allocation13_spill] sm:$0xff] }
 0x4ae   :  { %v3235_v4 = vadd.f32 -2.117904, %v7762_v61 }
 0x4af   :  { %v3236_v55 = vadd.f32 -2.117904, %v7763_v16  ;;  %v3123_v33 = vpop.f32.mrb[48].mxu1  ;;  %v12464_v16 = vld [vmem:[#allocation19_spill] sm:$0xff] }
 0x4b0   :  { %4862 = vmatmul.mubr.f32.gmra.mrb[86].mxu0 %v12456_v40  ;;  %3292 = vst [vmem:[#allocation9 + $0xf0] sm:$0xff] %v3235_v4  ;;  %v7764_v34 = vadd.f32 %v3123_v33, %v12457_v41  ;;  %v3125_v52 = vpop.f32.mrb[49].mxu1  ;;  %6117 = vmatmul.mubr.f32.gmra.mrb[82].mxu1 %v12458_v15  ;;  %v12465_v33 = vld [vmem:[#allocation119_spill] sm:$0xff]  ;;  %v12520_v15 = vld [vmem:[#allocation121_spill] sm:$0xff] }
 0x4b1   :  { %4867 = vmatprep.mubr.f32.mxu0 %v12084_v42  ;;  %3293 = vst.msk [vmem:[#allocation9 + $0xf8] sm:$0xff] %vm3262_vm1, %v3236_v55  ;;  %v7765_v9 = vadd.f32 %v3125_v52, %v12459_v8  ;;  %6122 = vmatprep.mubr.f32.mxu1 %v12084_v42 }
 0x4b2   :  { %v3237_v28 = vadd.f32 -2.117904, %v7764_v34 }
 0x4b3   :  { %v3238_v3 = vadd.f32 -2.117904, %v7765_v9  ;;  %v3130_v0 = vpop.f32.mrb[50].mxu1  ;;  %v12466_v9 = vld [vmem:[#allocation14_spill] sm:$0xff] }
 0x4b4   :  { %4869 = vmatmul.mubr.f32.gmra.mrb[88].mxu0 %v12460_v60  ;;  %3294 = vst [vmem:[#allocation9 + $0x100] sm:$0xff] %v3237_v28  ;;  %v7766_v44 = vadd.f32 %v3130_v0, %v12461_v35  ;;  %v3132_v17 = vpop.f32.mrb[51].mxu1  ;;  %6124 = vmatmul.mubr.f32.gmra.mrb[84].mxu1 %v10854_v56  ;;  %v12467_v28 = vld [vmem:[#allocation30_spill] sm:$0xff]  ;;  %v12468_v35 = vld [vmem:[#allocation120_spill] sm:$0xff] }
 0x4b5   :  { %4874 = vmatprep.mubr.f32.mxu0 %v12084_v42  ;;  %3295 = vst.msk [vmem:[#allocation9 + $0x108] sm:$0xff] %vm3262_vm1, %v3238_v3  ;;  %v7767_v11 = vadd.f32 %v3132_v17, %v12462_v30  ;;  %6129 = vmatprep.mubr.f32.mxu1 %v12084_v42  ;;  %v12519_v56 = vld [vmem:[#allocation96_spill] sm:$0xff] }
 0x4b6   :  { %v3239_v24 = vadd.f32 -2.117904, %v7766_v44 }
 0x4b7   :  { %v3240_v61 = vadd.f32 -2.117904, %v7767_v11  ;;  %v3137_v50 = vpop.f32.mrb[52].mxu1 }
 0x4b8   :  { %4876 = vmatmul.mubr.f32.gmra.mrb[90].mxu0 %v12463_v20  ;;  %3296 = vst [vmem:[#allocation9 + $0x110] sm:$0xff] %v3239_v24  ;;  %v7768_v4 = vadd.f32 %v3137_v50, %v12464_v16  ;;  %v3139_v55 = vpop.f32.mrb[53].mxu1  ;;  %6131 = vmatmul.mubr.f32.gmra.mrb[86].mxu1 %v10873_v36  ;;  %v12469_v24 = vld [vmem:[#allocation16_spill] sm:$0xff] }
 0x4b9   :  { %4881 = vmatprep.mubr.f32.mxu0 %v12084_v42  ;;  %3297 = vst.msk [vmem:[#allocation9 + $0x118] sm:$0xff] %vm3262_vm1, %v3240_v61  ;;  %v7769_v41 = vadd.f32 %v3139_v55, %v12465_v33  ;;  %6136 = vmatprep.mubr.f32.mxu1 %v12084_v42  ;;  %v12470_v61 = vld [vmem:[#allocation41_spill] sm:$0xff]  ;;  %v12518_v36 = vld [vmem:[#allocation104_spill] sm:$0xff] }
 0x4ba   :  { %v3241_v34 = vadd.f32 -2.117904, %v7768_v4  ;;  %v12471_v4 = vld [vmem:[#allocation35_spill] sm:$0xff] }
 0x4bb   :  { %v3242_v52 = vadd.f32 -2.117904, %v7769_v41  ;;  %v3144_v8 = vpop.f32.mrb[54].mxu1 }
 0x4bc   :  { %4883 = vmatmul.mubr.f32.gmra.mrb[92].mxu0 %v12466_v9  ;;  %3298 = vst [vmem:[#allocation9 + $0x120] sm:$0xff] %v3241_v34  ;;  %v7770_v3 = vadd.f32 %v3144_v8, %v12467_v28  ;;  %v3146_v0 = vpop.f32.mrb[55].mxu1  ;;  %6138 = vmatmul.mubr.f32.gmra.mrb[88].mxu1 %v10889_v57  ;;  %v12473_v8 = vld [vmem:[#allocation51_spill] sm:$0xff]  ;;  %v12517_v57 = vld [vmem:[#allocation53_spill] sm:$0xff] }
 0x4bd   :  { %4888 = vmatprep.mubr.f32.mxu0 %v12084_v42  ;;  %3299 = vst.msk [vmem:[#allocation9 + $0x128] sm:$0xff] %vm3262_vm1, %v3242_v52  ;;  %v7771_v44 = vadd.f32 %v3146_v0, %v12468_v35  ;;  %6143 = vmatprep.mubr.f32.mxu1 %v12084_v42  ;;  %v12472_v52 = vld [vmem:[#allocation17_spill] sm:$0xff] }
 0x4be   :  { %v3243_v17 = vadd.f32 -2.117904, %v7770_v3  ;;  %v12474_v0 = vld [vmem:[#allocation45_spill] sm:$0xff] }
 0x4bf   :  { %v3244_v30 = vadd.f32 -2.117904, %v7771_v44  ;;  %v3151_v11 = vpop.f32.mrb[0].mxu1 }
 0x4c0   :  { %4890 = vmatmul.mubr.f32.gmra.mrb[94].mxu0 %v12469_v24  ;;  %3300 = vst [vmem:[#allocation9 + $0x130] sm:$0xff] %v3243_v17  ;;  %v7772_v50 = vadd.f32 %v3151_v11, %v12470_v61  ;;  %v3153_v16 = vpop.f32.mrb[1].mxu1  ;;  %6145 = vmatmul.mubr.f32.gmra.mrb[90].mxu1 %v10905_v49  ;;  %v12475_v11 = vld [vmem:[#allocation20_spill] sm:$0xff]  ;;  %v12476_v61 = vld [vmem:[#allocation49_spill] sm:$0xff]  ;;  %v12516_v49 = vld [vmem:[#allocation103_spill] sm:$0xff] }
 0x4c1   :  { %4895 = vmatprep.mubr.f32.mxu0 %v12084_v42  ;;  %3301 = vst.msk [vmem:[#allocation9 + $0x138] sm:$0xff] %vm3262_vm1, %v3244_v30  ;;  %v7773_v55 = vadd.f32 %v3153_v16, %v12471_v4  ;;  %6150 = vmatprep.mubr.f32.mxu1 %v12084_v42  ;;  %v12477_v4 = vld [vmem:[#allocation44_spill] sm:$0xff] }
 0x4c2   :  { %v3245_v33 = vadd.f32 -2.117904, %v7772_v50 }
 0x4c3   :  { %v3246_v41 = vadd.f32 -2.117904, %v7773_v55  ;;  %v3158_v34 = vpop.f32.mrb[2].mxu1 }
 0x4c4   :  { %4897 = vmatmul.mubr.f32.gmra.mrb[96].mxu0 %v12472_v52  ;;  %3302 = vst [vmem:[#allocation9 + $0x140] sm:$0xff] %v3245_v33  ;;  %v7774_v28 = vadd.f32 %v3158_v34, %v12473_v8  ;;  %v3160_v3 = vpop.f32.mrb[3].mxu1  ;;  %6152 = vmatmul.mubr.f32.gmra.mrb[92].mxu1 %v10911_v58  ;;  %v12478_v8 = vld [vmem:[#allocation36_spill] sm:$0xff]  ;;  %v12515_v58 = vld [vmem:[#allocation59_spill] sm:$0xff] }
 0x4c5   :  { %4902 = vmatprep.mubr.f32.mxu0 %v12084_v42  ;;  %3303 = vst.msk [vmem:[#allocation9 + $0x148] sm:$0xff] %vm3262_vm1, %v3246_v41  ;;  %v7775_v35 = vadd.f32 %v3160_v3, %v12474_v0  ;;  %6157 = vmatprep.mubr.f32.mxu1 %v12084_v42 }
 0x4c6   :  { %v3247_v44 = vadd.f32 -2.117904, %v7774_v28  ;;  %v12479_v28 = vld [vmem:[#allocation43_spill] sm:$0xff] }
 0x4c7   :  { %v3248_v17 = vadd.f32 -2.117904, %v7775_v35  ;;  %v3165_v30 = vpop.f32.mrb[4].mxu1  ;;  %v12480_v35 = vld [vmem:[#allocation76_spill] sm:$0xff] }
 0x4c8   :  { %4904 = vmatmul.mubr.f32.gmra.mrb[98].mxu0 %v12475_v11  ;;  %3304 = vst [vmem:[#allocation9 + $0x150] sm:$0xff] %v3247_v44  ;;  %v7776_v50 = vadd.f32 %v3165_v30, %v12476_v61  ;;  %v3167_v16 = vpop.f32.mrb[5].mxu1  ;;  %6159 = vmatmul.mubr.f32.gmra.mrb[94].mxu1 %v10928_v45  ;;  %v12514_v45 = vld [vmem:[#allocation102_spill] sm:$0xff] }
 0x4c9   :  { %4909 = vmatprep.mubr.f32.mxu0 %v12084_v42  ;;  %3305 = vst.msk [vmem:[#allocation9 + $0x158] sm:$0xff] %vm3262_vm1, %v3248_v17  ;;  %v7777_v55 = vadd.f32 %v3167_v16, %v12477_v4  ;;  %6164 = vmatprep.mubr.f32.mxu1 %v12084_v42  ;;  %v12482_v16 = vld [vmem:[#allocation77_spill] sm:$0xff] }
 0x4ca   :  { %v3249_v33 = vadd.f32 -2.117904, %v7776_v50  ;;  %v12481_v50 = vld [vmem:[#allocation39_spill] sm:$0xff] }
 0x4cb   :  { %v3250_v41 = vadd.f32 -2.117904, %v7777_v55  ;;  %v3172_v34 = vpop.f32.mrb[6].mxu1 }
 0x4cc   :  { %4911 = vmatmul.mubr.f32.gmra.mrb[100].mxu0 %v12478_v8  ;;  %3306 = vst [vmem:[#allocation9 + $0x160] sm:$0xff] %v3249_v33  ;;  %v7778_v3 = vadd.f32 %v3172_v34, %v12479_v28  ;;  %v3174_v0 = vpop.f32.mrb[7].mxu1  ;;  %6166 = vmatmul.mubr.f32.gmra.mrb[96].mxu1 %v10947_v2  ;;  %v12483_v33 = vld [vmem:[#allocation78_spill] sm:$0xff]  ;;  %v12513_v2 = vld [vmem:[#allocation69_spill] sm:$0xff] }
 0x4cd   :  { %4916 = vmatprep.mubr.f32.mxu0 %v12084_v42  ;;  %3307 = vst.msk [vmem:[#allocation9 + $0x168] sm:$0xff] %vm3262_vm1, %v3250_v41  ;;  %v7779_v44 = vadd.f32 %v3174_v0, %v12480_v35  ;;  %6171 = vmatprep.mubr.f32.mxu1 %v12084_v42  ;;  %v12484_v0 = vld [vmem:[#allocation38_spill] sm:$0xff]  ;;  %v12485_v35 = vld [vmem:[#allocation23_spill] sm:$0xff] }
 0x4ce   :  { %v3251_v17 = vadd.f32 -2.117904, %v7778_v3 }
 0x4cf   :  { %v3252_v30 = vadd.f32 -2.117904, %v7779_v44  ;;  %v3179_v61 = vpop.f32.mrb[8].mxu1 }
 0x4d0   :  { %4918 = vmatmul.mubr.f32.gmra.mrb[102].mxu0 %v12481_v50  ;;  %3308 = vst [vmem:[#allocation9 + $0x170] sm:$0xff] %v3251_v17  ;;  %v7780_v4 = vadd.f32 %v3179_v61, %v12482_v16  ;;  %v3181_v55 = vpop.f32.mrb[9].mxu1  ;;  %6173 = vmatmul.mubr.f32.gmra.mrb[98].mxu1 %v10961_v47  ;;  %v12512_v47 = vld [vmem:[#allocation100_spill] sm:$0xff] }
 0x4d1   :  { %4923 = vmatprep.mubr.f32.mxu0 %v12084_v42  ;;  %3309 = vst.msk [vmem:[#allocation9 + $0x178] sm:$0xff] %vm3262_vm1, %v3252_v30  ;;  %v7781_v41 = vadd.f32 %v3181_v55, %v12483_v33  ;;  %6178 = vmatprep.mubr.f32.mxu1 %v12084_v42  ;;  %v12486_v30 = vld [vmem:[#allocation25_spill] sm:$0xff]  ;;  %v12487_v33 = vld [vmem:[#allocation79_spill] sm:$0xff] }
 0x4d2   :  { %v3253_v34 = vadd.f32 -2.117904, %v7780_v4 }
 0x4d3   :  { %v3254_v28 = vadd.f32 -2.117904, %v7781_v41  ;;  %v3186_v3 = vpop.f32.mrb[10].mxu1  ;;  %v12488_v41 = vld [vmem:[#allocation27_spill] sm:$0xff] }
 0x4d4   :  { %4925 = vmatmul.mubr.f32.gmra.mrb[104].mxu0 %v12484_v0  ;;  %3310 = vst [vmem:[#allocation9 + $0x180] sm:$0xff] %v3253_v34  ;;  %v7782_v44 = vadd.f32 %v3186_v3, %v12485_v35  ;;  %v3188_v17 = vpop.f32.mrb[11].mxu1  ;;  %6180 = vmatmul.mubr.f32.gmra.mrb[100].mxu1 %v10975_v51  ;;  %v12511_v51 = vld [vmem:[#allocation90_spill] sm:$0xff] }
 0x4d5   :  { %4930 = vmatprep.mubr.f32.mxu0 %v12084_v42  ;;  %3311 = vst.msk [vmem:[#allocation9 + $0x188] sm:$0xff] %vm3262_vm1, %v3254_v28  ;;  %v7783_v61 = vadd.f32 %v3188_v17, %v12486_v30  ;;  %6185 = vmatprep.mubr.f32.mxu1 %v12084_v42  ;;  %v12489_v28 = vld [vmem:[#allocation29_spill] sm:$0xff] }
 0x4d6   :  { %v3255_v16 = vadd.f32 -2.117904, %v7782_v44 }
 0x4d7   :  { %v3256_v4 = vadd.f32 -2.117904, %v7783_v61  ;;  %v3193_v55 = vpop.f32.mrb[12].mxu1  ;;  %v12490_v61 = vld [vmem:[#allocation82_spill] sm:$0xff] }
 0x4d8   :  { %4932 = vmatmul.mubr.f32.gmra.mrb[106].mxu0 %v12487_v33  ;;  %3312 = vst [vmem:[#allocation9 + $0x190] sm:$0xff] %v3255_v16  ;;  %v7784_v34 = vadd.f32 %v3193_v55, %v12488_v41  ;;  %v3195_v3 = vpop.f32.mrb[13].mxu1  ;;  %6187 = vmatmul.mubr.f32.gmra.mrb[102].mxu1 %v10981_v39  ;;  %v12491_v16 = vld [vmem:[#allocation31_spill] sm:$0xff]  ;;  %v12509_v39 = vld [vmem:[#allocation85_spill] sm:$0xff] }
 0x4d9   :  { %4937 = vmatprep.mubr.f32.mxu0 %v12084_v42  ;;  %3313 = vst.msk [vmem:[#allocation9 + $0x198] sm:$0xff] %vm3262_vm1, %v3256_v4  ;;  %v7785_v35 = vadd.f32 %v3195_v3, %v12489_v28  ;;  %6192 = vmatprep.mubr.f32.mxu1 %v12084_v42  ;;  %v12492_v4 = vld [vmem:[#allocation42_spill] sm:$0xff]  ;;  %v12493_v28 = vld [vmem:[#allocation84_spill] sm:$0xff] }
 0x4da   :  { %v3257_v17 = vadd.f32 -2.117904, %v7784_v34 }
 0x4db   :  { %v3258_v44 = vadd.f32 -2.117904, %v7785_v35  ;;  %v3200_v30 = vpop.f32.mrb[14].mxu1  ;;  %v12494_v35 = vld [vmem:[#allocation86_spill] sm:$0xff] }
 0x4dc   :  { %4939 = vmatmul.mubr.f32.gmra.mrb[108].mxu0 %v12490_v61  ;;  %3314 = vst [vmem:[#allocation9 + $0x1a0] sm:$0xff] %v3257_v17  ;;  %v7786_v62 = vadd.f32 %v3200_v30, %v12491_v16  ;;  %v3202_v55 = vpop.f32.mrb[15].mxu1  ;;  %6194 = vmatmul.mubr.f32.gmra.mrb[104].mxu1 %v11003_v26  ;;  %v12496_v17 = vld [vmem:[#allocation89_spill] sm:$0xff]  ;;  %v12498_v30 = vld [vmem:[#allocation56_spill] sm:$0xff]  ;;  %v12499_v16 = vld [vmem:[#allocation66_spill] sm:$0xff] }
 0x4dd   :  { %4944 = vmatprep.mubr.f32.mxu0 %v12084_v42  ;;  %3315 = vst.msk [vmem:[#allocation9 + $0x1a8] sm:$0xff] %vm3262_vm1, %v3258_v44  ;;  %v7787_v41 = vadd.f32 %v3202_v55, %v12492_v4  ;;  %6199 = vmatprep.mubr.f32.mxu1 %v12084_v42  ;;  %v12497_v44 = vld [vmem:[#allocation34_spill] sm:$0xff]  ;;  %v12500_v55 = vld [vmem:[#allocation92_spill] sm:$0xff]  ;;  %v12501_v4 = vld [vmem:[#allocation37_spill] sm:$0xff] }
 0x4de   :  { %v3259_v3 = vadd.f32 -2.117904, %v7786_v62  ;;  %v12495_v62 = vld [vmem:[#allocation88_spill] sm:$0xff]  ;;  %v12508_v26 = vld [vmem:[#allocation97_spill] sm:$0xff] }
 0x4df   :  { %v3260_v34 = vadd.f32 -2.117904, %v7787_v41  ;;  %v12502_v41 = vld [vmem:[#allocation64_spill] sm:$0xff] }
 0x4e0   :  { %4946 = vmatmul.mubr.f32.gmra.mrb[110].mxu0 %v12493_v28  ;;  %3316 = vst [vmem:[#allocation9 + $0x1b0] sm:$0xff] %v3259_v3  ;;  %6201 = vmatmul.mubr.f32.gmra.mrb[106].mxu1 %v11017_v13  ;;  %v12503_v3 = vld [vmem:[#allocation62_spill] sm:$0xff]  ;;  %v12507_v13 = vld [vmem:[#allocation81_spill] sm:$0xff] }
 0x4e1   :  { %4951 = vmatprep.mubr.f32.mxu0 %v12084_v42  ;;  %3317 = vst.msk [vmem:[#allocation9 + $0x1b8] sm:$0xff] %vm3262_vm1, %v3260_v34  ;;  %6206 = vmatprep.mubr.f32.mxu1 %v12084_v42  ;;  %v12504_v34 = vld [vmem:[#allocation93_spill] sm:$0xff] }
 0x4e4   :  { %4953 = vmatmul.mubr.f32.gmra.mrb[112].mxu0 %v12494_v35  ;;  %6208 = vmatmul.mubr.f32.gmra.mrb[108].mxu1 %v11031_v54  ;;  %v12506_v54 = vld [vmem:[#allocation95_spill] sm:$0xff] }
 0x4e5   :  { %4958 = vmatprep.mubr.f32.mxu0 %v12084_v42  ;;  %6213 = vmatprep.mubr.f32.mxu1 %v12084_v42 }
 0x4e8   :  { %4960 = vmatmul.mubr.f32.gmra.mrb[114].mxu0 %v12495_v62  ;;  %6215 = vmatmul.mubr.f32.gmra.mrb[110].mxu1 %v11045_v12  ;;  %v12505_v12 = vld [vmem:[#allocation80_spill] sm:$0xff] }
 0x4e9   :  { %4965 = vmatprep.mubr.f32.mxu0 %v12084_v42  ;;  %6301 = vmatprep.mubr.f32.mxu1 %v12084_v42 }
 0x4ec   :  { %4967 = vmatmul.mubr.f32.gmra.mrb[116].mxu0 %v12496_v17  ;;  %6304 = vmatmul.mubr.f32.vlgmr.msra.gmra.mrb[56].mxu1 %v12497_v44 }
 0x4ed   :  { %4972 = vmatprep.mubr.f32.mxu0 %v12084_v42  ;;  %7707 = vmatpush1.bf16.msra.mxu1 %v12498_v30 }
 0x4ee   :  { %6309 = vmatprep.mubr.f32.mxu1 %v12084_v42  ;;  %7709 = vmatprep.subr.bf16.mxu1 %v12499_v16 }
 0x4f0   :  { %4974 = vmatmul.mubr.f32.gmra.mrb[118].mxu0 %v12500_v55  ;;  %6312 = vmatmul.mubr.f32.gmra.mrb[58].mxu1 %v12501_v4 }
 0x4f1   :  { %4979 = vmatprep.mubr.f32.mxu0 %v12084_v42  ;;  %7711 = vmatpush1.bf16.msra.mxu1 %v12502_v41 }
 0x4f2   :  { %6317 = vmatprep.mubr.f32.mxu1 %v12084_v42  ;;  %7713 = vmatprep.subr.bf16.mxu1 %v12503_v3  ;;  %v12510_v3 = vld [vmem:[#allocation98_spill] sm:$0xff] }
 0x4f4   :  { %4981 = vmatmul.mubr.f32.gmra.mrb[120].mxu0 %v12504_v34  ;;  %6320 = vmatmul.mubr.f32.gmra.mrb[60].mxu1 %v12505_v12 }
 0x4f5   :  { %4986 = vmatprep.mubr.f32.mxu0 %v12084_v42  ;;  %6325 = vmatprep.mubr.f32.mxu1 %v12084_v42 }
 0x4f8   :  { %4988 = vmatmul.mubr.f32.gmra.mrb[122].mxu0 %v12506_v54  ;;  %6328 = vmatmul.mubr.f32.gmra.mrb[62].mxu1 %v12507_v13 }
 0x4f9   :  { %4993 = vmatprep.mubr.f32.mxu0 %v12084_v42  ;;  %6333 = vmatprep.mubr.f32.mxu1 %v12084_v42 }
 0x4fc   :  { %4995 = vmatmul.mubr.f32.gmra.mrb[124].mxu0 %v12508_v26  ;;  %6336 = vmatmul.mubr.f32.gmra.mrb[64].mxu1 %v12509_v39 }
 0x4fd   :  { %5000 = vmatprep.mubr.f32.mxu0 %v12084_v42  ;;  %6341 = vmatprep.mubr.f32.mxu1 %v12084_v42 }
 0x500   :  { %5002 = vmatmul.mubr.f32.gmra.mrb[126].mxu0 %v12510_v3  ;;  %6344 = vmatmul.mubr.f32.gmra.mrb[66].mxu1 %v12511_v51 }
 0x501   :  { %5007 = vmatprep.mubr.f32.mxu0 %v12084_v42  ;;  %6349 = vmatprep.mubr.f32.mxu1 %v12084_v42 }
 0x504   :  { %5009 = vmatmul.mubr.f32.gmra.mrb[128].mxu0 %v12512_v47  ;;  %6352 = vmatmul.mubr.f32.gmra.mrb[68].mxu1 %v12513_v2 }
 0x505   :  { %5014 = vmatprep.mubr.f32.mxu0 %v12084_v42  ;;  %6357 = vmatprep.mubr.f32.mxu1 %v12084_v42 }
 0x508   :  { %5016 = vmatmul.mubr.f32.gmra.mrb[130].mxu0 %v12514_v45  ;;  %6360 = vmatmul.mubr.f32.gmra.mrb[70].mxu1 %v12515_v58 }
 0x509   :  { %5021 = vmatprep.mubr.f32.mxu0 %v12084_v42  ;;  %6365 = vmatprep.mubr.f32.mxu1 %v12084_v42 }
 0x50c   :  { %5023 = vmatmul.mubr.f32.gmra.mrb[132].mxu0 %v12516_v49  ;;  %6368 = vmatmul.mubr.f32.gmra.mrb[72].mxu1 %v12517_v57 }
 0x50d   :  { %5028 = vmatprep.mubr.f32.mxu0 %v12084_v42  ;;  %6373 = vmatprep.mubr.f32.mxu1 %v12084_v42 }
 0x510   :  { %5030 = vmatmul.mubr.f32.gmra.mrb[134].mxu0 %v12518_v36  ;;  %6376 = vmatmul.mubr.f32.gmra.mrb[74].mxu1 %v12519_v56 }
 0x511   :  { %5108 = vmatprep.mubr.f32.mxu0 %v12084_v42  ;;  %6381 = vmatprep.mubr.f32.mxu1 %v12084_v42 }
 0x514   :  { %5110 = vmatmul.mubr.f32.vlgmr.msra.gmra.mrb[80].mxu0 %v12441_v48  ;;  %6384 = vmatmul.mubr.f32.gmra.mrb[76].mxu1 %v12520_v15  ;;  %v12522_v48 = vld [vmem:[#allocation127_spill] sm:$0xff] }
 0x515   :  { %5115 = vmatprep.mubr.f32.mxu0 %v12084_v42  ;;  %6389 = vmatprep.mubr.f32.mxu1 %v12084_v42 }
 0x518   :  { %5117 = vmatmul.mubr.f32.gmra.mrb[82].mxu0 %v12447_v27  ;;  %6392 = vmatmul.mubr.f32.gmra.mrb[78].mxu1 %v12521_v19  ;;  %v12523_v27 = vld [vmem:[#allocation54_spill] sm:$0xff] }
 0x519   :  { %5122 = vmatprep.mubr.f32.mxu0 %v12084_v42  ;;  %6397 = vmatprep.mubr.f32.mxu1 %v12084_v42 }
 0x51c   :  { %5124 = vmatmul.mubr.f32.gmra.mrb[84].mxu0 %v12452_v53  ;;  %6400 = vmatmul.mubr.f32.gmra.mrb[80].mxu1 %v10846_v25  ;;  %v12524_v53 = vld [vmem:[#allocation128_spill] sm:$0xff] }
 0x51d   :  { %5129 = vmatprep.mubr.f32.mxu0 %v12084_v42  ;;  %6405 = vmatprep.mubr.f32.mxu1 %v12084_v42 }
 0x520   :  { %5131 = vmatmul.mubr.f32.gmra.mrb[86].mxu0 %v12456_v40  ;;  %6408 = vmatmul.mubr.f32.gmra.mrb[82].mxu1 %v10852_v32  ;;  %v12525_v40 = vld [vmem:[#allocation131_spill] sm:$0xff] }
 0x521   :  { %5136 = vmatprep.mubr.f32.mxu0 %v12084_v42  ;;  %6413 = vmatprep.mubr.f32.mxu1 %v12084_v42 }
 0x524   :  { %5138 = vmatmul.mubr.f32.gmra.mrb[88].mxu0 %v12460_v60  ;;  %6416 = vmatmul.mubr.f32.gmra.mrb[84].mxu1 %v12522_v48  ;;  %v12526_v60 = vld [vmem:[#allocation132_spill] sm:$0xff] }
 0x525   :  { %5143 = vmatprep.mubr.f32.mxu0 %v12084_v42  ;;  %6421 = vmatprep.mubr.f32.mxu1 %v12084_v42 }
 0x528   :  { %5145 = vmatmul.mubr.f32.gmra.mrb[90].mxu0 %v12463_v20  ;;  %6424 = vmatmul.mubr.f32.gmra.mrb[86].mxu1 %v12523_v27  ;;  %v12527_v20 = vld [vmem:[#allocation134_spill] sm:$0xff] }
 0x529   :  { %5150 = vmatprep.mubr.f32.mxu0 %v12084_v42  ;;  %6429 = vmatprep.mubr.f32.mxu1 %v12084_v42 }
 0x52c   :  { %5152 = vmatmul.mubr.f32.gmra.mrb[92].mxu0 %v12466_v9  ;;  %6432 = vmatmul.mubr.f32.gmra.mrb[88].mxu1 %v12524_v53  ;;  %v12528_v9 = vld [vmem:[#allocation136_spill] sm:$0xff] }
 0x52d   :  { %5157 = vmatprep.mubr.f32.mxu0 %v12084_v42  ;;  %6437 = vmatprep.mubr.f32.mxu1 %v12084_v42 }
 0x530   :  { %5159 = vmatmul.mubr.f32.gmra.mrb[94].mxu0 %v12469_v24  ;;  %6440 = vmatmul.mubr.f32.gmra.mrb[90].mxu1 %v12525_v40  ;;  %v12529_v24 = vld [vmem:[#allocation138_spill] sm:$0xff] }
 0x531   :  { %5164 = vmatprep.mubr.f32.mxu0 %v12084_v42  ;;  %6445 = vmatprep.mubr.f32.mxu1 %v12084_v42 }
 0x534   :  { %5166 = vmatmul.mubr.f32.gmra.mrb[96].mxu0 %v12472_v52  ;;  %6448 = vmatmul.mubr.f32.gmra.mrb[92].mxu1 %v12526_v60  ;;  %v12530_v52 = vld [vmem:[#allocation141_spill] sm:$0xff] }
 0x535   :  { %5171 = vmatprep.mubr.f32.mxu0 %v12084_v42  ;;  %6453 = vmatprep.mubr.f32.mxu1 %v12084_v42 }
 0x538   :  { %5173 = vmatmul.mubr.f32.gmra.mrb[98].mxu0 %v12475_v11  ;;  %6456 = vmatmul.mubr.f32.gmra.mrb[94].mxu1 %v12527_v20  ;;  %v12531_v11 = vand.u32 4294901760, %v12497_v44  ;;  %v12560_v44 = vand.u32 4294901760, %v11043_v14 }
 0x539   :  { %5178 = vmatprep.mubr.f32.mxu0 %v12084_v42  ;;  %6461 = vmatprep.mubr.f32.mxu1 %v12084_v42 }
 0x53c   :  { %5180 = vmatmul.mubr.f32.gmra.mrb[100].mxu0 %v12478_v8  ;;  %6464 = vmatmul.mubr.f32.gmra.mrb[96].mxu1 %v12528_v9  ;;  %v12532_v8 = vld [vmem:[#allocation63_spill] sm:$0xff] }
 0x53d   :  { %5185 = vmatprep.mubr.f32.mxu0 %v12084_v42  ;;  %6469 = vmatprep.mubr.f32.mxu1 %v12084_v42 }
 0x540   :  { %5187 = vmatmul.mubr.f32.gmra.mrb[102].mxu0 %v12481_v50  ;;  %6472 = vmatmul.mubr.f32.gmra.mrb[98].mxu1 %v12529_v24  ;;  %v12533_v50 = vld [vmem:[#allocation72_spill] sm:$0xff] }
 0x541   :  { %5192 = vmatprep.mubr.f32.mxu0 %v12084_v42  ;;  %6477 = vmatprep.mubr.f32.mxu1 %v12084_v42 }
 0x544   :  { %5194 = vmatmul.mubr.f32.gmra.mrb[104].mxu0 %v12484_v0  ;;  %6480 = vmatmul.mubr.f32.gmra.mrb[100].mxu1 %v12530_v52  ;;  %v12534_v0 = vand.u32 4294901760, %v12501_v4 }
 0x545   :  { %5199 = vmatprep.mubr.f32.mxu0 %v12084_v42  ;;  %6485 = vmatprep.mubr.f32.mxu1 %v12084_v42 }
 0x548   :  { %5201 = vmatmul.mubr.f32.gmra.mrb[106].mxu0 %v12487_v33  ;;  %6488 = vmatmul.mubr.f32.gmra.mrb[102].mxu1 %v10996_v21  ;;  %v12535_v33 = vld [vmem:[#allocation71_spill] sm:$0xff] }
 0x549   :  { %5206 = vmatprep.mubr.f32.mxu0 %v12084_v42  ;;  %6493 = vmatprep.mubr.f32.mxu1 %v12084_v42 }
 0x54c   :  { %5208 = vmatmul.mubr.f32.gmra.mrb[108].mxu0 %v12490_v61  ;;  %6496 = vmatmul.mubr.f32.gmra.mrb[104].mxu1 %v11015_v46  ;;  %v12536_v61 = vand.u32 4294901760, %v12505_v12  ;;  %v12554_v12 = vand.u32 4294901760, %v12528_v9 }
 0x54d   :  { %5213 = vmatprep.mubr.f32.mxu0 %v12084_v42  ;;  %6501 = vmatprep.mubr.f32.mxu1 %v12084_v42 }
 0x550   :  { %5215 = vmatmul.mubr.f32.gmra.mrb[110].mxu0 %v12493_v28  ;;  %6504 = vmatmul.mubr.f32.gmra.mrb[106].mxu1 %v11029_v5  ;;  %v12537_v28 = vand.u32 4294901760, %v12507_v13  ;;  %v12541_v13 = vand.u32 4294901760, %v12515_v58  ;;  %v12544_v58 = vand.u32 4294901760, %v12520_v15  ;;  %v12556_v15 = vand.u32 4294901760, %v12530_v52 }
 0x551   :  { %5220 = vmatprep.mubr.f32.mxu0 %v12084_v42  ;;  %6509 = vmatprep.mubr.f32.mxu1 %v12084_v42 }
 0x554   :  { %5222 = vmatmul.mubr.f32.gmra.mrb[112].mxu0 %v12494_v35  ;;  %6512 = vmatmul.mubr.f32.gmra.mrb[108].mxu1 %v11043_v14  ;;  %v12557_v35 = vand.u32 4294901760, %v10996_v21  ;;  %v12561_v21 = vand.u32 4294901760, %v11056_v10 }
 0x555   :  { %5227 = vmatprep.mubr.f32.mxu0 %v12084_v42  ;;  %6517 = vmatprep.mubr.f32.mxu1 %v12084_v42 }
 0x558   :  { %5229 = vmatmul.mubr.f32.gmra.mrb[114].mxu0 %v12495_v62  ;;  %6520 = vmatmul.mubr.f32.gmra.mrb[110].mxu1 %v11056_v10  ;;  %v12558_v62 = vand.u32 4294901760, %v11015_v46 }
 0x559   :  { %5234 = vmatprep.mubr.f32.mxu0 %v12084_v42  ;;  %6598 = vmatprep.mubr.f32.mxu1 %v12084_v42 }
 0x55c   :  { %5236 = vmatmul.mubr.f32.gmra.mrb[116].mxu0 %v12496_v17  ;;  %6602 = vmatmul.mubr.f32.vlgmr.msra.gmra.mrb[56].mxu1 %v12531_v11  ;;  %v12559_v17 = vand.u32 4294901760, %v11029_v5 }
 0x55d   :  { %5241 = vmatprep.mubr.f32.mxu0 %v12084_v42  ;;  %7715 = vmatpush1.bf16.msra.mxu1 %v12532_v8 }
 0x55e   :  { %6607 = vmatprep.mubr.f32.mxu1 %v12084_v42  ;;  %7717 = vmatprep.subr.bf16.mxu1 %v12533_v50 }
 0x560   :  { %5243 = vmatmul.mubr.f32.gmra.mrb[118].mxu0 %v12500_v55  ;;  %6611 = vmatmul.mubr.f32.gmra.mrb[58].mxu1 %v12534_v0 }
 0x561   :  { %5248 = vmatprep.mubr.f32.mxu0 %v12084_v42  ;;  %7719 = vmatpush1.bf16.msra.mxu1 %v12535_v33  ;;  %v12562_v33 = vld [vmem:[#allocation124_spill] sm:$0xff] }
 0x562   :  { %6616 = vmatprep.mubr.f32.mxu1 %v12084_v42  ;;  %7721 = vmatprep.subr.bf16.mxu1 %v12413_v7  ;;  %v12538_v7 = vand.u32 4294901760, %v12509_v39  ;;  %v12553_v39 = vand.u32 4294901760, %v12527_v20 }
 0x564   :  { %5250 = vmatmul.mubr.f32.gmra.mrb[120].mxu0 %v12504_v34  ;;  %6620 = vmatmul.mubr.f32.gmra.mrb[60].mxu1 %v12536_v61 }
 0x565   :  { %5255 = vmatprep.mubr.f32.mxu0 %v12084_v42  ;;  %6625 = vmatprep.mubr.f32.mxu1 %v12084_v42 }
 0x568   :  { %5257 = vmatmul.mubr.f32.gmra.mrb[122].mxu0 %v12506_v54  ;;  %6629 = vmatmul.mubr.f32.gmra.mrb[62].mxu1 %v12537_v28  ;;  %v12539_v54 = vand.u32 4294901760, %v12511_v51  ;;  %v12549_v51 = vand.u32 4294901760, %v12523_v27 }
 0x569   :  { %5262 = vmatprep.mubr.f32.mxu0 %v12084_v42  ;;  %6634 = vmatprep.mubr.f32.mxu1 %v12084_v42 }
 0x56c   :  { %5264 = vmatmul.mubr.f32.gmra.mrb[124].mxu0 %v12508_v26  ;;  %6638 = vmatmul.mubr.f32.gmra.mrb[64].mxu1 %v12538_v7  ;;  %v12540_v26 = vand.u32 4294901760, %v12513_v2  ;;  %v12543_v2 = vand.u32 4294901760, %v12519_v56  ;;  %v12547_v56 = vand.u32 4294901760, %v10852_v32  ;;  %v12551_v32 = vand.u32 4294901760, %v12525_v40 }
 0x56d   :  { %5269 = vmatprep.mubr.f32.mxu0 %v12084_v42  ;;  %6643 = vmatprep.mubr.f32.mxu1 %v12084_v42 }
 0x570   :  { %5271 = vmatmul.mubr.f32.gmra.mrb[126].mxu0 %v12510_v3  ;;  %6647 = vmatmul.mubr.f32.gmra.mrb[66].mxu1 %v12539_v54 }
 0x571   :  { %5276 = vmatprep.mubr.f32.mxu0 %v12084_v42  ;;  %6652 = vmatprep.mubr.f32.mxu1 %v12084_v42 }
 0x574   :  { %5278 = vmatmul.mubr.f32.gmra.mrb[128].mxu0 %v12512_v47  ;;  %6656 = vmatmul.mubr.f32.gmra.mrb[68].mxu1 %v12540_v26  ;;  %v12542_v47 = vand.u32 4294901760, %v12517_v57  ;;  %v12546_v57 = vand.u32 4294901760, %v10846_v25  ;;  %v12550_v25 = vand.u32 4294901760, %v12524_v53  ;;  %v12563_v26 = vld [vmem:[#allocation125_spill] sm:$0xff] }
 0x575   :  { %5283 = vmatprep.mubr.f32.mxu0 %v12084_v42  ;;  %6661 = vmatprep.mubr.f32.mxu1 %v12084_v42 }
 0x578   :  { %5285 = vmatmul.mubr.f32.gmra.mrb[130].mxu0 %v12514_v45  ;;  %6665 = vmatmul.mubr.f32.gmra.mrb[70].mxu1 %v12541_v13  ;;  %v12552_v45 = vand.u32 4294901760, %v12526_v60 }
 0x579   :  { %5290 = vmatprep.mubr.f32.mxu0 %v12084_v42  ;;  %6670 = vmatprep.mubr.f32.mxu1 %v12084_v42 }
 0x57c   :  { %5292 = vmatmul.mubr.f32.gmra.mrb[132].mxu0 %v12516_v49  ;;  %6674 = vmatmul.mubr.f32.gmra.mrb[72].mxu1 %v12542_v47  ;;  %v12545_v49 = vand.u32 4294901760, %v12521_v19  ;;  %v12555_v19 = vand.u32 4294901760, %v12529_v24 }
 0x57d   :  { %5297 = vmatprep.mubr.f32.mxu0 %v12084_v42  ;;  %6679 = vmatprep.mubr.f32.mxu1 %v12084_v42 }
 0x580   :  { %5299 = vmatmul.mubr.f32.gmra.mrb[134].mxu0 %v12518_v36  ;;  %6683 = vmatmul.mubr.f32.gmra.mrb[74].mxu1 %v12543_v2  ;;  %v12548_v36 = vand.u32 4294901760, %v12522_v48 }
 0x581   :  { %6688 = vmatprep.mubr.f32.mxu1 %v12084_v42 }
 0x584   :  { %6692 = vmatmul.mubr.f32.gmra.mrb[76].mxu1 %v12544_v58 }
 0x585   :  { %6697 = vmatprep.mubr.f32.mxu1 %v12084_v42 }
 0x588   :  { %6701 = vmatmul.mubr.f32.gmra.mrb[78].mxu1 %v12545_v49  ;;  %v12564_v49 = vld [vmem:[#allocation126_spill] sm:$0xff] }
 0x589   :  { %6706 = vmatprep.mubr.f32.mxu1 %v12084_v42 }
 0x58c   :  { %6710 = vmatmul.mubr.f32.gmra.mrb[80].mxu1 %v12546_v57 }
 0x58d   :  { %6715 = vmatprep.mubr.f32.mxu1 %v12084_v42 }
 0x590   :  { %6719 = vmatmul.mubr.f32.gmra.mrb[82].mxu1 %v12547_v56 }
 0x591   :  { %6724 = vmatprep.mubr.f32.mxu1 %v12084_v42 }
 0x594   :  { %6728 = vmatmul.mubr.f32.gmra.mrb[84].mxu1 %v12548_v36 }
 0x595   :  { %6733 = vmatprep.mubr.f32.mxu1 %v12084_v42 }
 0x598   :  { %6737 = vmatmul.mubr.f32.gmra.mrb[86].mxu1 %v12549_v51 }
 0x599   :  { %6742 = vmatprep.mubr.f32.mxu1 %v12084_v42 }
 0x59c   :  { %6746 = vmatmul.mubr.f32.gmra.mrb[88].mxu1 %v12550_v25  ;;  %v12565_v25 = vld [vmem:[#allocation47_spill] sm:$0xff] }
 0x59d   :  { %6751 = vmatprep.mubr.f32.mxu1 %v12084_v42 }
 0x5a0   :  { %6755 = vmatmul.mubr.f32.gmra.mrb[90].mxu1 %v12551_v32 }
 0x5a1   :  { %6760 = vmatprep.mubr.f32.mxu1 %v12084_v42 }
 0x5a4   :  { %6764 = vmatmul.mubr.f32.gmra.mrb[92].mxu1 %v12552_v45 }
 0x5a5   :  { %6769 = vmatprep.mubr.f32.mxu1 %v12084_v42 }
 0x5a8   :  { %6773 = vmatmul.mubr.f32.gmra.mrb[94].mxu1 %v12553_v39 }
 0x5a9   :  { %6778 = vmatprep.mubr.f32.mxu1 %v12084_v42 }
 0x5ac   :  { %6782 = vmatmul.mubr.f32.gmra.mrb[96].mxu1 %v12554_v12 }
 0x5ad   :  { %6787 = vmatprep.mubr.f32.mxu1 %v12084_v42 }
 0x5b0   :  { %6791 = vmatmul.mubr.f32.gmra.mrb[98].mxu1 %v12555_v19  ;;  %v12566_v19 = vld [vmem:[#allocation55_spill] sm:$0xff] }
 0x5b1   :  { %6796 = vmatprep.mubr.f32.mxu1 %v12084_v42 }
 0x5b4   :  { %6800 = vmatmul.mubr.f32.gmra.mrb[100].mxu1 %v12556_v15 }
 0x5b5   :  { %6805 = vmatprep.mubr.f32.mxu1 %v12084_v42 }
 0x5b8   :  { %6809 = vmatmul.mubr.f32.gmra.mrb[102].mxu1 %v12557_v35 }
 0x5b9   :  { %6814 = vmatprep.mubr.f32.mxu1 %v12084_v42 }
 0x5bc   :  { %6818 = vmatmul.mubr.f32.gmra.mrb[104].mxu1 %v12558_v62 }
 0x5bd   :  { %6823 = vmatprep.mubr.f32.mxu1 %v12084_v42 }
 0x5c0   :  { %6827 = vmatmul.mubr.f32.gmra.mrb[106].mxu1 %v12559_v17 }
 0x5c1   :  { %6832 = vmatprep.mubr.f32.mxu1 %v12084_v42 }
 0x5c4   :  { %6836 = vmatmul.mubr.f32.gmra.mrb[108].mxu1 %v12560_v44  ;;  %v12567_v44 = vld [vmem:[#allocation129_spill] sm:$0xff] }
 0x5c5   :  { %6841 = vmatprep.mubr.f32.mxu1 %v12084_v42 }
 0x5c8   :  { %6845 = vmatmul.mubr.f32.gmra.mrb[110].mxu1 %v12561_v21 }
 0x5c9   :  { %6939 = vmatprep.mubr.f32.mxu1 %v12084_v42 }
 0x5cc   :  { %6941 = vmatmul.mubr.f32.vlgmr.msra.gmra.mrb[56].mxu1 %v10674_v31 }
 0x5cd   :  { %7723 = vmatpush1.bf16.msra.mxu1 %v12498_v30  ;;  %6946 = vmatprep.mubr.f32.mxu1 %v12084_v42 }
 0x5ce   :  { %7725 = vmatprep.subr.bf16.mxu1 %v12499_v16 }
 0x5d0   :  { %6948 = vmatmul.mubr.f32.gmra.mrb[58].mxu1 %v10684_v1 }
 0x5d1   :  { %7727 = vmatpush1.bf16.msra.mxu1 %v12502_v41  ;;  %6953 = vmatprep.mubr.f32.mxu1 %v12084_v42 }
 0x5d4   :  { %6955 = vmatmul.mubr.f32.gmra.mrb[60].mxu1 %v10695_v38 }
 0x5d5   :  { %6960 = vmatprep.mubr.f32.mxu1 %v12084_v42 }
 0x5d8   :  { %6962 = vmatmul.mubr.f32.gmra.mrb[62].mxu1 %v10700_v43 }
 0x5d9   :  { %6967 = vmatprep.mubr.f32.mxu1 %v12084_v42 }
 0x5dc   :  { %6969 = vmatmul.mubr.f32.gmra.mrb[64].mxu1 %v12417_v22 }
 0x5dd   :  { %6974 = vmatprep.mubr.f32.mxu1 %v12084_v42 }
 0x5e0   :  { %6976 = vmatmul.mubr.f32.gmra.mrb[66].mxu1 %v12421_v18 }
 0x5e1   :  { %6981 = vmatprep.mubr.f32.mxu1 %v12084_v42 }
 0x5e4   :  { %6983 = vmatmul.mubr.f32.gmra.mrb[68].mxu1 %v12426_v59 }
 0x5e5   :  { %6988 = vmatprep.mubr.f32.mxu1 %v12084_v42 }
 0x5e7   :  { %v5111_v46 = vpop.f32.mrb[80].mxu0 }
 0x5e8   :  { %v5305_v5 = vadd.f32 -2.0357141, %v5111_v46  ;;  %v5113_v14 = vpop.f32.mrb[81].mxu0  ;;  %6990 = vmatmul.mubr.f32.gmra.mrb[70].mxu1 %v12430_v29 }
 0x5e9   :  { %v5306_v10 = vadd.f32 -2.0357141, %v5113_v14  ;;  %6995 = vmatprep.mubr.f32.mxu1 %v12084_v42 }
 0x5ea   :  { %5362 = vst [vmem:[#allocation9 + $0x1c0] sm:$0xff] %v5305_v5 }
 0x5eb   :  { %5363 = vst.msk [vmem:[#allocation9 + $0x1c8] sm:$0xff] %vm3262_vm1, %v5306_v10  ;;  %v5118_v30 = vpop.f32.mrb[82].mxu0  ;;  %v12568_v10 = vld [vmem:[#allocation130_spill] sm:$0xff] }
 0x5ec   :  { %v5307_v16 = vadd.f32 -2.0357141, %v5118_v30  ;;  %v5120_v55 = vpop.f32.mrb[83].mxu0  ;;  %6997 = vmatmul.mubr.f32.gmra.mrb[72].mxu1 %v12434_v63 }
 0x5ed   :  { %v5308_v4 = vadd.f32 -2.0357141, %v5120_v55  ;;  %7002 = vmatprep.mubr.f32.mxu1 %v12084_v42 }
 0x5ee   :  { %5364 = vst [vmem:[#allocation9 + $0x1d0] sm:$0xff] %v5307_v16 }
 0x5ef   :  { %5365 = vst.msk [vmem:[#allocation9 + $0x1d8] sm:$0xff] %vm3262_vm1, %v5308_v4  ;;  %v5125_v41 = vpop.f32.mrb[84].mxu0 }
 0x5f0   :  { %v5309_v34 = vadd.f32 -2.0357141, %v5125_v41  ;;  %v5127_v3 = vpop.f32.mrb[85].mxu0  ;;  %7004 = vmatmul.mubr.f32.gmra.mrb[74].mxu1 %v12439_v23  ;;  %v12569_v41 = vld [vmem:[#allocation133_spill] sm:$0xff] }
 0x5f1   :  { %v5310_v48 = vadd.f32 -2.0357141, %v5127_v3  ;;  %7009 = vmatprep.mubr.f32.mxu1 %v12084_v42 }
 0x5f2   :  { %5366 = vst [vmem:[#allocation9 + $0x1e0] sm:$0xff] %v5309_v34 }
 0x5f3   :  { %5367 = vst.msk [vmem:[#allocation9 + $0x1e8] sm:$0xff] %vm3262_vm1, %v5310_v48  ;;  %v5132_v27 = vpop.f32.mrb[86].mxu0 }
 0x5f4   :  { %v5311_v53 = vadd.f32 -2.0357141, %v5132_v27  ;;  %v5134_v40 = vpop.f32.mrb[87].mxu0  ;;  %7011 = vmatmul.mubr.f32.gmra.mrb[76].mxu1 %v12444_v6 }
 0x5f5   :  { %v5312_v60 = vadd.f32 -2.0357141, %v5134_v40  ;;  %7016 = vmatprep.mubr.f32.mxu1 %v12084_v42 }
 0x5f6   :  { %5368 = vst [vmem:[#allocation9 + $0x1f0] sm:$0xff] %v5311_v53  ;;  %v12570_v53 = vld [vmem:[#allocation135_spill] sm:$0xff] }
 0x5f7   :  { %5369 = vst.msk [vmem:[#allocation9 + $0x1f8] sm:$0xff] %vm3262_vm1, %v5312_v60  ;;  %v5139_v20 = vpop.f32.mrb[88].mxu0 }
 0x5f8   :  { %v5313_v9 = vadd.f32 -2.0357141, %v5139_v20  ;;  %v5141_v24 = vpop.f32.mrb[89].mxu0  ;;  %7018 = vmatmul.mubr.f32.gmra.mrb[78].mxu1 %v12450_v37 }
 0x5f9   :  { %v5314_v52 = vadd.f32 -2.0357141, %v5141_v24  ;;  %7023 = vmatprep.mubr.f32.mxu1 %v12084_v42  ;;  %v12571_v24 = vld [vmem:[#allocation137_spill] sm:$0xff] }
 0x5fa   :  { %5370 = vst [vmem:[#allocation9 + $0x200] sm:$0xff] %v5313_v9 }
 0x5fb   :  { %5371 = vst.msk [vmem:[#allocation9 + $0x208] sm:$0xff] %vm3262_vm1, %v5314_v52  ;;  %v5146_v11 = vpop.f32.mrb[90].mxu0 }
 0x5fc   :  { %v5315_v8 = vadd.f32 -2.0357141, %v5146_v11  ;;  %v5148_v50 = vpop.f32.mrb[91].mxu0  ;;  %7025 = vmatmul.mubr.f32.gmra.mrb[80].mxu1 %v12562_v33 }
 0x5fd   :  { %v5316_v0 = vadd.f32 -2.0357141, %v5148_v50  ;;  %7030 = vmatprep.mubr.f32.mxu1 %v12084_v42 }
 0x5fe   :  { %5372 = vst [vmem:[#allocation9 + $0x210] sm:$0xff] %v5315_v8 }
 0x5ff   :  { %5373 = vst.msk [vmem:[#allocation9 + $0x218] sm:$0xff] %vm3262_vm1, %v5316_v0  ;;  %v5153_v61 = vpop.f32.mrb[92].mxu0  ;;  %v12572_v0 = vld [vmem:[#allocation139_spill] sm:$0xff] }
 0x600   :  { %v5317_v28 = vadd.f32 -2.0357141, %v5153_v61  ;;  %v5155_v7 = vpop.f32.mrb[93].mxu0  ;;  %7032 = vmatmul.mubr.f32.gmra.mrb[82].mxu1 %v12563_v26 }
 0x601   :  { %v5318_v54 = vadd.f32 -2.0357141, %v5155_v7  ;;  %7037 = vmatprep.mubr.f32.mxu1 %v12084_v42 }
 0x602   :  { %5374 = vst [vmem:[#allocation9 + $0x220] sm:$0xff] %v5317_v28 }
 0x603   :  { %5375 = vst.msk [vmem:[#allocation9 + $0x228] sm:$0xff] %vm3262_vm1, %v5318_v54  ;;  %v5160_v13 = vpop.f32.mrb[94].mxu0 }
 0x604   :  { %v5319_v47 = vadd.f32 -2.0357141, %v5160_v13  ;;  %v5162_v2 = vpop.f32.mrb[95].mxu0  ;;  %7039 = vmatmul.mubr.f32.gmra.mrb[84].mxu1 %v12564_v49  ;;  %v12573_v13 = vld [vmem:[#allocation140_spill] sm:$0xff] }
 0x605   :  { %v5320_v58 = vadd.f32 -2.0357141, %v5162_v2  ;;  %7044 = vmatprep.mubr.f32.mxu1 %v12084_v42 }
 0x606   :  { %5376 = vst [vmem:[#allocation9 + $0x230] sm:$0xff] %v5319_v47 }
 0x607   :  { %5377 = vst.msk [vmem:[#allocation9 + $0x238] sm:$0xff] %vm3262_vm1, %v5320_v58  ;;  %v5167_v57 = vpop.f32.mrb[96].mxu0 }
 0x608   :  { %v5321_v56 = vadd.f32 -2.0357141, %v5167_v57  ;;  %v5169_v36 = vpop.f32.mrb[97].mxu0  ;;  %7046 = vmatmul.mubr.f32.gmra.mrb[86].mxu1 %v12565_v25 }
 0x609   :  { %v5322_v51 = vadd.f32 -2.0357141, %v5169_v36  ;;  %7051 = vmatprep.mubr.f32.mxu1 %v12084_v42 }
 0x60a   :  { %5378 = vst [vmem:[#allocation9 + $0x240] sm:$0xff] %v5321_v56  ;;  %v12574_v56 = vld [vmem:[#allocation142_spill] sm:$0xff] }
 0x60b   :  { %5379 = vst.msk [vmem:[#allocation9 + $0x248] sm:$0xff] %vm3262_vm1, %v5322_v51  ;;  %v5174_v32 = vpop.f32.mrb[98].mxu0 }
 0x60c   :  { %v5323_v45 = vadd.f32 -2.0357141, %v5174_v32  ;;  %v5176_v39 = vpop.f32.mrb[99].mxu0  ;;  %7053 = vmatmul.mubr.f32.gmra.mrb[88].mxu1 %v12566_v19 }
 0x60d   :  { %v5324_v12 = vadd.f32 -2.0357141, %v5176_v39  ;;  %7058 = vmatprep.mubr.f32.mxu1 %v12084_v42  ;;  %v12575_v39 = vld [vmem:[#allocation143_spill] sm:$0xff] }
 0x60e   :  { %5380 = vst [vmem:[#allocation9 + $0x250] sm:$0xff] %v5323_v45 }
 0x60f   :  { %5381 = vst.msk [vmem:[#allocation9 + $0x258] sm:$0xff] %vm3262_vm1, %v5324_v12  ;;  %v5181_v15 = vpop.f32.mrb[100].mxu0 }
 0x610   :  { %v5325_v35 = vadd.f32 -2.0357141, %v5181_v15  ;;  %v5183_v62 = vpop.f32.mrb[101].mxu0  ;;  %7060 = vmatmul.mubr.f32.gmra.mrb[90].mxu1 %v12567_v44 }
 0x611   :  { %v5326_v17 = vadd.f32 -2.0357141, %v5183_v62  ;;  %7065 = vmatprep.mubr.f32.mxu1 %v12084_v42 }
 0x612   :  { %5382 = vst [vmem:[#allocation9 + $0x260] sm:$0xff] %v5325_v35 }
 0x613   :  { %5383 = vst.msk [vmem:[#allocation9 + $0x268] sm:$0xff] %vm3262_vm1, %v5326_v17  ;;  %v5188_v21 = vpop.f32.mrb[102].mxu0  ;;  %v12576_v17 = vld [vmem:[#allocation144_spill] sm:$0xff] }
 0x614   :  { %v5327_v46 = vadd.f32 -2.0357141, %v5188_v21  ;;  %v5190_v5 = vpop.f32.mrb[103].mxu0  ;;  %7067 = vmatmul.mubr.f32.gmra.mrb[92].mxu1 %v12568_v10 }
 0x615   :  { %v5328_v14 = vadd.f32 -2.0357141, %v5190_v5  ;;  %7072 = vmatprep.mubr.f32.mxu1 %v12084_v42 }
 0x616   :  { %5384 = vst [vmem:[#allocation9 + $0x270] sm:$0xff] %v5327_v46 }
 0x617   :  { %5385 = vst.msk [vmem:[#allocation9 + $0x278] sm:$0xff] %vm3262_vm1, %v5328_v14  ;;  %v5195_v30 = vpop.f32.mrb[104].mxu0 }
 0x618   :  { %v5329_v16 = vadd.f32 -2.0357141, %v5195_v30  ;;  %v5197_v55 = vpop.f32.mrb[105].mxu0  ;;  %7074 = vmatmul.mubr.f32.gmra.mrb[94].mxu1 %v12569_v41  ;;  %v12577_v30 = vld [vmem:[#allocation145_spill] sm:$0xff] }
 0x619   :  { %v5330_v4 = vadd.f32 -2.0357141, %v5197_v55  ;;  %7079 = vmatprep.mubr.f32.mxu1 %v12084_v42 }
 0x61a   :  { %5386 = vst [vmem:[#allocation9 + $0x280] sm:$0xff] %v5329_v16 }
 0x61b   :  { %5387 = vst.msk [vmem:[#allocation9 + $0x288] sm:$0xff] %vm3262_vm1, %v5330_v4  ;;  %v5202_v34 = vpop.f32.mrb[106].mxu0 }
 0x61c   :  { %v5331_v3 = vadd.f32 -2.0357141, %v5202_v34  ;;  %v5204_v48 = vpop.f32.mrb[107].mxu0  ;;  %7081 = vmatmul.mubr.f32.gmra.mrb[96].mxu1 %v12570_v53 }
 0x61d   :  { %v5332_v27 = vadd.f32 -2.0357141, %v5204_v48  ;;  %7086 = vmatprep.mubr.f32.mxu1 %v12084_v42 }
 0x61e   :  { %5388 = vst [vmem:[#allocation9 + $0x290] sm:$0xff] %v5331_v3 }
 0x61f   :  { %5389 = vst.msk [vmem:[#allocation9 + $0x298] sm:$0xff] %vm3262_vm1, %v5332_v27  ;;  %v5209_v40 = vpop.f32.mrb[108].mxu0 }
 0x620   :  { %v5333_v60 = vadd.f32 -2.0357141, %v5209_v40  ;;  %v5211_v20 = vpop.f32.mrb[109].mxu0  ;;  %7088 = vmatmul.mubr.f32.gmra.mrb[98].mxu1 %v12571_v24 }
 0x621   :  { %v5334_v9 = vadd.f32 -2.0357141, %v5211_v20  ;;  %7093 = vmatprep.mubr.f32.mxu1 %v12084_v42 }
 0x622   :  { %5390 = vst [vmem:[#allocation9 + $0x2a0] sm:$0xff] %v5333_v60 }
 0x623   :  { %5391 = vst.msk [vmem:[#allocation9 + $0x2a8] sm:$0xff] %vm3262_vm1, %v5334_v9  ;;  %v5216_v52 = vpop.f32.mrb[110].mxu0 }
 0x624   :  { %v5335_v11 = vadd.f32 -2.0357141, %v5216_v52  ;;  %v5218_v8 = vpop.f32.mrb[111].mxu0  ;;  %7095 = vmatmul.mubr.f32.gmra.mrb[100].mxu1 %v12572_v0 }
 0x625   :  { %v5336_v50 = vadd.f32 -2.0357141, %v5218_v8  ;;  %7100 = vmatprep.mubr.f32.mxu1 %v12084_v42 }
 0x626   :  { %5392 = vst [vmem:[#allocation9 + $0x2b0] sm:$0xff] %v5335_v11 }
 0x627   :  { %5393 = vst.msk [vmem:[#allocation9 + $0x2b8] sm:$0xff] %vm3262_vm1, %v5336_v50  ;;  %v5223_v61 = vpop.f32.mrb[112].mxu0 }
 0x628   :  { %v5337_v28 = vadd.f32 -2.0357141, %v5223_v61  ;;  %v5225_v7 = vpop.f32.mrb[113].mxu0  ;;  %7102 = vmatmul.mubr.f32.gmra.mrb[102].mxu1 %v12573_v13 }
 0x629   :  { %v5338_v54 = vadd.f32 -2.0357141, %v5225_v7  ;;  %7107 = vmatprep.mubr.f32.mxu1 %v12084_v42 }
 0x62a   :  { %5394 = vst [vmem:[#allocation9 + $0x2c0] sm:$0xff] %v5337_v28 }
 0x62b   :  { %5395 = vst.msk [vmem:[#allocation9 + $0x2c8] sm:$0xff] %vm3262_vm1, %v5338_v54  ;;  %v5230_v47 = vpop.f32.mrb[114].mxu0 }
 0x62c   :  { %v5339_v2 = vadd.f32 -2.0357141, %v5230_v47  ;;  %v5232_v58 = vpop.f32.mrb[115].mxu0  ;;  %7109 = vmatmul.mubr.f32.gmra.mrb[104].mxu1 %v12574_v56 }
 0x62d   :  { %v5340_v57 = vadd.f32 -2.0357141, %v5232_v58  ;;  %7114 = vmatprep.mubr.f32.mxu1 %v12084_v42 }
 0x62e   :  { %5396 = vst [vmem:[#allocation9 + $0x2d0] sm:$0xff] %v5339_v2 }
 0x62f   :  { %5397 = vst.msk [vmem:[#allocation9 + $0x2d8] sm:$0xff] %vm3262_vm1, %v5340_v57  ;;  %v5237_v36 = vpop.f32.mrb[116].mxu0 }
 0x630   :  { %v5341_v51 = vadd.f32 -2.0357141, %v5237_v36  ;;  %v5239_v32 = vpop.f32.mrb[117].mxu0  ;;  %7116 = vmatmul.mubr.f32.gmra.mrb[106].mxu1 %v12575_v39 }
 0x631   :  { %v5342_v45 = vadd.f32 -2.0357141, %v5239_v32  ;;  %7121 = vmatprep.mubr.f32.mxu1 %v12084_v42 }
 0x632   :  { %5398 = vst [vmem:[#allocation9 + $0x2e0] sm:$0xff] %v5341_v51 }
 0x633   :  { %5399 = vst.msk [vmem:[#allocation9 + $0x2e8] sm:$0xff] %vm3262_vm1, %v5342_v45  ;;  %v5244_v12 = vpop.f32.mrb[118].mxu0 }
 0x634   :  { %v5343_v15 = vadd.f32 -2.0357141, %v5244_v12  ;;  %v5246_v35 = vpop.f32.mrb[119].mxu0  ;;  %7123 = vmatmul.mubr.f32.gmra.mrb[108].mxu1 %v12576_v17 }
 0x635   :  { %v5344_v62 = vadd.f32 -2.0357141, %v5246_v35  ;;  %7128 = vmatprep.mubr.f32.mxu1 %v12084_v42 }
 0x636   :  { %5400 = vst [vmem:[#allocation9 + $0x2f0] sm:$0xff] %v5343_v15 }
 0x637   :  { %5401 = vst.msk [vmem:[#allocation9 + $0x2f8] sm:$0xff] %vm3262_vm1, %v5344_v62  ;;  %v5251_v21 = vpop.f32.mrb[120].mxu0 }
 0x638   :  { %v5345_v46 = vadd.f32 -2.0357141, %v5251_v21  ;;  %v5253_v5 = vpop.f32.mrb[121].mxu0  ;;  %7130 = vmatmul.mubr.f32.gmra.mrb[110].mxu1 %v12577_v30 }
 0x639   :  { %v5346_v14 = vadd.f32 -2.0357141, %v5253_v5  ;;  %7208 = vmatprep.mubr.f32.mxu1 %v12084_v42 }
 0x63a   :  { %5402 = vst [vmem:[#allocation9 + $0x300] sm:$0xff] %v5345_v46 }
 0x63b   :  { %5403 = vst.msk [vmem:[#allocation9 + $0x308] sm:$0xff] %vm3262_vm1, %v5346_v14  ;;  %v5258_v16 = vpop.f32.mrb[122].mxu0 }
 0x63c   :  { %v5347_v55 = vadd.f32 -2.0357141, %v5258_v16  ;;  %v5260_v4 = vpop.f32.mrb[123].mxu0  ;;  %7210 = vmatmul.mubr.f32.vlgmr.msra.gmra.mrb[56].mxu1 %v10674_v31 }
 0x63d   :  { %v5348_v34 = vadd.f32 -2.0357141, %v5260_v4  ;;  %7215 = vmatprep.mubr.f32.mxu1 %v12084_v42 }
 0x63e   :  { %5404 = vst [vmem:[#allocation9 + $0x310] sm:$0xff] %v5347_v55 }
 0x63f   :  { %5405 = vst.msk [vmem:[#allocation9 + $0x318] sm:$0xff] %vm3262_vm1, %v5348_v34  ;;  %v5265_v3 = vpop.f32.mrb[124].mxu0 }
 0x640   :  { %v5349_v48 = vadd.f32 -2.0357141, %v5265_v3  ;;  %v5267_v27 = vpop.f32.mrb[125].mxu0  ;;  %7217 = vmatmul.mubr.f32.gmra.mrb[58].mxu1 %v10684_v1 }
 0x641   :  { %v5350_v40 = vadd.f32 -2.0357141, %v5267_v27  ;;  %7222 = vmatprep.mubr.f32.mxu1 %v12084_v42 }
 0x642   :  { %5406 = vst [vmem:[#allocation9 + $0x320] sm:$0xff] %v5349_v48 }
 0x643   :  { %5407 = vst.msk [vmem:[#allocation9 + $0x328] sm:$0xff] %vm3262_vm1, %v5350_v40  ;;  %v5272_v60 = vpop.f32.mrb[126].mxu0 }
 0x644   :  { %v5351_v20 = vadd.f32 -2.0357141, %v5272_v60  ;;  %v5274_v9 = vpop.f32.mrb[127].mxu0  ;;  %7224 = vmatmul.mubr.f32.gmra.mrb[60].mxu1 %v10695_v38 }
 0x645   :  { %v5352_v31 = vadd.f32 -2.0357141, %v5274_v9  ;;  %7229 = vmatprep.mubr.f32.mxu1 %v12084_v42 }
 0x646   :  { %5408 = vst [vmem:[#allocation9 + $0x330] sm:$0xff] %v5351_v20 }
 0x647   :  { %5409 = vst.msk [vmem:[#allocation9 + $0x338] sm:$0xff] %vm3262_vm1, %v5352_v31  ;;  %v5279_v52 = vpop.f32.mrb[128].mxu0 }
 0x648   :  { %v5353_v11 = vadd.f32 -2.0357141, %v5279_v52  ;;  %v5281_v8 = vpop.f32.mrb[129].mxu0  ;;  %7231 = vmatmul.mubr.f32.gmra.mrb[62].mxu1 %v10700_v43 }
 0x649   :  { %v5354_v1 = vadd.f32 -2.0357141, %v5281_v8  ;;  %7236 = vmatprep.mubr.f32.mxu1 %v12084_v42 }
 0x64a   :  { %5410 = vst [vmem:[#allocation9 + $0x340] sm:$0xff] %v5353_v11 }
 0x64b   :  { %5411 = vst.msk [vmem:[#allocation9 + $0x348] sm:$0xff] %vm3262_vm1, %v5354_v1  ;;  %v5286_v50 = vpop.f32.mrb[130].mxu0 }
 0x64c   :  { %v5355_v61 = vadd.f32 -2.0357141, %v5286_v50  ;;  %v5288_v28 = vpop.f32.mrb[131].mxu0  ;;  %7238 = vmatmul.mubr.f32.gmra.mrb[64].mxu1 %v12417_v22 }
 0x64d   :  { %v5356_v38 = vadd.f32 -2.0357141, %v5288_v28  ;;  %7243 = vmatprep.mubr.f32.mxu1 %v12084_v42 }
 0x64e   :  { %5412 = vst [vmem:[#allocation9 + $0x350] sm:$0xff] %v5355_v61 }
 0x64f   :  { %5413 = vst.msk [vmem:[#allocation9 + $0x358] sm:$0xff] %vm3262_vm1, %v5356_v38  ;;  %v5293_v7 = vpop.f32.mrb[132].mxu0 }
 0x650   :  { %v5357_v54 = vadd.f32 -2.0357141, %v5293_v7  ;;  %v5295_v47 = vpop.f32.mrb[133].mxu0  ;;  %7245 = vmatmul.mubr.f32.gmra.mrb[66].mxu1 %v12421_v18 }
 0x651   :  { %v5358_v43 = vadd.f32 -2.0357141, %v5295_v47  ;;  %7250 = vmatprep.mubr.f32.mxu1 %v12084_v42 }
 0x652   :  { %5414 = vst [vmem:[#allocation9 + $0x360] sm:$0xff] %v5357_v54 }
 0x653   :  { %5415 = vst.msk [vmem:[#allocation9 + $0x368] sm:$0xff] %vm3262_vm1, %v5358_v43  ;;  %v5300_v2 = vpop.f32.mrb[134].mxu0 }
 0x654   :  { %v5359_v58 = vadd.f32 -2.0357141, %v5300_v2  ;;  %v5302_v57 = vpop.f32.mrb[135].mxu0  ;;  %7252 = vmatmul.mubr.f32.gmra.mrb[68].mxu1 %v12426_v59 }
 0x655   :  { %v5360_v22 = vadd.f32 -2.0357141, %v5302_v57  ;;  %7257 = vmatprep.mubr.f32.mxu1 %v12084_v42 }
 0x656   :  { %5416 = vst [vmem:[#allocation9 + $0x370] sm:$0xff] %v5359_v58 }
 0x657   :  { %5417 = vst.msk [vmem:[#allocation9 + $0x378] sm:$0xff] %vm3262_vm1, %v5360_v22 }
 0x658   :  { %7259 = vmatmul.mubr.f32.gmra.mrb[70].mxu1 %v12430_v29 }
 0x659   :  { %7264 = vmatprep.mubr.f32.mxu1 %v12084_v42 }
 0x65c   :  { %7266 = vmatmul.mubr.f32.gmra.mrb[72].mxu1 %v12434_v63 }
 0x65d   :  { %7271 = vmatprep.mubr.f32.mxu1 %v12084_v42 }
 0x660   :  { %7273 = vmatmul.mubr.f32.gmra.mrb[74].mxu1 %v12439_v23 }
 0x661   :  { %7278 = vmatprep.mubr.f32.mxu1 %v12084_v42 }
 0x664   :  { %7280 = vmatmul.mubr.f32.gmra.mrb[76].mxu1 %v12444_v6 }
 0x665   :  { %7285 = vmatprep.mubr.f32.mxu1 %v12084_v42 }
 0x668   :  { %7287 = vmatmul.mubr.f32.gmra.mrb[78].mxu1 %v12450_v37 }
 0x669   :  { %7292 = vmatprep.mubr.f32.mxu1 %v12084_v42 }
 0x66c   :  { %7294 = vmatmul.mubr.f32.gmra.mrb[80].mxu1 %v12562_v33 }
 0x66d   :  { %7299 = vmatprep.mubr.f32.mxu1 %v12084_v42 }
 0x670   :  { %7301 = vmatmul.mubr.f32.gmra.mrb[82].mxu1 %v12563_v26 }
 0x671   :  { %7306 = vmatprep.mubr.f32.mxu1 %v12084_v42 }
 0x674   :  { %7308 = vmatmul.mubr.f32.gmra.mrb[84].mxu1 %v12564_v49 }
 0x675   :  { %7313 = vmatprep.mubr.f32.mxu1 %v12084_v42 }
 0x678   :  { %7315 = vmatmul.mubr.f32.gmra.mrb[86].mxu1 %v12565_v25 }
 0x679   :  { %7320 = vmatprep.mubr.f32.mxu1 %v12084_v42 }
 0x67c   :  { %7322 = vmatmul.mubr.f32.gmra.mrb[88].mxu1 %v12566_v19 }
 0x67d   :  { %7327 = vmatprep.mubr.f32.mxu1 %v12084_v42 }
 0x680   :  { %7329 = vmatmul.mubr.f32.gmra.mrb[90].mxu1 %v12567_v44 }
 0x681   :  { %7334 = vmatprep.mubr.f32.mxu1 %v12084_v42 }
 0x684   :  { %7336 = vmatmul.mubr.f32.gmra.mrb[92].mxu1 %v12568_v10 }
 0x685   :  { %7341 = vmatprep.mubr.f32.mxu1 %v12084_v42 }
 0x688   :  { %7343 = vmatmul.mubr.f32.gmra.mrb[94].mxu1 %v12569_v41 }
 0x689   :  { %7348 = vmatprep.mubr.f32.mxu1 %v12084_v42 }
 0x68c   :  { %7350 = vmatmul.mubr.f32.gmra.mrb[96].mxu1 %v12570_v53 }
 0x68d   :  { %7355 = vmatprep.mubr.f32.mxu1 %v12084_v42 }
 0x690   :  { %7357 = vmatmul.mubr.f32.gmra.mrb[98].mxu1 %v12571_v24 }
 0x691   :  { %7362 = vmatprep.mubr.f32.mxu1 %v12084_v42 }
 0x694   :  { %7364 = vmatmul.mubr.f32.gmra.mrb[100].mxu1 %v12572_v0 }
 0x695   :  { %7369 = vmatprep.mubr.f32.mxu1 %v12084_v42 }
 0x698   :  { %7371 = vmatmul.mubr.f32.gmra.mrb[102].mxu1 %v12573_v13 }
 0x699   :  { %7376 = vmatprep.mubr.f32.mxu1 %v12084_v42 }
 0x69c   :  { %7378 = vmatmul.mubr.f32.gmra.mrb[104].mxu1 %v12574_v56 }
 0x69d   :  { %7383 = vmatprep.mubr.f32.mxu1 %v12084_v42 }
 0x6a0   :  { %7385 = vmatmul.mubr.f32.gmra.mrb[106].mxu1 %v12575_v39 }
 0x6a1   :  { %7390 = vmatprep.mubr.f32.mxu1 %v12084_v42 }
 0x6a4   :  { %7392 = vmatmul.mubr.f32.gmra.mrb[108].mxu1 %v12576_v17 }
 0x6a5   :  { %7397 = vmatprep.mubr.f32.mxu1 %v12084_v42 }
 0x6a8   :  { %7399 = vmatmul.mubr.f32.gmra.mrb[110].mxu1 %v12577_v30 }
 0x70f   :  { %v7211_v18 = vpop.f32.mrb[56].mxu1 }
 0x710   :  { %v7405_v59 = vadd.f32 -1.8044444, %v7211_v18  ;;  %v7213_v29 = vpop.f32.mrb[57].mxu1 }
 0x711   :  { %v7406_v63 = vadd.f32 -1.8044444, %v7213_v29 }
 0x712   :  { %7462 = vst [vmem:[#allocation9 + $0x380] sm:$0xff] %v7405_v59 }
 0x713   :  { %7463 = vst.msk [vmem:[#allocation9 + $0x388] sm:$0xff] %vm3262_vm1, %v7406_v63  ;;  %v7218_v23 = vpop.f32.mrb[58].mxu1 }
 0x714   :  { %v7407_v6 = vadd.f32 -1.8044444, %v7218_v23  ;;  %v7220_v37 = vpop.f32.mrb[59].mxu1 }
 0x715   :  { %v7408_v33 = vadd.f32 -1.8044444, %v7220_v37 }
 0x716   :  { %7464 = vst [vmem:[#allocation9 + $0x390] sm:$0xff] %v7407_v6 }
 0x717   :  { %7465 = vst.msk [vmem:[#allocation9 + $0x398] sm:$0xff] %vm3262_vm1, %v7408_v33  ;;  %v7225_v26 = vpop.f32.mrb[60].mxu1 }
 0x718   :  { %v7409_v49 = vadd.f32 -1.8044444, %v7225_v26  ;;  %v7227_v25 = vpop.f32.mrb[61].mxu1 }
 0x719   :  { %v7410_v42 = vadd.f32 -1.8044444, %v7227_v25 }
 0x71a   :  { %7466 = vst [vmem:[#allocation9 + $0x3a0] sm:$0xff] %v7409_v49 }
 0x71b   :  { %7467 = vst.msk [vmem:[#allocation9 + $0x3a8] sm:$0xff] %vm3262_vm1, %v7410_v42  ;;  %v7232_v19 = vpop.f32.mrb[62].mxu1 }
 0x71c   :  { %v7411_v44 = vadd.f32 -1.8044444, %v7232_v19  ;;  %v7234_v10 = vpop.f32.mrb[63].mxu1 }
 0x71d   :  { %v7412_v41 = vadd.f32 -1.8044444, %v7234_v10 }
 0x71e   :  { %7468 = vst [vmem:[#allocation9 + $0x3b0] sm:$0xff] %v7411_v44 }
 0x71f   :  { %7469 = vst.msk [vmem:[#allocation9 + $0x3b8] sm:$0xff] %vm3262_vm1, %v7412_v41  ;;  %v7239_v53 = vpop.f32.mrb[64].mxu1 }
 0x720   :  { %v7413_v24 = vadd.f32 -1.8044444, %v7239_v53  ;;  %v7241_v0 = vpop.f32.mrb[65].mxu1 }
 0x721   :  { %v7414_v13 = vadd.f32 -1.8044444, %v7241_v0 }
 0x722   :  { %7470 = vst [vmem:[#allocation9 + $0x3c0] sm:$0xff] %v7413_v24 }
 0x723   :  { %7471 = vst.msk [vmem:[#allocation9 + $0x3c8] sm:$0xff] %vm3262_vm1, %v7414_v13  ;;  %v7246_v56 = vpop.f32.mrb[66].mxu1 }
 0x724   :  { %v7415_v36 = vadd.f32 -1.8044444, %v7246_v56  ;;  %v7248_v51 = vpop.f32.mrb[67].mxu1 }
 0x725   :  { %v7416_v32 = vadd.f32 -1.8044444, %v7248_v51 }
 0x726   :  { %7472 = vst [vmem:[#allocation9 + $0x3d0] sm:$0xff] %v7415_v36 }
 0x727   :  { %7473 = vst.msk [vmem:[#allocation9 + $0x3d8] sm:$0xff] %vm3262_vm1, %v7416_v32  ;;  %v7253_v45 = vpop.f32.mrb[68].mxu1 }
 0x728   :  { %v7417_v39 = vadd.f32 -1.8044444, %v7253_v45  ;;  %v7255_v12 = vpop.f32.mrb[69].mxu1 }
 0x729   :  { %v7418_v15 = vadd.f32 -1.8044444, %v7255_v12 }
 0x72a   :  { %7474 = vst [vmem:[#allocation9 + $0x3e0] sm:$0xff] %v7417_v39 }
 0x72b   :  { %7475 = vst.msk [vmem:[#allocation9 + $0x3e8] sm:$0xff] %vm3262_vm1, %v7418_v15  ;;  %v7260_v35 = vpop.f32.mrb[70].mxu1 }
 0x72c   :  { %v7419_v62 = vadd.f32 -1.8044444, %v7260_v35  ;;  %v7262_v17 = vpop.f32.mrb[71].mxu1 }
 0x72d   :  { %v7420_v21 = vadd.f32 -1.8044444, %v7262_v17 }
 0x72e   :  { %7476 = vst [vmem:[#allocation9 + $0x3f0] sm:$0xff] %v7419_v62 }
 0x72f   :  { %7477 = vst.msk [vmem:[#allocation9 + $0x3f8] sm:$0xff] %vm3262_vm1, %v7420_v21  ;;  %v7267_v46 = vpop.f32.mrb[72].mxu1 }
 0x730   :  { %v7421_v5 = vadd.f32 -1.8044444, %v7267_v46  ;;  %v7269_v14 = vpop.f32.mrb[73].mxu1 }
 0x731   :  { %v7422_v30 = vadd.f32 -1.8044444, %v7269_v14 }
 0x732   :  { %7478 = vst [vmem:[#allocation9 + $0x400] sm:$0xff] %v7421_v5 }
 0x733   :  { %7479 = vst.msk [vmem:[#allocation9 + $0x408] sm:$0xff] %vm3262_vm1, %v7422_v30  ;;  %v7274_v16 = vpop.f32.mrb[74].mxu1 }
 0x734   :  { %v7423_v55 = vadd.f32 -1.8044444, %v7274_v16  ;;  %v7276_v4 = vpop.f32.mrb[75].mxu1 }
 0x735   :  { %v7424_v34 = vadd.f32 -1.8044444, %v7276_v4 }
 0x736   :  { %7480 = vst [vmem:[#allocation9 + $0x410] sm:$0xff] %v7423_v55 }
 0x737   :  { %7481 = vst.msk [vmem:[#allocation9 + $0x418] sm:$0xff] %vm3262_vm1, %v7424_v34  ;;  %v7281_v3 = vpop.f32.mrb[76].mxu1 }
 0x738   :  { %v7425_v48 = vadd.f32 -1.8044444, %v7281_v3  ;;  %v7283_v27 = vpop.f32.mrb[77].mxu1 }
 0x739   :  { %v7426_v40 = vadd.f32 -1.8044444, %v7283_v27 }
 0x73a   :  { %7482 = vst [vmem:[#allocation9 + $0x420] sm:$0xff] %v7425_v48 }
 0x73b   :  { %7483 = vst.msk [vmem:[#allocation9 + $0x428] sm:$0xff] %vm3262_vm1, %v7426_v40  ;;  %v7288_v60 = vpop.f32.mrb[78].mxu1 }
 0x73c   :  { %v7427_v20 = vadd.f32 -1.8044444, %v7288_v60  ;;  %v7290_v9 = vpop.f32.mrb[79].mxu1 }
 0x73d   :  { %v7428_v31 = vadd.f32 -1.8044444, %v7290_v9 }
 0x73e   :  { %7484 = vst [vmem:[#allocation9 + $0x430] sm:$0xff] %v7427_v20 }
 0x73f   :  { %7485 = vst.msk [vmem:[#allocation9 + $0x438] sm:$0xff] %vm3262_vm1, %v7428_v31  ;;  %v7295_v52 = vpop.f32.mrb[80].mxu1 }
 0x740   :  { %v7429_v11 = vadd.f32 -1.8044444, %v7295_v52  ;;  %v7297_v8 = vpop.f32.mrb[81].mxu1 }
 0x741   :  { %v7430_v1 = vadd.f32 -1.8044444, %v7297_v8 }
 0x742   :  { %7486 = vst [vmem:[#allocation9 + $0x440] sm:$0xff] %v7429_v11 }
 0x743   :  { %7487 = vst.msk [vmem:[#allocation9 + $0x448] sm:$0xff] %vm3262_vm1, %v7430_v1  ;;  %v7302_v50 = vpop.f32.mrb[82].mxu1 }
 0x744   :  { %v7431_v61 = vadd.f32 -1.8044444, %v7302_v50  ;;  %v7304_v28 = vpop.f32.mrb[83].mxu1 }
 0x745   :  { %v7432_v38 = vadd.f32 -1.8044444, %v7304_v28 }
 0x746   :  { %7488 = vst [vmem:[#allocation9 + $0x450] sm:$0xff] %v7431_v61 }
 0x747   :  { %7489 = vst.msk [vmem:[#allocation9 + $0x458] sm:$0xff] %vm3262_vm1, %v7432_v38  ;;  %v7309_v7 = vpop.f32.mrb[84].mxu1 }
 0x748   :  { %v7433_v54 = vadd.f32 -1.8044444, %v7309_v7  ;;  %v7311_v47 = vpop.f32.mrb[85].mxu1 }
 0x749   :  { %v7434_v43 = vadd.f32 -1.8044444, %v7311_v47 }
 0x74a   :  { %7490 = vst [vmem:[#allocation9 + $0x460] sm:$0xff] %v7433_v54 }
 0x74b   :  { %7491 = vst.msk [vmem:[#allocation9 + $0x468] sm:$0xff] %vm3262_vm1, %v7434_v43  ;;  %v7316_v2 = vpop.f32.mrb[86].mxu1 }
 0x74c   :  { %v7435_v58 = vadd.f32 -1.8044444, %v7316_v2  ;;  %v7318_v57 = vpop.f32.mrb[87].mxu1 }
 0x74d   :  { %v7436_v22 = vadd.f32 -1.8044444, %v7318_v57 }
 0x74e   :  { %7492 = vst [vmem:[#allocation9 + $0x470] sm:$0xff] %v7435_v58 }
 0x74f   :  { %7493 = vst.msk [vmem:[#allocation9 + $0x478] sm:$0xff] %vm3262_vm1, %v7436_v22  ;;  %v7323_v18 = vpop.f32.mrb[88].mxu1 }
 0x750   :  { %v7437_v59 = vadd.f32 -1.8044444, %v7323_v18  ;;  %v7325_v29 = vpop.f32.mrb[89].mxu1 }
 0x751   :  { %v7438_v63 = vadd.f32 -1.8044444, %v7325_v29 }
 0x752   :  { %7494 = vst [vmem:[#allocation9 + $0x480] sm:$0xff] %v7437_v59 }
 0x753   :  { %7495 = vst.msk [vmem:[#allocation9 + $0x488] sm:$0xff] %vm3262_vm1, %v7438_v63  ;;  %v7330_v23 = vpop.f32.mrb[90].mxu1 }
 0x754   :  { %v7439_v6 = vadd.f32 -1.8044444, %v7330_v23  ;;  %v7332_v37 = vpop.f32.mrb[91].mxu1 }
 0x755   :  { %v7440_v33 = vadd.f32 -1.8044444, %v7332_v37 }
 0x756   :  { %7496 = vst [vmem:[#allocation9 + $0x490] sm:$0xff] %v7439_v6 }
 0x757   :  { %7497 = vst.msk [vmem:[#allocation9 + $0x498] sm:$0xff] %vm3262_vm1, %v7440_v33  ;;  %v7337_v26 = vpop.f32.mrb[92].mxu1 }
 0x758   :  { %v7441_v49 = vadd.f32 -1.8044444, %v7337_v26  ;;  %v7339_v25 = vpop.f32.mrb[93].mxu1 }
 0x759   :  { %v7442_v42 = vadd.f32 -1.8044444, %v7339_v25 }
 0x75a   :  { %7498 = vst [vmem:[#allocation9 + $0x4a0] sm:$0xff] %v7441_v49 }
 0x75b   :  { %7499 = vst.msk [vmem:[#allocation9 + $0x4a8] sm:$0xff] %vm3262_vm1, %v7442_v42  ;;  %v7344_v19 = vpop.f32.mrb[94].mxu1 }
 0x75c   :  { %v7443_v44 = vadd.f32 -1.8044444, %v7344_v19  ;;  %v7346_v10 = vpop.f32.mrb[95].mxu1 }
 0x75d   :  { %v7444_v41 = vadd.f32 -1.8044444, %v7346_v10 }
 0x75e   :  { %7500 = vst [vmem:[#allocation9 + $0x4b0] sm:$0xff] %v7443_v44 }
 0x75f   :  { %7501 = vst.msk [vmem:[#allocation9 + $0x4b8] sm:$0xff] %vm3262_vm1, %v7444_v41  ;;  %v7351_v53 = vpop.f32.mrb[96].mxu1 }
 0x760   :  { %v7445_v24 = vadd.f32 -1.8044444, %v7351_v53  ;;  %v7353_v0 = vpop.f32.mrb[97].mxu1 }
 0x761   :  { %v7446_v13 = vadd.f32 -1.8044444, %v7353_v0 }
 0x762   :  { %7502 = vst [vmem:[#allocation9 + $0x4c0] sm:$0xff] %v7445_v24 }
 0x763   :  { %7503 = vst.msk [vmem:[#allocation9 + $0x4c8] sm:$0xff] %vm3262_vm1, %v7446_v13  ;;  %v7358_v56 = vpop.f32.mrb[98].mxu1 }
 0x764   :  { %v7447_v36 = vadd.f32 -1.8044444, %v7358_v56  ;;  %v7360_v51 = vpop.f32.mrb[99].mxu1 }
 0x765   :  { %v7448_v32 = vadd.f32 -1.8044444, %v7360_v51 }
 0x766   :  { %7504 = vst [vmem:[#allocation9 + $0x4d0] sm:$0xff] %v7447_v36 }
 0x767   :  { %7505 = vst.msk [vmem:[#allocation9 + $0x4d8] sm:$0xff] %vm3262_vm1, %v7448_v32  ;;  %v7365_v45 = vpop.f32.mrb[100].mxu1 }
 0x768   :  { %v7449_v39 = vadd.f32 -1.8044444, %v7365_v45  ;;  %v7367_v12 = vpop.f32.mrb[101].mxu1 }
 0x769   :  { %v7450_v15 = vadd.f32 -1.8044444, %v7367_v12 }
 0x76a   :  { %7506 = vst [vmem:[#allocation9 + $0x4e0] sm:$0xff] %v7449_v39 }
 0x76b   :  { %7507 = vst.msk [vmem:[#allocation9 + $0x4e8] sm:$0xff] %vm3262_vm1, %v7450_v15  ;;  %v7372_v35 = vpop.f32.mrb[102].mxu1 }
 0x76c   :  { %v7451_v62 = vadd.f32 -1.8044444, %v7372_v35  ;;  %v7374_v17 = vpop.f32.mrb[103].mxu1 }
 0x76d   :  { %v7452_v21 = vadd.f32 -1.8044444, %v7374_v17 }
 0x76e   :  { %7508 = vst [vmem:[#allocation9 + $0x4f0] sm:$0xff] %v7451_v62 }
 0x76f   :  { %7509 = vst.msk [vmem:[#allocation9 + $0x4f8] sm:$0xff] %vm3262_vm1, %v7452_v21  ;;  %v7379_v46 = vpop.f32.mrb[104].mxu1 }
 0x770   :  { %v7453_v5 = vadd.f32 -1.8044444, %v7379_v46  ;;  %v7381_v14 = vpop.f32.mrb[105].mxu1 }
 0x771   :  { %v7454_v30 = vadd.f32 -1.8044444, %v7381_v14 }
 0x772   :  { %7510 = vst [vmem:[#allocation9 + $0x500] sm:$0xff] %v7453_v5 }
 0x773   :  { %7511 = vst.msk [vmem:[#allocation9 + $0x508] sm:$0xff] %vm3262_vm1, %v7454_v30  ;;  %v7386_v16 = vpop.f32.mrb[106].mxu1 }
 0x774   :  { %v7455_v55 = vadd.f32 -1.8044444, %v7386_v16  ;;  %v7388_v4 = vpop.f32.mrb[107].mxu1 }
 0x775   :  { %v7456_v34 = vadd.f32 -1.8044444, %v7388_v4 }
 0x776   :  { %7512 = vst [vmem:[#allocation9 + $0x510] sm:$0xff] %v7455_v55 }
 0x777   :  { %7513 = vst.msk [vmem:[#allocation9 + $0x518] sm:$0xff] %vm3262_vm1, %v7456_v34  ;;  %v7393_v3 = vpop.f32.mrb[108].mxu1 }
 0x778   :  { %v7457_v48 = vadd.f32 -1.8044444, %v7393_v3  ;;  %v7395_v27 = vpop.f32.mrb[109].mxu1 }
 0x779   :  { %v7458_v40 = vadd.f32 -1.8044444, %v7395_v27 }
 0x77a   :  { %7514 = vst [vmem:[#allocation9 + $0x520] sm:$0xff] %v7457_v48 }
 0x77b   :  { %7515 = vst.msk [vmem:[#allocation9 + $0x528] sm:$0xff] %vm3262_vm1, %v7458_v40  ;;  %v7400_v60 = vpop.f32.mrb[110].mxu1 }
 0x77c   :  { %v7459_v20 = vadd.f32 -1.8044444, %v7400_v60  ;;  %v7402_v9 = vpop.f32.mrb[111].mxu1 }
 0x77d   :  { %v7460_v31 = vadd.f32 -1.8044444, %v7402_v9 }
 0x77e   :  { %7516 = vst [vmem:[#allocation9 + $0x530] sm:$0xff] %v7459_v20 }
 0x77f   :  { %7517 = vst.msk [vmem:[#allocation9 + $0x538] sm:$0xff] %vm3262_vm1, %v7460_v31 }
 0x780   :  { %8778 = shalt.err (!%p8775_p0)
}
 0x781   :  { %s8779_s29 = scalar_lea.hbm %s11712_s3, 21504 }
 0x782   :  { %p8780_p1 = scmp.ne.s32.totalorder %s11712_s3, %s8779_s29  ;;  %p8783_p2 = scmp.lt.u32.totalorder %s8779_s29, %s11712_s3 }
 0x784   :  { %p8785_p3 = pnand %p8783_p2, %p8780_p1 }
 0x786   :  { %8788 = shalt.err (!%p8785_p3)
}
 0x787   :  { %7529 = dma.vmem_to_hbm [thread:$0]  %s7524_s25, 21504, %s11712_s3, [#allocation5], %s8796_s22, %s8796_s22, %s8797_s23  }
 0x788   :  { %8793 = dma.done.wait [#allocation5], 21504  }
 0x789   :  { %8794 = vsyncadd [#allocation5], 4294945792 }
 0x78a   :  { %7533 = vsyncpa [#allocation4], 1 }
 0x78b   :  { %7534 = vsyncpa [#allocation7], 1 }
 0x78c   :  { %7535 = vsyncpa [#allocation5], 1 }

</bundles_post_ra>
